<compile_context>
chip_gen: v6e
topology: v6e:2x2x1
jax: 0.10.0
libtpu: 0.0.40
codegen_flags: <defaults>
</compile_context>

<pallas_src>
import jax
import jax.numpy as jnp
from jax import lax
from jax.experimental import pallas as pl
from jax.experimental.pallas import tpu as pltpu

LANE = 128
SUBLANE = 8
HALO = 8  # top/bottom slab halo rows (>=2 needed; 8 keeps sublane alignment)


def _round_up(a, b):
    return (a + b - 1) // b * b


def _make_kernel(H, W, TH, Bt):
    """H, W: real image size; TH: row-tile height; Bt: images per grid step."""
    SH = TH + 2 * HALO  # slab height read per tile (aligned, includes halo)

    def kernel(x_ref, w_ref, b_ref, o_ref):
        # x_ref : (Bt, 3, Hp_in, Wp) padded input, resident across row tiles
        # w_ref : (81,) SMEM  (conv weight, flattened (3,3,3,3))
        # b_ref : (3,)  SMEM  (conv bias)
        # o_ref : (Bt, 3, TH, Wp)
        it = pl.program_id(1)
        row0 = pl.multiple_of(it * TH, SUBLANE)     # slab start (padded coords)
        Wp = x_ref.shape[-1]

        # ---- masks (built once per grid step, shared by all Bt images) ----
        col_t = lax.broadcasted_iota(jnp.int32, (TH, Wp), 1)
        not_last = col_t < (Wp - 1)   # keep-mask after a "+1 column" shift
        not_first = col_t >= 1        # keep-mask after a "-1 column" shift

        col_s = lax.broadcasted_iota(jnp.int32, (SH, Wp), 1)
        row_s = lax.broadcasted_iota(jnp.int32, (SH, Wp), 0)
        orig_row = row_s + (row0 - HALO)            # slab row -> original row
        valid = (orig_row >= 0) & (orig_row < H) & (col_s < W)
        s_not_last = col_s < (Wp - 1)
        s_not_first = col_s >= 1

        def shift_cols_tile(a, d):
            # a[:, j] -> a[:, j + d] with zero fill outside [0, Wp); |d| == 1.
            if d == 0:
                return a
            rolled = pltpu.roll(a, shift=(-d) % Wp, axis=1)      # XLU lane roll
            return jnp.where(not_last if d > 0 else not_first, rolled, 0.0)

        for bt in range(Bt):  # static unroll (Bt is small)
            xs = x_ref[bt, :, pl.ds(row0, SH), :]                # (3, SH, Wp)
            r, g, b = xs[0], xs[1], xs[2]

            # ---------- color_computing: RGB -> HLS, keep H and L ----------
            vmax = jnp.maximum(jnp.maximum(r, g), b)
            vmin = jnp.minimum(jnp.minimum(r, g), b)
            l_ch = 0.5 * (vmax + vmin)
            diff = vmax - vmin
            inv = pl.reciprocal(jnp.where(diff == 0.0, 1.0, diff), approx=True)
            h_ch = jnp.where(
                vmax == r, 60.0 * (g - b) * inv,
                jnp.where(vmax == g,
                          120.0 + 60.0 * (b - r) * inv,
                          240.0 + 60.0 * (r - g) * inv))
            h_ch = jnp.where(h_ch < 0.0, h_ch + 360.0, h_ch)
            h_ch = jnp.where(diff == 0.0, 0.0, h_ch)

            # ---------- edge_computing (gradient-magnitude HOG stand-in) ----------
            gray = 0.299 * r + 0.587 * g + 0.114 * b
            gxp = jnp.where(s_not_last,
                            pltpu.roll(gray, shift=Wp - 1, axis=1), 0.0)  # gray[j+1]
            gxm = jnp.where(s_not_first,
                            pltpu.roll(gray, shift=1, axis=1), 0.0)       # gray[j-1]
            gyp = pltpu.roll(gray, shift=SH - 1, axis=0)                  # gray[s+1]
            gym = pltpu.roll(gray, shift=1, axis=0)                       # gray[s-1]
            gx = gxp - gxm
            gy = gyp - gym
            # central difference (x0.5) and rescale_intensity in_range=(0,10) (x0.1)
            edge = jnp.clip(jnp.sqrt(gx * gx + gy * gy) * 0.05, 0.0, 1.0)

            # zero the embedding outside the real HxW image so the 3x3 conv sees
            # exactly the reference zero padding at every border
            emb = [jnp.where(valid, c, 0.0) for c in (h_ch, l_ch, edge)]

            # ---------- 3x3 conv: tap-outer, output-channel-inner ----------
            acc = [jnp.full((TH, Wp), b_ref[oc], jnp.float32) for oc in range(3)]
            for ic in range(3):
                for ky in range(3):
                    dy = ky - 1
                    rt_full = emb[ic] if dy == 0 else pltpu.roll(
                        emb[ic], shift=(-dy) % SH, axis=0)       # XLU sublane roll
                    rt = rt_full[HALO:HALO + TH, :]              # aligned slice
                    for kx in range(3):
                        tap = shift_cols_tile(rt, kx - 1)        # reused by all oc
                        for oc in range(3):
                            wv = w_ref[((oc * 3 + ic) * 3 + ky) * 3 + kx]
                            acc[oc] = acc[oc] + wv * tap

            # ---------- residual add, one stacked lane-dense store ----------
            xc = xs[:, HALO:HALO + TH, :]                        # (3, TH, Wp)
            out = jnp.stack([xc[oc] + acc[oc] for oc in range(3)], axis=0)
            o_ref[bt] = out

    return kernel


def dkgm_block(x, conv_w, conv_b):
    """x: (B, 3, H, W) f32; conv_w: (3, 3, 3, 3) f32; conv_b: (3,) f32."""
    B, C, H, W = x.shape
    assert C == 3, "DKGMBlock expects RGB input"

    Wp = _round_up(W, LANE)                      # lane-dense width

    # Row-tile height: keep the ~20 f32 slab-sized temporaries under ~4 MiB.
    slab_row_bytes = 20 * Wp * 4
    th_cap = max(SUBLANE, min(256, (4 << 20) // slab_row_bytes // SUBLANE * SUBLANE))
    nt = -(-H // th_cap)
    TH = _round_up(-(-H // nt), SUBLANE)
    Hp_out = TH * nt
    Hp_in = Hp_out + 2 * HALO
    # TODO(synk): for very large images (input block > ~24 MiB) the resident
    # whole-image input block should itself be halo-tiled via manual DMA.

    # Pack small images along batch (static unroll in kernel) to amortize the
    # ~0.35us per-grid-step overhead.
    img_bytes = 3 * Hp_in * Wp * 4
    Bt = int(max(1, min(B, 8, (2 << 20) // img_bytes)))
    Bp = _round_up(B, Bt)
    nb = Bp // Bt

    # Zero-padded input: 8 halo rows top/bottom, W padded to a lane multiple.
    xp = jnp.zeros((Bp, 3, Hp_in, Wp), jnp.float32)
    xp = xp.at[:B, :, HALO:HALO + H, :W].set(x.astype(jnp.float32))

    w_flat = conv_w.reshape(-1).astype(jnp.float32)
    b_flat = conv_b.reshape(-1).astype(jnp.float32)

    kernel = _make_kernel(H, W, TH, Bt)

    cost = pl.CostEstimate(
        flops=int(230 * Bp * Hp_out * Wp),
        transcendentals=int(2 * Bp * Hp_out * Wp),
        bytes_accessed=int(2 * Bp * 3 * Hp_out * Wp * 4),
    )

    out_p = pl.pallas_call(
        kernel,
        out_shape=jax.ShapeDtypeStruct((Bp, 3, Hp_out, Wp), jnp.float32),
        grid=(nb, nt),
        in_specs=[
            # whole padded image block; resident across row tiles (index ignores it)
            pl.BlockSpec((Bt, 3, Hp_in, Wp), lambda ib, it: (ib, 0, 0, 0)),
            pl.BlockSpec(memory_space=pltpu.MemorySpace.SMEM),
            pl.BlockSpec(memory_space=pltpu.MemorySpace.SMEM),
        ],
        out_specs=pl.BlockSpec((Bt, 3, TH, Wp), lambda ib, it: (ib, 0, it, 0)),
        compiler_params=pltpu.CompilerParams(
            dimension_semantics=("parallel", "parallel"),
            vmem_limit_bytes=48 * 1024 * 1024,
        ),
        cost_estimate=cost,
    )(xp, w_flat, b_flat)

    return out_p[:B, :, :H, :W]


def _reference(x, conv_w, conv_b):
    """Pure-JAX mirror of the kernel math (exact divisions), for validation."""
    r, g, b = x[:, 0], x[:, 1], x[:, 2]
    vmax = jnp.maximum(jnp.maximum(r, g), b)
    vmin = jnp.minimum(jnp.minimum(r, g), b)
    l_ch = 0.5 * (vmax + vmin)
    diff = vmax - vmin
    safe = jnp.where(diff == 0.0, 1.0, diff)
    h_ch = jnp.where(
        vmax == r, 60.0 * (g - b) / safe,
        jnp.where(vmax == g,
                  120.0 + 60.0 * (b - r) / safe,
                  240.0 + 60.0 * (r - g) / safe))
    h_ch = jnp.where(h_ch < 0.0, h_ch + 360.0, h_ch)
    h_ch = jnp.where(diff == 0.0, 0.0, h_ch)

    gray = 0.299 * r + 0.587 * g + 0.114 * b
    gp = jnp.pad(gray, ((0, 0), (1, 1), (1, 1)))
    gx = gp[:, 1:-1, 2:] - gp[:, 1:-1, :-2]
    gy = gp[:, 2:, 1:-1] - gp[:, :-2, 1:-1]
    edge = jnp.clip(jnp.sqrt(gx * gx + gy * gy) * 0.05, 0.0, 1.0)

    emb = jnp.stack([h_ch, l_ch, edge], axis=1)
    conv = lax.conv_general_dilated(
        emb, conv_w, window_strides=(1, 1), padding=((1, 1), (1, 1)),
        dimension_numbers=("NCHW", "OIHW", "NCHW"))
    return x + conv + conv_b.reshape(1, 3, 1, 1)


if __name__ == "__main__":
    # Deterministic small example: batch=2, 3 channels, 16x16 spatial.
    key = jax.random.PRNGKey(0)
    key_x, key_w, key_b = jax.random.split(key, 3)
    x = jax.random.uniform(key_x, (2, 3, 16, 16), dtype=jnp.float32)

    # Deterministic conv parameters (nn.Conv2d(3, 3, 3, padding=1) shapes).
    fan_in = 3 * 3 * 3
    conv_w = jax.random.normal(key_w, (3, 3, 3, 3), dtype=jnp.float32) / jnp.sqrt(fan_in)
    conv_b = jax.random.normal(key_b, (3,), dtype=jnp.float32) * 0.01

    out = dkgm_block(x, conv_w, conv_b)
    jax.block_until_ready(out)
    assert out.shape == x.shape and out.dtype == jnp.float32

    # Validate against the pure-JAX reference (loose tol: approx reciprocal).
    ref = _reference(x, conv_w, conv_b)
    rel_err = float(jnp.max(jnp.abs(out - ref)) / (jnp.max(jnp.abs(ref)) + 1e-6))
    assert rel_err < 1e-2, f"mismatch vs reference: rel_err={rel_err}"

    print("KERNEL_OK")
</pallas_src>

<mosaic_0001>
module attributes {stable_mosaic.version = 11 : i64} {
  func.func @kernel(%arg0: i32, %arg1: i32, %arg2: memref<2x3x32x128xf32, #tpu.memory_space<vmem>>, %arg3: memref<81xf32, #tpu.memory_space<smem>>, %arg4: memref<3xf32, #tpu.memory_space<smem>>, %arg5: memref<2x3x16x128xf32, #tpu.memory_space<vmem>>) attributes {dimension_semantics = [#tpu.dimension_semantics<parallel>, #tpu.dimension_semantics<parallel>], iteration_bounds = array<i64: 1, 1>, scalar_prefetch = 0 : i64, scratch_operands = 0 : i64, tpu.core_type = #tpu.core_type<tc>, window_params = [{transform_indices = @transform_0, window_bounds = array<i64: 2, 3, 32, 128>}, {transform_indices = @transform_1, window_bounds = array<i64: 81>}, {transform_indices = @transform_2, window_bounds = array<i64: 3>}, {transform_indices = @transform_3, window_bounds = array<i64: 2, 3, 16, 128>}]} {
    %c16_i32 = arith.constant 16 : i32
    %0 = arith.muli %arg1, %c16_i32 : i32
    %1 = tpu.assume_multiple %0, 8 : i32
    %2 = tpu.iota {dimensions = array<i32: 1>} : vector<16x128xi32>
    %c127_i32 = arith.constant 127 : i32
    %3 = vector.broadcast %c127_i32 : i32 to vector<16x128xi32>
    %4 = arith.cmpi slt, %2, %3 : vector<16x128xi32>
    %c1_i32 = arith.constant 1 : i32
    %5 = vector.broadcast %c1_i32 : i32 to vector<16x128xi32>
    %6 = arith.cmpi sge, %2, %5 : vector<16x128xi32>
    %7 = tpu.iota {dimensions = array<i32: 1>} : vector<32x128xi32>
    %8 = tpu.iota {dimensions = array<i32: 0>} : vector<32x128xi32>
    %c8_i32 = arith.constant 8 : i32
    %9 = arith.subi %1, %c8_i32 : i32
    %10 = vector.broadcast %9 : i32 to vector<32x128xi32>
    %11 = arith.addi %8, %10 : vector<32x128xi32>
    %c0_i32 = arith.constant 0 : i32
    %12 = vector.broadcast %c0_i32 : i32 to vector<32x128xi32>
    %13 = arith.cmpi sge, %11, %12 : vector<32x128xi32>
    %c16_i32_0 = arith.constant 16 : i32
    %14 = vector.broadcast %c16_i32_0 : i32 to vector<32x128xi32>
    %15 = arith.cmpi slt, %11, %14 : vector<32x128xi32>
    %16 = arith.andi %13, %15 : vector<32x128xi1>
    %c16_i32_1 = arith.constant 16 : i32
    %17 = vector.broadcast %c16_i32_1 : i32 to vector<32x128xi32>
    %18 = arith.cmpi slt, %7, %17 : vector<32x128xi32>
    %19 = arith.andi %16, %18 : vector<32x128xi1>
    %c127_i32_2 = arith.constant 127 : i32
    %20 = vector.broadcast %c127_i32_2 : i32 to vector<32x128xi32>
    %21 = arith.cmpi slt, %7, %20 : vector<32x128xi32>
    %c1_i32_3 = arith.constant 1 : i32
    %22 = vector.broadcast %c1_i32_3 : i32 to vector<32x128xi32>
    %23 = arith.cmpi sge, %7, %22 : vector<32x128xi32>
    %c0 = arith.constant 0 : index
    %c0_4 = arith.constant 0 : index
    %24 = arith.index_cast %1 : i32 to index
    %c0_5 = arith.constant 0 : index
    %25 = vector.load %arg2[%c0, %c0_4, %24, %c0_5] : memref<2x3x32x128xf32, #tpu.memory_space<vmem>>, vector<1x3x32x128xf32>
    %26 = vector.shape_cast %25 : vector<1x3x32x128xf32> to vector<3x32x128xf32>
    %27 = vector.extract_strided_slice %26 {offsets = [0, 0, 0], sizes = [1, 32, 128], strides = [1, 1, 1]} : vector<3x32x128xf32> to vector<1x32x128xf32>
    %28 = vector.shape_cast %27 : vector<1x32x128xf32> to vector<32x128xf32>
    %29 = vector.extract_strided_slice %26 {offsets = [1, 0, 0], sizes = [1, 32, 128], strides = [1, 1, 1]} : vector<3x32x128xf32> to vector<1x32x128xf32>
    %30 = vector.shape_cast %29 : vector<1x32x128xf32> to vector<32x128xf32>
    %31 = vector.extract_strided_slice %26 {offsets = [2, 0, 0], sizes = [1, 32, 128], strides = [1, 1, 1]} : vector<3x32x128xf32> to vector<1x32x128xf32>
    %32 = vector.shape_cast %31 : vector<1x32x128xf32> to vector<32x128xf32>
    %33 = arith.maximumf %28, %30 : vector<32x128xf32>
    %34 = arith.maximumf %33, %32 : vector<32x128xf32>
    %35 = arith.minimumf %28, %30 : vector<32x128xf32>
    %36 = arith.minimumf %35, %32 : vector<32x128xf32>
    %37 = arith.addf %34, %36 : vector<32x128xf32>
    %cst = arith.constant 5.000000e-01 : f32
    %38 = vector.broadcast %cst : f32 to vector<32x128xf32>
    %39 = arith.mulf %38, %37 : vector<32x128xf32>
    %40 = arith.subf %34, %36 : vector<32x128xf32>
    %cst_6 = arith.constant 0.000000e+00 : f32
    %41 = vector.broadcast %cst_6 : f32 to vector<32x128xf32>
    %42 = arith.cmpf oeq, %40, %41 : vector<32x128xf32>
    %cst_7 = arith.constant 1.000000e+00 : f32
    %43 = vector.broadcast %cst_7 : f32 to vector<32x128xf32>
    %44 = arith.select %42, %43, %40 : vector<32x128xi1>, vector<32x128xf32>
    %45 = tpu.reciprocal %44 {approx = true} : vector<32x128xf32> -> vector<32x128xf32>
    %46 = arith.cmpf oeq, %34, %28 : vector<32x128xf32>
    %47 = arith.subf %30, %32 : vector<32x128xf32>
    %cst_8 = arith.constant 6.000000e+01 : f32
    %48 = vector.broadcast %cst_8 : f32 to vector<32x128xf32>
    %49 = arith.mulf %48, %47 : vector<32x128xf32>
    %50 = arith.mulf %49, %45 : vector<32x128xf32>
    %51 = arith.cmpf oeq, %34, %30 : vector<32x128xf32>
    %52 = arith.subf %32, %28 : vector<32x128xf32>
    %cst_9 = arith.constant 6.000000e+01 : f32
    %53 = vector.broadcast %cst_9 : f32 to vector<32x128xf32>
    %54 = arith.mulf %53, %52 : vector<32x128xf32>
    %55 = arith.mulf %54, %45 : vector<32x128xf32>
    %cst_10 = arith.constant 1.200000e+02 : f32
    %56 = vector.broadcast %cst_10 : f32 to vector<32x128xf32>
    %57 = arith.addf %56, %55 : vector<32x128xf32>
    %58 = arith.subf %28, %30 : vector<32x128xf32>
    %cst_11 = arith.constant 6.000000e+01 : f32
    %59 = vector.broadcast %cst_11 : f32 to vector<32x128xf32>
    %60 = arith.mulf %59, %58 : vector<32x128xf32>
    %61 = arith.mulf %60, %45 : vector<32x128xf32>
    %cst_12 = arith.constant 2.400000e+02 : f32
    %62 = vector.broadcast %cst_12 : f32 to vector<32x128xf32>
    %63 = arith.addf %62, %61 : vector<32x128xf32>
    %64 = arith.select %51, %57, %63 : vector<32x128xi1>, vector<32x128xf32>
    %65 = arith.select %46, %50, %64 : vector<32x128xi1>, vector<32x128xf32>
    %cst_13 = arith.constant 0.000000e+00 : f32
    %66 = vector.broadcast %cst_13 : f32 to vector<32x128xf32>
    %67 = arith.cmpf olt, %65, %66 : vector<32x128xf32>
    %cst_14 = arith.constant 3.600000e+02 : f32
    %68 = vector.broadcast %cst_14 : f32 to vector<32x128xf32>
    %69 = arith.addf %65, %68 : vector<32x128xf32>
    %70 = arith.select %67, %69, %65 : vector<32x128xi1>, vector<32x128xf32>
    %cst_15 = arith.constant 0.000000e+00 : f32
    %71 = vector.broadcast %cst_15 : f32 to vector<32x128xf32>
    %72 = arith.cmpf oeq, %40, %71 : vector<32x128xf32>
    %cst_16 = arith.constant 0.000000e+00 : f32
    %73 = vector.broadcast %cst_16 : f32 to vector<32x128xf32>
    %74 = arith.select %72, %73, %70 : vector<32x128xi1>, vector<32x128xf32>
    %cst_17 = arith.constant 2.990000e-01 : f32
    %75 = vector.broadcast %cst_17 : f32 to vector<32x128xf32>
    %76 = arith.mulf %75, %28 : vector<32x128xf32>
    %cst_18 = arith.constant 5.870000e-01 : f32
    %77 = vector.broadcast %cst_18 : f32 to vector<32x128xf32>
    %78 = arith.mulf %77, %30 : vector<32x128xf32>
    %79 = arith.addf %76, %78 : vector<32x128xf32>
    %cst_19 = arith.constant 1.140000e-01 : f32
    %80 = vector.broadcast %cst_19 : f32 to vector<32x128xf32>
    %81 = arith.mulf %80, %32 : vector<32x128xf32>
    %82 = arith.addf %79, %81 : vector<32x128xf32>
    %c127_i32_20 = arith.constant 127 : i32
    %83 = tpu.dynamic_rotate %82 by %c127_i32_20 dim 1 : vector<32x128xf32>, i32 -> vector<32x128xf32>
    %cst_21 = arith.constant 0.000000e+00 : f32
    %84 = vector.broadcast %cst_21 : f32 to vector<32x128xf32>
    %85 = arith.select %21, %83, %84 : vector<32x128xi1>, vector<32x128xf32>
    %c1_i32_22 = arith.constant 1 : i32
    %86 = tpu.dynamic_rotate %82 by %c1_i32_22 dim 1 : vector<32x128xf32>, i32 -> vector<32x128xf32>
    %cst_23 = arith.constant 0.000000e+00 : f32
    %87 = vector.broadcast %cst_23 : f32 to vector<32x128xf32>
    %88 = arith.select %23, %86, %87 : vector<32x128xi1>, vector<32x128xf32>
    %c31_i32 = arith.constant 31 : i32
    %89 = tpu.dynamic_rotate %82 by %c31_i32 dim 0 : vector<32x128xf32>, i32 -> vector<32x128xf32>
    %c1_i32_24 = arith.constant 1 : i32
    %90 = tpu.dynamic_rotate %82 by %c1_i32_24 dim 0 : vector<32x128xf32>, i32 -> vector<32x128xf32>
    %91 = arith.subf %85, %88 : vector<32x128xf32>
    %92 = arith.subf %89, %90 : vector<32x128xf32>
    %93 = arith.mulf %91, %91 : vector<32x128xf32>
    %94 = arith.mulf %92, %92 : vector<32x128xf32>
    %95 = arith.addf %93, %94 : vector<32x128xf32>
    %96 = math.sqrt %95 : vector<32x128xf32>
    %cst_25 = arith.constant 5.000000e-02 : f32
    %97 = vector.broadcast %cst_25 : f32 to vector<32x128xf32>
    %98 = arith.mulf %96, %97 : vector<32x128xf32>
    %cst_26 = arith.constant 0.000000e+00 : f32
    %cst_27 = arith.constant 1.000000e+00 : f32
    %99 = vector.broadcast %cst_26 : f32 to vector<32x128xf32>
    %100 = arith.maximumf %99, %98 : vector<32x128xf32>
    %101 = vector.broadcast %cst_27 : f32 to vector<32x128xf32>
    %102 = arith.minimumf %101, %100 : vector<32x128xf32>
    %cst_28 = arith.constant 0.000000e+00 : f32
    %103 = vector.broadcast %cst_28 : f32 to vector<32x128xf32>
    %104 = arith.select %19, %74, %103 : vector<32x128xi1>, vector<32x128xf32>
    %cst_29 = arith.constant 0.000000e+00 : f32
    %105 = vector.broadcast %cst_29 : f32 to vector<32x128xf32>
    %106 = arith.select %19, %39, %105 : vector<32x128xi1>, vector<32x128xf32>
    %cst_30 = arith.constant 0.000000e+00 : f32
    %107 = vector.broadcast %cst_30 : f32 to vector<32x128xf32>
    %108 = arith.select %19, %102, %107 : vector<32x128xi1>, vector<32x128xf32>
    %c0_31 = arith.constant 0 : index
    %109 = memref.load %arg4[%c0_31] : memref<3xf32, #tpu.memory_space<smem>>
    %110 = vector.broadcast %109 : f32 to vector<16x128xf32>
    %c1 = arith.constant 1 : index
    %111 = memref.load %arg4[%c1] : memref<3xf32, #tpu.memory_space<smem>>
    %112 = vector.broadcast %111 : f32 to vector<16x128xf32>
    %c2 = arith.constant 2 : index
    %113 = memref.load %arg4[%c2] : memref<3xf32, #tpu.memory_space<smem>>
    %114 = vector.broadcast %113 : f32 to vector<16x128xf32>
    %c1_i32_32 = arith.constant 1 : i32
    %115 = tpu.dynamic_rotate %104 by %c1_i32_32 dim 0 : vector<32x128xf32>, i32 -> vector<32x128xf32>
    %116 = vector.extract_strided_slice %115 {offsets = [8, 0], sizes = [16, 128], strides = [1, 1]} : vector<32x128xf32> to vector<16x128xf32>
    %c1_i32_33 = arith.constant 1 : i32
    %117 = tpu.dynamic_rotate %116 by %c1_i32_33 dim 1 : vector<16x128xf32>, i32 -> vector<16x128xf32>
    %cst_34 = arith.constant 0.000000e+00 : f32
    %118 = vector.broadcast %cst_34 : f32 to vector<16x128xf32>
    %119 = arith.select %6, %117, %118 : vector<16x128xi1>, vector<16x128xf32>
    %c0_35 = arith.constant 0 : index
    %120 = memref.load %arg3[%c0_35] : memref<81xf32, #tpu.memory_space<smem>>
    %121 = vector.broadcast %120 : f32 to vector<16x128xf32>
    %122 = arith.mulf %121, %119 : vector<16x128xf32>
    %123 = arith.addf %110, %122 : vector<16x128xf32>
    %c27 = arith.constant 27 : index
    %124 = memref.load %arg3[%c27] : memref<81xf32, #tpu.memory_space<smem>>
    %125 = vector.broadcast %124 : f32 to vector<16x128xf32>
    %126 = arith.mulf %125, %119 : vector<16x128xf32>
    %127 = arith.addf %112, %126 : vector<16x128xf32>
    %c54 = arith.constant 54 : index
    %128 = memref.load %arg3[%c54] : memref<81xf32, #tpu.memory_space<smem>>
    %129 = vector.broadcast %128 : f32 to vector<16x128xf32>
    %130 = arith.mulf %129, %119 : vector<16x128xf32>
    %131 = arith.addf %114, %130 : vector<16x128xf32>
    %c1_36 = arith.constant 1 : index
    %132 = memref.load %arg3[%c1_36] : memref<81xf32, #tpu.memory_space<smem>>
    %133 = vector.broadcast %132 : f32 to vector<16x128xf32>
    %134 = arith.mulf %133, %116 : vector<16x128xf32>
    %135 = arith.addf %123, %134 : vector<16x128xf32>
    %c28 = arith.constant 28 : index
    %136 = memref.load %arg3[%c28] : memref<81xf32, #tpu.memory_space<smem>>
    %137 = vector.broadcast %136 : f32 to vector<16x128xf32>
    %138 = arith.mulf %137, %116 : vector<16x128xf32>
    %139 = arith.addf %127, %138 : vector<16x128xf32>
    %c55 = arith.constant 55 : index
    %140 = memref.load %arg3[%c55] : memref<81xf32, #tpu.memory_space<smem>>
    %141 = vector.broadcast %140 : f32 to vector<16x128xf32>
    %142 = arith.mulf %141, %116 : vector<16x128xf32>
    %143 = arith.addf %131, %142 : vector<16x128xf32>
    %c127_i32_37 = arith.constant 127 : i32
    %144 = tpu.dynamic_rotate %116 by %c127_i32_37 dim 1 : vector<16x128xf32>, i32 -> vector<16x128xf32>
    %cst_38 = arith.constant 0.000000e+00 : f32
    %145 = vector.broadcast %cst_38 : f32 to vector<16x128xf32>
    %146 = arith.select %4, %144, %145 : vector<16x128xi1>, vector<16x128xf32>
    %c2_39 = arith.constant 2 : index
    %147 = memref.load %arg3[%c2_39] : memref<81xf32, #tpu.memory_space<smem>>
    %148 = vector.broadcast %147 : f32 to vector<16x128xf32>
    %149 = arith.mulf %148, %146 : vector<16x128xf32>
    %150 = arith.addf %135, %149 : vector<16x128xf32>
    %c29 = arith.constant 29 : index
    %151 = memref.load %arg3[%c29] : memref<81xf32, #tpu.memory_space<smem>>
    %152 = vector.broadcast %151 : f32 to vector<16x128xf32>
    %153 = arith.mulf %152, %146 : vector<16x128xf32>
    %154 = arith.addf %139, %153 : vector<16x128xf32>
    %c56 = arith.constant 56 : index
    %155 = memref.load %arg3[%c56] : memref<81xf32, #tpu.memory_space<smem>>
    %156 = vector.broadcast %155 : f32 to vector<16x128xf32>
    %157 = arith.mulf %156, %146 : vector<16x128xf32>
    %158 = arith.addf %143, %157 : vector<16x128xf32>
    %159 = vector.extract_strided_slice %104 {offsets = [8, 0], sizes = [16, 128], strides = [1, 1]} : vector<32x128xf32> to vector<16x128xf32>
    %c1_i32_40 = arith.constant 1 : i32
    %160 = tpu.dynamic_rotate %159 by %c1_i32_40 dim 1 : vector<16x128xf32>, i32 -> vector<16x128xf32>
    %cst_41 = arith.constant 0.000000e+00 : f32
    %161 = vector.broadcast %cst_41 : f32 to vector<16x128xf32>
    %162 = arith.select %6, %160, %161 : vector<16x128xi1>, vector<16x128xf32>
    %c3 = arith.constant 3 : index
    %163 = memref.load %arg3[%c3] : memref<81xf32, #tpu.memory_space<smem>>
    %164 = vector.broadcast %163 : f32 to vector<16x128xf32>
    %165 = arith.mulf %164, %162 : vector<16x128xf32>
    %166 = arith.addf %150, %165 : vector<16x128xf32>
    %c30 = arith.constant 30 : index
    %167 = memref.load %arg3[%c30] : memref<81xf32, #tpu.memory_space<smem>>
    %168 = vector.broadcast %167 : f32 to vector<16x128xf32>
    %169 = arith.mulf %168, %162 : vector<16x128xf32>
    %170 = arith.addf %154, %169 : vector<16x128xf32>
    %c57 = arith.constant 57 : index
    %171 = memref.load %arg3[%c57] : memref<81xf32, #tpu.memory_space<smem>>
    %172 = vector.broadcast %171 : f32 to vector<16x128xf32>
    %173 = arith.mulf %172, %162 : vector<16x128xf32>
    %174 = arith.addf %158, %173 : vector<16x128xf32>
    %c4 = arith.constant 4 : index
    %175 = memref.load %arg3[%c4] : memref<81xf32, #tpu.memory_space<smem>>
    %176 = vector.broadcast %175 : f32 to vector<16x128xf32>
    %177 = arith.mulf %176, %159 : vector<16x128xf32>
    %178 = arith.addf %166, %177 : vector<16x128xf32>
    %c31 = arith.constant 31 : index
    %179 = memref.load %arg3[%c31] : memref<81xf32, #tpu.memory_space<smem>>
    %180 = vector.broadcast %179 : f32 to vector<16x128xf32>
    %181 = arith.mulf %180, %159 : vector<16x128xf32>
    %182 = arith.addf %170, %181 : vector<16x128xf32>
    %c58 = arith.constant 58 : index
    %183 = memref.load %arg3[%c58] : memref<81xf32, #tpu.memory_space<smem>>
    %184 = vector.broadcast %183 : f32 to vector<16x128xf32>
    %185 = arith.mulf %184, %159 : vector<16x128xf32>
    %186 = arith.addf %174, %185 : vector<16x128xf32>
    %c127_i32_42 = arith.constant 127 : i32
    %187 = tpu.dynamic_rotate %159 by %c127_i32_42 dim 1 : vector<16x128xf32>, i32 -> vector<16x128xf32>
    %cst_43 = arith.constant 0.000000e+00 : f32
    %188 = vector.broadcast %cst_43 : f32 to vector<16x128xf32>
    %189 = arith.select %4, %187, %188 : vector<16x128xi1>, vector<16x128xf32>
    %c5 = arith.constant 5 : index
    %190 = memref.load %arg3[%c5] : memref<81xf32, #tpu.memory_space<smem>>
    %191 = vector.broadcast %190 : f32 to vector<16x128xf32>
    %192 = arith.mulf %191, %189 : vector<16x128xf32>
    %193 = arith.addf %178, %192 : vector<16x128xf32>
    %c32 = arith.constant 32 : index
    %194 = memref.load %arg3[%c32] : memref<81xf32, #tpu.memory_space<smem>>
    %195 = vector.broadcast %194 : f32 to vector<16x128xf32>
    %196 = arith.mulf %195, %189 : vector<16x128xf32>
    %197 = arith.addf %182, %196 : vector<16x128xf32>
    %c59 = arith.constant 59 : index
    %198 = memref.load %arg3[%c59] : memref<81xf32, #tpu.memory_space<smem>>
    %199 = vector.broadcast %198 : f32 to vector<16x128xf32>
    %200 = arith.mulf %199, %189 : vector<16x128xf32>
    %201 = arith.addf %186, %200 : vector<16x128xf32>
    %c31_i32_44 = arith.constant 31 : i32
    %202 = tpu.dynamic_rotate %104 by %c31_i32_44 dim 0 : vector<32x128xf32>, i32 -> vector<32x128xf32>
    %203 = vector.extract_strided_slice %202 {offsets = [8, 0], sizes = [16, 128], strides = [1, 1]} : vector<32x128xf32> to vector<16x128xf32>
    %c1_i32_45 = arith.constant 1 : i32
    %204 = tpu.dynamic_rotate %203 by %c1_i32_45 dim 1 : vector<16x128xf32>, i32 -> vector<16x128xf32>
    %cst_46 = arith.constant 0.000000e+00 : f32
    %205 = vector.broadcast %cst_46 : f32 to vector<16x128xf32>
    %206 = arith.select %6, %204, %205 : vector<16x128xi1>, vector<16x128xf32>
    %c6 = arith.constant 6 : index
    %207 = memref.load %arg3[%c6] : memref<81xf32, #tpu.memory_space<smem>>
    %208 = vector.broadcast %207 : f32 to vector<16x128xf32>
    %209 = arith.mulf %208, %206 : vector<16x128xf32>
    %210 = arith.addf %193, %209 : vector<16x128xf32>
    %c33 = arith.constant 33 : index
    %211 = memref.load %arg3[%c33] : memref<81xf32, #tpu.memory_space<smem>>
    %212 = vector.broadcast %211 : f32 to vector<16x128xf32>
    %213 = arith.mulf %212, %206 : vector<16x128xf32>
    %214 = arith.addf %197, %213 : vector<16x128xf32>
    %c60 = arith.constant 60 : index
    %215 = memref.load %arg3[%c60] : memref<81xf32, #tpu.memory_space<smem>>
    %216 = vector.broadcast %215 : f32 to vector<16x128xf32>
    %217 = arith.mulf %216, %206 : vector<16x128xf32>
    %218 = arith.addf %201, %217 : vector<16x128xf32>
    %c7 = arith.constant 7 : index
    %219 = memref.load %arg3[%c7] : memref<81xf32, #tpu.memory_space<smem>>
    %220 = vector.broadcast %219 : f32 to vector<16x128xf32>
    %221 = arith.mulf %220, %203 : vector<16x128xf32>
    %222 = arith.addf %210, %221 : vector<16x128xf32>
    %c34 = arith.constant 34 : index
    %223 = memref.load %arg3[%c34] : memref<81xf32, #tpu.memory_space<smem>>
    %224 = vector.broadcast %223 : f32 to vector<16x128xf32>
    %225 = arith.mulf %224, %203 : vector<16x128xf32>
    %226 = arith.addf %214, %225 : vector<16x128xf32>
    %c61 = arith.constant 61 : index
    %227 = memref.load %arg3[%c61] : memref<81xf32, #tpu.memory_space<smem>>
    %228 = vector.broadcast %227 : f32 to vector<16x128xf32>
    %229 = arith.mulf %228, %203 : vector<16x128xf32>
    %230 = arith.addf %218, %229 : vector<16x128xf32>
    %c127_i32_47 = arith.constant 127 : i32
    %231 = tpu.dynamic_rotate %203 by %c127_i32_47 dim 1 : vector<16x128xf32>, i32 -> vector<16x128xf32>
    %cst_48 = arith.constant 0.000000e+00 : f32
    %232 = vector.broadcast %cst_48 : f32 to vector<16x128xf32>
    %233 = arith.select %4, %231, %232 : vector<16x128xi1>, vector<16x128xf32>
    %c8 = arith.constant 8 : index
    %234 = memref.load %arg3[%c8] : memref<81xf32, #tpu.memory_space<smem>>
    %235 = vector.broadcast %234 : f32 to vector<16x128xf32>
    %236 = arith.mulf %235, %233 : vector<16x128xf32>
    %237 = arith.addf %222, %236 : vector<16x128xf32>
    %c35 = arith.constant 35 : index
    %238 = memref.load %arg3[%c35] : memref<81xf32, #tpu.memory_space<smem>>
    %239 = vector.broadcast %238 : f32 to vector<16x128xf32>
    %240 = arith.mulf %239, %233 : vector<16x128xf32>
    %241 = arith.addf %226, %240 : vector<16x128xf32>
    %c62 = arith.constant 62 : index
    %242 = memref.load %arg3[%c62] : memref<81xf32, #tpu.memory_space<smem>>
    %243 = vector.broadcast %242 : f32 to vector<16x128xf32>
    %244 = arith.mulf %243, %233 : vector<16x128xf32>
    %245 = arith.addf %230, %244 : vector<16x128xf32>
    %c1_i32_49 = arith.constant 1 : i32
    %246 = tpu.dynamic_rotate %106 by %c1_i32_49 dim 0 : vector<32x128xf32>, i32 -> vector<32x128xf32>
    %247 = vector.extract_strided_slice %246 {offsets = [8, 0], sizes = [16, 128], strides = [1, 1]} : vector<32x128xf32> to vector<16x128xf32>
    %c1_i32_50 = arith.constant 1 : i32
    %248 = tpu.dynamic_rotate %247 by %c1_i32_50 dim 1 : vector<16x128xf32>, i32 -> vector<16x128xf32>
    %cst_51 = arith.constant 0.000000e+00 : f32
    %249 = vector.broadcast %cst_51 : f32 to vector<16x128xf32>
    %250 = arith.select %6, %248, %249 : vector<16x128xi1>, vector<16x128xf32>
    %c9 = arith.constant 9 : index
    %251 = memref.load %arg3[%c9] : memref<81xf32, #tpu.memory_space<smem>>
    %252 = vector.broadcast %251 : f32 to vector<16x128xf32>
    %253 = arith.mulf %252, %250 : vector<16x128xf32>
    %254 = arith.addf %237, %253 : vector<16x128xf32>
    %c36 = arith.constant 36 : index
    %255 = memref.load %arg3[%c36] : memref<81xf32, #tpu.memory_space<smem>>
    %256 = vector.broadcast %255 : f32 to vector<16x128xf32>
    %257 = arith.mulf %256, %250 : vector<16x128xf32>
    %258 = arith.addf %241, %257 : vector<16x128xf32>
    %c63 = arith.constant 63 : index
    %259 = memref.load %arg3[%c63] : memref<81xf32, #tpu.memory_space<smem>>
    %260 = vector.broadcast %259 : f32 to vector<16x128xf32>
    %261 = arith.mulf %260, %250 : vector<16x128xf32>
    %262 = arith.addf %245, %261 : vector<16x128xf32>
    %c10 = arith.constant 10 : index
    %263 = memref.load %arg3[%c10] : memref<81xf32, #tpu.memory_space<smem>>
    %264 = vector.broadcast %263 : f32 to vector<16x128xf32>
    %265 = arith.mulf %264, %247 : vector<16x128xf32>
    %266 = arith.addf %254, %265 : vector<16x128xf32>
    %c37 = arith.constant 37 : index
    %267 = memref.load %arg3[%c37] : memref<81xf32, #tpu.memory_space<smem>>
    %268 = vector.broadcast %267 : f32 to vector<16x128xf32>
    %269 = arith.mulf %268, %247 : vector<16x128xf32>
    %270 = arith.addf %258, %269 : vector<16x128xf32>
    %c64 = arith.constant 64 : index
    %271 = memref.load %arg3[%c64] : memref<81xf32, #tpu.memory_space<smem>>
    %272 = vector.broadcast %271 : f32 to vector<16x128xf32>
    %273 = arith.mulf %272, %247 : vector<16x128xf32>
    %274 = arith.addf %262, %273 : vector<16x128xf32>
    %c127_i32_52 = arith.constant 127 : i32
    %275 = tpu.dynamic_rotate %247 by %c127_i32_52 dim 1 : vector<16x128xf32>, i32 -> vector<16x128xf32>
    %cst_53 = arith.constant 0.000000e+00 : f32
    %276 = vector.broadcast %cst_53 : f32 to vector<16x128xf32>
    %277 = arith.select %4, %275, %276 : vector<16x128xi1>, vector<16x128xf32>
    %c11 = arith.constant 11 : index
    %278 = memref.load %arg3[%c11] : memref<81xf32, #tpu.memory_space<smem>>
    %279 = vector.broadcast %278 : f32 to vector<16x128xf32>
    %280 = arith.mulf %279, %277 : vector<16x128xf32>
    %281 = arith.addf %266, %280 : vector<16x128xf32>
    %c38 = arith.constant 38 : index
    %282 = memref.load %arg3[%c38] : memref<81xf32, #tpu.memory_space<smem>>
    %283 = vector.broadcast %282 : f32 to vector<16x128xf32>
    %284 = arith.mulf %283, %277 : vector<16x128xf32>
    %285 = arith.addf %270, %284 : vector<16x128xf32>
    %c65 = arith.constant 65 : index
    %286 = memref.load %arg3[%c65] : memref<81xf32, #tpu.memory_space<smem>>
    %287 = vector.broadcast %286 : f32 to vector<16x128xf32>
    %288 = arith.mulf %287, %277 : vector<16x128xf32>
    %289 = arith.addf %274, %288 : vector<16x128xf32>
    %290 = vector.extract_strided_slice %106 {offsets = [8, 0], sizes = [16, 128], strides = [1, 1]} : vector<32x128xf32> to vector<16x128xf32>
    %c1_i32_54 = arith.constant 1 : i32
    %291 = tpu.dynamic_rotate %290 by %c1_i32_54 dim 1 : vector<16x128xf32>, i32 -> vector<16x128xf32>
    %cst_55 = arith.constant 0.000000e+00 : f32
    %292 = vector.broadcast %cst_55 : f32 to vector<16x128xf32>
    %293 = arith.select %6, %291, %292 : vector<16x128xi1>, vector<16x128xf32>
    %c12 = arith.constant 12 : index
    %294 = memref.load %arg3[%c12] : memref<81xf32, #tpu.memory_space<smem>>
    %295 = vector.broadcast %294 : f32 to vector<16x128xf32>
    %296 = arith.mulf %295, %293 : vector<16x128xf32>
    %297 = arith.addf %281, %296 : vector<16x128xf32>
    %c39 = arith.constant 39 : index
    %298 = memref.load %arg3[%c39] : memref<81xf32, #tpu.memory_space<smem>>
    %299 = vector.broadcast %298 : f32 to vector<16x128xf32>
    %300 = arith.mulf %299, %293 : vector<16x128xf32>
    %301 = arith.addf %285, %300 : vector<16x128xf32>
    %c66 = arith.constant 66 : index
    %302 = memref.load %arg3[%c66] : memref<81xf32, #tpu.memory_space<smem>>
    %303 = vector.broadcast %302 : f32 to vector<16x128xf32>
    %304 = arith.mulf %303, %293 : vector<16x128xf32>
    %305 = arith.addf %289, %304 : vector<16x128xf32>
    %c13 = arith.constant 13 : index
    %306 = memref.load %arg3[%c13] : memref<81xf32, #tpu.memory_space<smem>>
    %307 = vector.broadcast %306 : f32 to vector<16x128xf32>
    %308 = arith.mulf %307, %290 : vector<16x128xf32>
    %309 = arith.addf %297, %308 : vector<16x128xf32>
    %c40 = arith.constant 40 : index
    %310 = memref.load %arg3[%c40] : memref<81xf32, #tpu.memory_space<smem>>
    %311 = vector.broadcast %310 : f32 to vector<16x128xf32>
    %312 = arith.mulf %311, %290 : vector<16x128xf32>
    %313 = arith.addf %301, %312 : vector<16x128xf32>
    %c67 = arith.constant 67 : index
    %314 = memref.load %arg3[%c67] : memref<81xf32, #tpu.memory_space<smem>>
    %315 = vector.broadcast %314 : f32 to vector<16x128xf32>
    %316 = arith.mulf %315, %290 : vector<16x128xf32>
    %317 = arith.addf %305, %316 : vector<16x128xf32>
    %c127_i32_56 = arith.constant 127 : i32
    %318 = tpu.dynamic_rotate %290 by %c127_i32_56 dim 1 : vector<16x128xf32>, i32 -> vector<16x128xf32>
    %cst_57 = arith.constant 0.000000e+00 : f32
    %319 = vector.broadcast %cst_57 : f32 to vector<16x128xf32>
    %320 = arith.select %4, %318, %319 : vector<16x128xi1>, vector<16x128xf32>
    %c14 = arith.constant 14 : index
    %321 = memref.load %arg3[%c14] : memref<81xf32, #tpu.memory_space<smem>>
    %322 = vector.broadcast %321 : f32 to vector<16x128xf32>
    %323 = arith.mulf %322, %320 : vector<16x128xf32>
    %324 = arith.addf %309, %323 : vector<16x128xf32>
    %c41 = arith.constant 41 : index
    %325 = memref.load %arg3[%c41] : memref<81xf32, #tpu.memory_space<smem>>
    %326 = vector.broadcast %325 : f32 to vector<16x128xf32>
    %327 = arith.mulf %326, %320 : vector<16x128xf32>
    %328 = arith.addf %313, %327 : vector<16x128xf32>
    %c68 = arith.constant 68 : index
    %329 = memref.load %arg3[%c68] : memref<81xf32, #tpu.memory_space<smem>>
    %330 = vector.broadcast %329 : f32 to vector<16x128xf32>
    %331 = arith.mulf %330, %320 : vector<16x128xf32>
    %332 = arith.addf %317, %331 : vector<16x128xf32>
    %c31_i32_58 = arith.constant 31 : i32
    %333 = tpu.dynamic_rotate %106 by %c31_i32_58 dim 0 : vector<32x128xf32>, i32 -> vector<32x128xf32>
    %334 = vector.extract_strided_slice %333 {offsets = [8, 0], sizes = [16, 128], strides = [1, 1]} : vector<32x128xf32> to vector<16x128xf32>
    %c1_i32_59 = arith.constant 1 : i32
    %335 = tpu.dynamic_rotate %334 by %c1_i32_59 dim 1 : vector<16x128xf32>, i32 -> vector<16x128xf32>
    %cst_60 = arith.constant 0.000000e+00 : f32
    %336 = vector.broadcast %cst_60 : f32 to vector<16x128xf32>
    %337 = arith.select %6, %335, %336 : vector<16x128xi1>, vector<16x128xf32>
    %c15 = arith.constant 15 : index
    %338 = memref.load %arg3[%c15] : memref<81xf32, #tpu.memory_space<smem>>
    %339 = vector.broadcast %338 : f32 to vector<16x128xf32>
    %340 = arith.mulf %339, %337 : vector<16x128xf32>
    %341 = arith.addf %324, %340 : vector<16x128xf32>
    %c42 = arith.constant 42 : index
    %342 = memref.load %arg3[%c42] : memref<81xf32, #tpu.memory_space<smem>>
    %343 = vector.broadcast %342 : f32 to vector<16x128xf32>
    %344 = arith.mulf %343, %337 : vector<16x128xf32>
    %345 = arith.addf %328, %344 : vector<16x128xf32>
    %c69 = arith.constant 69 : index
    %346 = memref.load %arg3[%c69] : memref<81xf32, #tpu.memory_space<smem>>
    %347 = vector.broadcast %346 : f32 to vector<16x128xf32>
    %348 = arith.mulf %347, %337 : vector<16x128xf32>
    %349 = arith.addf %332, %348 : vector<16x128xf32>
    %c16 = arith.constant 16 : index
    %350 = memref.load %arg3[%c16] : memref<81xf32, #tpu.memory_space<smem>>
    %351 = vector.broadcast %350 : f32 to vector<16x128xf32>
    %352 = arith.mulf %351, %334 : vector<16x128xf32>
    %353 = arith.addf %341, %352 : vector<16x128xf32>
    %c43 = arith.constant 43 : index
    %354 = memref.load %arg3[%c43] : memref<81xf32, #tpu.memory_space<smem>>
    %355 = vector.broadcast %354 : f32 to vector<16x128xf32>
    %356 = arith.mulf %355, %334 : vector<16x128xf32>
    %357 = arith.addf %345, %356 : vector<16x128xf32>
    %c70 = arith.constant 70 : index
    %358 = memref.load %arg3[%c70] : memref<81xf32, #tpu.memory_space<smem>>
    %359 = vector.broadcast %358 : f32 to vector<16x128xf32>
    %360 = arith.mulf %359, %334 : vector<16x128xf32>
    %361 = arith.addf %349, %360 : vector<16x128xf32>
    %c127_i32_61 = arith.constant 127 : i32
    %362 = tpu.dynamic_rotate %334 by %c127_i32_61 dim 1 : vector<16x128xf32>, i32 -> vector<16x128xf32>
    %cst_62 = arith.constant 0.000000e+00 : f32
    %363 = vector.broadcast %cst_62 : f32 to vector<16x128xf32>
    %364 = arith.select %4, %362, %363 : vector<16x128xi1>, vector<16x128xf32>
    %c17 = arith.constant 17 : index
    %365 = memref.load %arg3[%c17] : memref<81xf32, #tpu.memory_space<smem>>
    %366 = vector.broadcast %365 : f32 to vector<16x128xf32>
    %367 = arith.mulf %366, %364 : vector<16x128xf32>
    %368 = arith.addf %353, %367 : vector<16x128xf32>
    %c44 = arith.constant 44 : index
    %369 = memref.load %arg3[%c44] : memref<81xf32, #tpu.memory_space<smem>>
    %370 = vector.broadcast %369 : f32 to vector<16x128xf32>
    %371 = arith.mulf %370, %364 : vector<16x128xf32>
    %372 = arith.addf %357, %371 : vector<16x128xf32>
    %c71 = arith.constant 71 : index
    %373 = memref.load %arg3[%c71] : memref<81xf32, #tpu.memory_space<smem>>
    %374 = vector.broadcast %373 : f32 to vector<16x128xf32>
    %375 = arith.mulf %374, %364 : vector<16x128xf32>
    %376 = arith.addf %361, %375 : vector<16x128xf32>
    %c1_i32_63 = arith.constant 1 : i32
    %377 = tpu.dynamic_rotate %108 by %c1_i32_63 dim 0 : vector<32x128xf32>, i32 -> vector<32x128xf32>
    %378 = vector.extract_strided_slice %377 {offsets = [8, 0], sizes = [16, 128], strides = [1, 1]} : vector<32x128xf32> to vector<16x128xf32>
    %c1_i32_64 = arith.constant 1 : i32
    %379 = tpu.dynamic_rotate %378 by %c1_i32_64 dim 1 : vector<16x128xf32>, i32 -> vector<16x128xf32>
    %cst_65 = arith.constant 0.000000e+00 : f32
    %380 = vector.broadcast %cst_65 : f32 to vector<16x128xf32>
    %381 = arith.select %6, %379, %380 : vector<16x128xi1>, vector<16x128xf32>
    %c18 = arith.constant 18 : index
    %382 = memref.load %arg3[%c18] : memref<81xf32, #tpu.memory_space<smem>>
    %383 = vector.broadcast %382 : f32 to vector<16x128xf32>
    %384 = arith.mulf %383, %381 : vector<16x128xf32>
    %385 = arith.addf %368, %384 : vector<16x128xf32>
    %c45 = arith.constant 45 : index
    %386 = memref.load %arg3[%c45] : memref<81xf32, #tpu.memory_space<smem>>
    %387 = vector.broadcast %386 : f32 to vector<16x128xf32>
    %388 = arith.mulf %387, %381 : vector<16x128xf32>
    %389 = arith.addf %372, %388 : vector<16x128xf32>
    %c72 = arith.constant 72 : index
    %390 = memref.load %arg3[%c72] : memref<81xf32, #tpu.memory_space<smem>>
    %391 = vector.broadcast %390 : f32 to vector<16x128xf32>
    %392 = arith.mulf %391, %381 : vector<16x128xf32>
    %393 = arith.addf %376, %392 : vector<16x128xf32>
    %c19 = arith.constant 19 : index
    %394 = memref.load %arg3[%c19] : memref<81xf32, #tpu.memory_space<smem>>
    %395 = vector.broadcast %394 : f32 to vector<16x128xf32>
    %396 = arith.mulf %395, %378 : vector<16x128xf32>
    %397 = arith.addf %385, %396 : vector<16x128xf32>
    %c46 = arith.constant 46 : index
    %398 = memref.load %arg3[%c46] : memref<81xf32, #tpu.memory_space<smem>>
    %399 = vector.broadcast %398 : f32 to vector<16x128xf32>
    %400 = arith.mulf %399, %378 : vector<16x128xf32>
    %401 = arith.addf %389, %400 : vector<16x128xf32>
    %c73 = arith.constant 73 : index
    %402 = memref.load %arg3[%c73] : memref<81xf32, #tpu.memory_space<smem>>
    %403 = vector.broadcast %402 : f32 to vector<16x128xf32>
    %404 = arith.mulf %403, %378 : vector<16x128xf32>
    %405 = arith.addf %393, %404 : vector<16x128xf32>
    %c127_i32_66 = arith.constant 127 : i32
    %406 = tpu.dynamic_rotate %378 by %c127_i32_66 dim 1 : vector<16x128xf32>, i32 -> vector<16x128xf32>
    %cst_67 = arith.constant 0.000000e+00 : f32
    %407 = vector.broadcast %cst_67 : f32 to vector<16x128xf32>
    %408 = arith.select %4, %406, %407 : vector<16x128xi1>, vector<16x128xf32>
    %c20 = arith.constant 20 : index
    %409 = memref.load %arg3[%c20] : memref<81xf32, #tpu.memory_space<smem>>
    %410 = vector.broadcast %409 : f32 to vector<16x128xf32>
    %411 = arith.mulf %410, %408 : vector<16x128xf32>
    %412 = arith.addf %397, %411 : vector<16x128xf32>
    %c47 = arith.constant 47 : index
    %413 = memref.load %arg3[%c47] : memref<81xf32, #tpu.memory_space<smem>>
    %414 = vector.broadcast %413 : f32 to vector<16x128xf32>
    %415 = arith.mulf %414, %408 : vector<16x128xf32>
    %416 = arith.addf %401, %415 : vector<16x128xf32>
    %c74 = arith.constant 74 : index
    %417 = memref.load %arg3[%c74] : memref<81xf32, #tpu.memory_space<smem>>
    %418 = vector.broadcast %417 : f32 to vector<16x128xf32>
    %419 = arith.mulf %418, %408 : vector<16x128xf32>
    %420 = arith.addf %405, %419 : vector<16x128xf32>
    %421 = vector.extract_strided_slice %108 {offsets = [8, 0], sizes = [16, 128], strides = [1, 1]} : vector<32x128xf32> to vector<16x128xf32>
    %c1_i32_68 = arith.constant 1 : i32
    %422 = tpu.dynamic_rotate %421 by %c1_i32_68 dim 1 : vector<16x128xf32>, i32 -> vector<16x128xf32>
    %cst_69 = arith.constant 0.000000e+00 : f32
    %423 = vector.broadcast %cst_69 : f32 to vector<16x128xf32>
    %424 = arith.select %6, %422, %423 : vector<16x128xi1>, vector<16x128xf32>
    %c21 = arith.constant 21 : index
    %425 = memref.load %arg3[%c21] : memref<81xf32, #tpu.memory_space<smem>>
    %426 = vector.broadcast %425 : f32 to vector<16x128xf32>
    %427 = arith.mulf %426, %424 : vector<16x128xf32>
    %428 = arith.addf %412, %427 : vector<16x128xf32>
    %c48 = arith.constant 48 : index
    %429 = memref.load %arg3[%c48] : memref<81xf32, #tpu.memory_space<smem>>
    %430 = vector.broadcast %429 : f32 to vector<16x128xf32>
    %431 = arith.mulf %430, %424 : vector<16x128xf32>
    %432 = arith.addf %416, %431 : vector<16x128xf32>
    %c75 = arith.constant 75 : index
    %433 = memref.load %arg3[%c75] : memref<81xf32, #tpu.memory_space<smem>>
    %434 = vector.broadcast %433 : f32 to vector<16x128xf32>
    %435 = arith.mulf %434, %424 : vector<16x128xf32>
    %436 = arith.addf %420, %435 : vector<16x128xf32>
    %c22 = arith.constant 22 : index
    %437 = memref.load %arg3[%c22] : memref<81xf32, #tpu.memory_space<smem>>
    %438 = vector.broadcast %437 : f32 to vector<16x128xf32>
    %439 = arith.mulf %438, %421 : vector<16x128xf32>
    %440 = arith.addf %428, %439 : vector<16x128xf32>
    %c49 = arith.constant 49 : index
    %441 = memref.load %arg3[%c49] : memref<81xf32, #tpu.memory_space<smem>>
    %442 = vector.broadcast %441 : f32 to vector<16x128xf32>
    %443 = arith.mulf %442, %421 : vector<16x128xf32>
    %444 = arith.addf %432, %443 : vector<16x128xf32>
    %c76 = arith.constant 76 : index
    %445 = memref.load %arg3[%c76] : memref<81xf32, #tpu.memory_space<smem>>
    %446 = vector.broadcast %445 : f32 to vector<16x128xf32>
    %447 = arith.mulf %446, %421 : vector<16x128xf32>
    %448 = arith.addf %436, %447 : vector<16x128xf32>
    %c127_i32_70 = arith.constant 127 : i32
    %449 = tpu.dynamic_rotate %421 by %c127_i32_70 dim 1 : vector<16x128xf32>, i32 -> vector<16x128xf32>
    %cst_71 = arith.constant 0.000000e+00 : f32
    %450 = vector.broadcast %cst_71 : f32 to vector<16x128xf32>
    %451 = arith.select %4, %449, %450 : vector<16x128xi1>, vector<16x128xf32>
    %c23 = arith.constant 23 : index
    %452 = memref.load %arg3[%c23] : memref<81xf32, #tpu.memory_space<smem>>
    %453 = vector.broadcast %452 : f32 to vector<16x128xf32>
    %454 = arith.mulf %453, %451 : vector<16x128xf32>
    %455 = arith.addf %440, %454 : vector<16x128xf32>
    %c50 = arith.constant 50 : index
    %456 = memref.load %arg3[%c50] : memref<81xf32, #tpu.memory_space<smem>>
    %457 = vector.broadcast %456 : f32 to vector<16x128xf32>
    %458 = arith.mulf %457, %451 : vector<16x128xf32>
    %459 = arith.addf %444, %458 : vector<16x128xf32>
    %c77 = arith.constant 77 : index
    %460 = memref.load %arg3[%c77] : memref<81xf32, #tpu.memory_space<smem>>
    %461 = vector.broadcast %460 : f32 to vector<16x128xf32>
    %462 = arith.mulf %461, %451 : vector<16x128xf32>
    %463 = arith.addf %448, %462 : vector<16x128xf32>
    %c31_i32_72 = arith.constant 31 : i32
    %464 = tpu.dynamic_rotate %108 by %c31_i32_72 dim 0 : vector<32x128xf32>, i32 -> vector<32x128xf32>
    %465 = vector.extract_strided_slice %464 {offsets = [8, 0], sizes = [16, 128], strides = [1, 1]} : vector<32x128xf32> to vector<16x128xf32>
    %c1_i32_73 = arith.constant 1 : i32
    %466 = tpu.dynamic_rotate %465 by %c1_i32_73 dim 1 : vector<16x128xf32>, i32 -> vector<16x128xf32>
    %cst_74 = arith.constant 0.000000e+00 : f32
    %467 = vector.broadcast %cst_74 : f32 to vector<16x128xf32>
    %468 = arith.select %6, %466, %467 : vector<16x128xi1>, vector<16x128xf32>
    %c24 = arith.constant 24 : index
    %469 = memref.load %arg3[%c24] : memref<81xf32, #tpu.memory_space<smem>>
    %470 = vector.broadcast %469 : f32 to vector<16x128xf32>
    %471 = arith.mulf %470, %468 : vector<16x128xf32>
    %472 = arith.addf %455, %471 : vector<16x128xf32>
    %c51 = arith.constant 51 : index
    %473 = memref.load %arg3[%c51] : memref<81xf32, #tpu.memory_space<smem>>
    %474 = vector.broadcast %473 : f32 to vector<16x128xf32>
    %475 = arith.mulf %474, %468 : vector<16x128xf32>
    %476 = arith.addf %459, %475 : vector<16x128xf32>
    %c78 = arith.constant 78 : index
    %477 = memref.load %arg3[%c78] : memref<81xf32, #tpu.memory_space<smem>>
    %478 = vector.broadcast %477 : f32 to vector<16x128xf32>
    %479 = arith.mulf %478, %468 : vector<16x128xf32>
    %480 = arith.addf %463, %479 : vector<16x128xf32>
    %c25 = arith.constant 25 : index
    %481 = memref.load %arg3[%c25] : memref<81xf32, #tpu.memory_space<smem>>
    %482 = vector.broadcast %481 : f32 to vector<16x128xf32>
    %483 = arith.mulf %482, %465 : vector<16x128xf32>
    %484 = arith.addf %472, %483 : vector<16x128xf32>
    %c52 = arith.constant 52 : index
    %485 = memref.load %arg3[%c52] : memref<81xf32, #tpu.memory_space<smem>>
    %486 = vector.broadcast %485 : f32 to vector<16x128xf32>
    %487 = arith.mulf %486, %465 : vector<16x128xf32>
    %488 = arith.addf %476, %487 : vector<16x128xf32>
    %c79 = arith.constant 79 : index
    %489 = memref.load %arg3[%c79] : memref<81xf32, #tpu.memory_space<smem>>
    %490 = vector.broadcast %489 : f32 to vector<16x128xf32>
    %491 = arith.mulf %490, %465 : vector<16x128xf32>
    %492 = arith.addf %480, %491 : vector<16x128xf32>
    %c127_i32_75 = arith.constant 127 : i32
    %493 = tpu.dynamic_rotate %465 by %c127_i32_75 dim 1 : vector<16x128xf32>, i32 -> vector<16x128xf32>
    %cst_76 = arith.constant 0.000000e+00 : f32
    %494 = vector.broadcast %cst_76 : f32 to vector<16x128xf32>
    %495 = arith.select %4, %493, %494 : vector<16x128xi1>, vector<16x128xf32>
    %c26 = arith.constant 26 : index
    %496 = memref.load %arg3[%c26] : memref<81xf32, #tpu.memory_space<smem>>
    %497 = vector.broadcast %496 : f32 to vector<16x128xf32>
    %498 = arith.mulf %497, %495 : vector<16x128xf32>
    %499 = arith.addf %484, %498 : vector<16x128xf32>
    %c53 = arith.constant 53 : index
    %500 = memref.load %arg3[%c53] : memref<81xf32, #tpu.memory_space<smem>>
    %501 = vector.broadcast %500 : f32 to vector<16x128xf32>
    %502 = arith.mulf %501, %495 : vector<16x128xf32>
    %503 = arith.addf %488, %502 : vector<16x128xf32>
    %c80 = arith.constant 80 : index
    %504 = memref.load %arg3[%c80] : memref<81xf32, #tpu.memory_space<smem>>
    %505 = vector.broadcast %504 : f32 to vector<16x128xf32>
    %506 = arith.mulf %505, %495 : vector<16x128xf32>
    %507 = arith.addf %492, %506 : vector<16x128xf32>
    %508 = vector.extract_strided_slice %26 {offsets = [0, 8, 0], sizes = [3, 16, 128], strides = [1, 1, 1]} : vector<3x32x128xf32> to vector<3x16x128xf32>
    %509 = vector.extract_strided_slice %508 {offsets = [0, 0, 0], sizes = [1, 16, 128], strides = [1, 1, 1]} : vector<3x16x128xf32> to vector<1x16x128xf32>
    %510 = vector.shape_cast %509 : vector<1x16x128xf32> to vector<16x128xf32>
    %511 = arith.addf %510, %499 : vector<16x128xf32>
    %512 = vector.extract_strided_slice %508 {offsets = [1, 0, 0], sizes = [1, 16, 128], strides = [1, 1, 1]} : vector<3x16x128xf32> to vector<1x16x128xf32>
    %513 = vector.shape_cast %512 : vector<1x16x128xf32> to vector<16x128xf32>
    %514 = arith.addf %513, %503 : vector<16x128xf32>
    %515 = vector.extract_strided_slice %508 {offsets = [2, 0, 0], sizes = [1, 16, 128], strides = [1, 1, 1]} : vector<3x16x128xf32> to vector<1x16x128xf32>
    %516 = vector.shape_cast %515 : vector<1x16x128xf32> to vector<16x128xf32>
    %517 = arith.addf %516, %507 : vector<16x128xf32>
    %518 = vector.shape_cast %511 : vector<16x128xf32> to vector<1x16x128xf32>
    %519 = vector.shape_cast %514 : vector<16x128xf32> to vector<1x16x128xf32>
    %520 = vector.shape_cast %517 : vector<16x128xf32> to vector<1x16x128xf32>
    %521 = tpu.concatenate %518, %519, %520 in 0 : vector<1x16x128xf32>, vector<1x16x128xf32>, vector<1x16x128xf32> -> vector<3x16x128xf32>
    %c0_77 = arith.constant 0 : index
    %c0_78 = arith.constant 0 : index
    %c0_79 = arith.constant 0 : index
    %c0_80 = arith.constant 0 : index
    %522 = vector.load %arg5[%c0_77, %c0_78, %c0_79, %c0_80] : memref<2x3x16x128xf32, #tpu.memory_space<vmem>>, vector<1x3x16x128xf32>
    %523 = vector.shape_cast %522 : vector<1x3x16x128xf32> to vector<3x16x128xf32>
    %524 = vector.shape_cast %521 : vector<3x16x128xf32> to vector<1x3x16x128xf32>
    tpu.vector_store %arg5[%c0_77, %c0_78, %c0_79, %c0_80], %524 {strides = array<i32>} : memref<2x3x16x128xf32, #tpu.memory_space<vmem>>, vector<1x3x16x128xf32>,
    %c1_81 = arith.constant 1 : index
    %c0_82 = arith.constant 0 : index
    %525 = arith.index_cast %1 : i32 to index
    %c0_83 = arith.constant 0 : index
    %526 = vector.load %arg2[%c1_81, %c0_82, %525, %c0_83] : memref<2x3x32x128xf32, #tpu.memory_space<vmem>>, vector<1x3x32x128xf32>
    %527 = vector.shape_cast %526 : vector<1x3x32x128xf32> to vector<3x32x128xf32>
    %528 = vector.extract_strided_slice %527 {offsets = [0, 0, 0], sizes = [1, 32, 128], strides = [1, 1, 1]} : vector<3x32x128xf32> to vector<1x32x128xf32>
    %529 = vector.shape_cast %528 : vector<1x32x128xf32> to vector<32x128xf32>
    %530 = vector.extract_strided_slice %527 {offsets = [1, 0, 0], sizes = [1, 32, 128], strides = [1, 1, 1]} : vector<3x32x128xf32> to vector<1x32x128xf32>
    %531 = vector.shape_cast %530 : vector<1x32x128xf32> to vector<32x128xf32>
    %532 = vector.extract_strided_slice %527 {offsets = [2, 0, 0], sizes = [1, 32, 128], strides = [1, 1, 1]} : vector<3x32x128xf32> to vector<1x32x128xf32>
    %533 = vector.shape_cast %532 : vector<1x32x128xf32> to vector<32x128xf32>
    %534 = arith.maximumf %529, %531 : vector<32x128xf32>
    %535 = arith.maximumf %534, %533 : vector<32x128xf32>
    %536 = arith.minimumf %529, %531 : vector<32x128xf32>
    %537 = arith.minimumf %536, %533 : vector<32x128xf32>
    %538 = arith.addf %535, %537 : vector<32x128xf32>
    %cst_84 = arith.constant 5.000000e-01 : f32
    %539 = vector.broadcast %cst_84 : f32 to vector<32x128xf32>
    %540 = arith.mulf %539, %538 : vector<32x128xf32>
    %541 = arith.subf %535, %537 : vector<32x128xf32>
    %cst_85 = arith.constant 0.000000e+00 : f32
    %542 = vector.broadcast %cst_85 : f32 to vector<32x128xf32>
    %543 = arith.cmpf oeq, %541, %542 : vector<32x128xf32>
    %cst_86 = arith.constant 1.000000e+00 : f32
    %544 = vector.broadcast %cst_86 : f32 to vector<32x128xf32>
    %545 = arith.select %543, %544, %541 : vector<32x128xi1>, vector<32x128xf32>
    %546 = tpu.reciprocal %545 {approx = true} : vector<32x128xf32> -> vector<32x128xf32>
    %547 = arith.cmpf oeq, %535, %529 : vector<32x128xf32>
    %548 = arith.subf %531, %533 : vector<32x128xf32>
    %cst_87 = arith.constant 6.000000e+01 : f32
    %549 = vector.broadcast %cst_87 : f32 to vector<32x128xf32>
    %550 = arith.mulf %549, %548 : vector<32x128xf32>
    %551 = arith.mulf %550, %546 : vector<32x128xf32>
    %552 = arith.cmpf oeq, %535, %531 : vector<32x128xf32>
    %553 = arith.subf %533, %529 : vector<32x128xf32>
    %cst_88 = arith.constant 6.000000e+01 : f32
    %554 = vector.broadcast %cst_88 : f32 to vector<32x128xf32>
    %555 = arith.mulf %554, %553 : vector<32x128xf32>
    %556 = arith.mulf %555, %546 : vector<32x128xf32>
    %cst_89 = arith.constant 1.200000e+02 : f32
    %557 = vector.broadcast %cst_89 : f32 to vector<32x128xf32>
    %558 = arith.addf %557, %556 : vector<32x128xf32>
    %559 = arith.subf %529, %531 : vector<32x128xf32>
    %cst_90 = arith.constant 6.000000e+01 : f32
    %560 = vector.broadcast %cst_90 : f32 to vector<32x128xf32>
    %561 = arith.mulf %560, %559 : vector<32x128xf32>
    %562 = arith.mulf %561, %546 : vector<32x128xf32>
    %cst_91 = arith.constant 2.400000e+02 : f32
    %563 = vector.broadcast %cst_91 : f32 to vector<32x128xf32>
    %564 = arith.addf %563, %562 : vector<32x128xf32>
    %565 = arith.select %552, %558, %564 : vector<32x128xi1>, vector<32x128xf32>
    %566 = arith.select %547, %551, %565 : vector<32x128xi1>, vector<32x128xf32>
    %cst_92 = arith.constant 0.000000e+00 : f32
    %567 = vector.broadcast %cst_92 : f32 to vector<32x128xf32>
    %568 = arith.cmpf olt, %566, %567 : vector<32x128xf32>
    %cst_93 = arith.constant 3.600000e+02 : f32
    %569 = vector.broadcast %cst_93 : f32 to vector<32x128xf32>
    %570 = arith.addf %566, %569 : vector<32x128xf32>
    %571 = arith.select %568, %570, %566 : vector<32x128xi1>, vector<32x128xf32>
    %cst_94 = arith.constant 0.000000e+00 : f32
    %572 = vector.broadcast %cst_94 : f32 to vector<32x128xf32>
    %573 = arith.cmpf oeq, %541, %572 : vector<32x128xf32>
    %cst_95 = arith.constant 0.000000e+00 : f32
    %574 = vector.broadcast %cst_95 : f32 to vector<32x128xf32>
    %575 = arith.select %573, %574, %571 : vector<32x128xi1>, vector<32x128xf32>
    %cst_96 = arith.constant 2.990000e-01 : f32
    %576 = vector.broadcast %cst_96 : f32 to vector<32x128xf32>
    %577 = arith.mulf %576, %529 : vector<32x128xf32>
    %cst_97 = arith.constant 5.870000e-01 : f32
    %578 = vector.broadcast %cst_97 : f32 to vector<32x128xf32>
    %579 = arith.mulf %578, %531 : vector<32x128xf32>
    %580 = arith.addf %577, %579 : vector<32x128xf32>
    %cst_98 = arith.constant 1.140000e-01 : f32
    %581 = vector.broadcast %cst_98 : f32 to vector<32x128xf32>
    %582 = arith.mulf %581, %533 : vector<32x128xf32>
    %583 = arith.addf %580, %582 : vector<32x128xf32>
    %c127_i32_99 = arith.constant 127 : i32
    %584 = tpu.dynamic_rotate %583 by %c127_i32_99 dim 1 : vector<32x128xf32>, i32 -> vector<32x128xf32>
    %cst_100 = arith.constant 0.000000e+00 : f32
    %585 = vector.broadcast %cst_100 : f32 to vector<32x128xf32>
    %586 = arith.select %21, %584, %585 : vector<32x128xi1>, vector<32x128xf32>
    %c1_i32_101 = arith.constant 1 : i32
    %587 = tpu.dynamic_rotate %583 by %c1_i32_101 dim 1 : vector<32x128xf32>, i32 -> vector<32x128xf32>
    %cst_102 = arith.constant 0.000000e+00 : f32
    %588 = vector.broadcast %cst_102 : f32 to vector<32x128xf32>
    %589 = arith.select %23, %587, %588 : vector<32x128xi1>, vector<32x128xf32>
    %c31_i32_103 = arith.constant 31 : i32
    %590 = tpu.dynamic_rotate %583 by %c31_i32_103 dim 0 : vector<32x128xf32>, i32 -> vector<32x128xf32>
    %c1_i32_104 = arith.constant 1 : i32
    %591 = tpu.dynamic_rotate %583 by %c1_i32_104 dim 0 : vector<32x128xf32>, i32 -> vector<32x128xf32>
    %592 = arith.subf %586, %589 : vector<32x128xf32>
    %593 = arith.subf %590, %591 : vector<32x128xf32>
    %594 = arith.mulf %592, %592 : vector<32x128xf32>
    %595 = arith.mulf %593, %593 : vector<32x128xf32>
    %596 = arith.addf %594, %595 : vector<32x128xf32>
    %597 = math.sqrt %596 : vector<32x128xf32>
    %cst_105 = arith.constant 5.000000e-02 : f32
    %598 = vector.broadcast %cst_105 : f32 to vector<32x128xf32>
    %599 = arith.mulf %597, %598 : vector<32x128xf32>
    %cst_106 = arith.constant 0.000000e+00 : f32
    %cst_107 = arith.constant 1.000000e+00 : f32
    %600 = vector.broadcast %cst_106 : f32 to vector<32x128xf32>
    %601 = arith.maximumf %600, %599 : vector<32x128xf32>
    %602 = vector.broadcast %cst_107 : f32 to vector<32x128xf32>
    %603 = arith.minimumf %602, %601 : vector<32x128xf32>
    %cst_108 = arith.constant 0.000000e+00 : f32
    %604 = vector.broadcast %cst_108 : f32 to vector<32x128xf32>
    %605 = arith.select %19, %575, %604 : vector<32x128xi1>, vector<32x128xf32>
    %cst_109 = arith.constant 0.000000e+00 : f32
    %606 = vector.broadcast %cst_109 : f32 to vector<32x128xf32>
    %607 = arith.select %19, %540, %606 : vector<32x128xi1>, vector<32x128xf32>
    %cst_110 = arith.constant 0.000000e+00 : f32
    %608 = vector.broadcast %cst_110 : f32 to vector<32x128xf32>
    %609 = arith.select %19, %603, %608 : vector<32x128xi1>, vector<32x128xf32>
    %c0_111 = arith.constant 0 : index
    %610 = memref.load %arg4[%c0_111] : memref<3xf32, #tpu.memory_space<smem>>
    %611 = vector.broadcast %610 : f32 to vector<16x128xf32>
    %c1_112 = arith.constant 1 : index
    %612 = memref.load %arg4[%c1_112] : memref<3xf32, #tpu.memory_space<smem>>
    %613 = vector.broadcast %612 : f32 to vector<16x128xf32>
    %c2_113 = arith.constant 2 : index
    %614 = memref.load %arg4[%c2_113] : memref<3xf32, #tpu.memory_space<smem>>
    %615 = vector.broadcast %614 : f32 to vector<16x128xf32>
    %c1_i32_114 = arith.constant 1 : i32
    %616 = tpu.dynamic_rotate %605 by %c1_i32_114 dim 0 : vector<32x128xf32>, i32 -> vector<32x128xf32>
    %617 = vector.extract_strided_slice %616 {offsets = [8, 0], sizes = [16, 128], strides = [1, 1]} : vector<32x128xf32> to vector<16x128xf32>
    %c1_i32_115 = arith.constant 1 : i32
    %618 = tpu.dynamic_rotate %617 by %c1_i32_115 dim 1 : vector<16x128xf32>, i32 -> vector<16x128xf32>
    %cst_116 = arith.constant 0.000000e+00 : f32
    %619 = vector.broadcast %cst_116 : f32 to vector<16x128xf32>
    %620 = arith.select %6, %618, %619 : vector<16x128xi1>, vector<16x128xf32>
    %c0_117 = arith.constant 0 : index
    %621 = memref.load %arg3[%c0_117] : memref<81xf32, #tpu.memory_space<smem>>
    %622 = vector.broadcast %621 : f32 to vector<16x128xf32>
    %623 = arith.mulf %622, %620 : vector<16x128xf32>
    %624 = arith.addf %611, %623 : vector<16x128xf32>
    %c27_118 = arith.constant 27 : index
    %625 = memref.load %arg3[%c27_118] : memref<81xf32, #tpu.memory_space<smem>>
    %626 = vector.broadcast %625 : f32 to vector<16x128xf32>
    %627 = arith.mulf %626, %620 : vector<16x128xf32>
    %628 = arith.addf %613, %627 : vector<16x128xf32>
    %c54_119 = arith.constant 54 : index
    %629 = memref.load %arg3[%c54_119] : memref<81xf32, #tpu.memory_space<smem>>
    %630 = vector.broadcast %629 : f32 to vector<16x128xf32>
    %631 = arith.mulf %630, %620 : vector<16x128xf32>
    %632 = arith.addf %615, %631 : vector<16x128xf32>
    %c1_120 = arith.constant 1 : index
    %633 = memref.load %arg3[%c1_120] : memref<81xf32, #tpu.memory_space<smem>>
    %634 = vector.broadcast %633 : f32 to vector<16x128xf32>
    %635 = arith.mulf %634, %617 : vector<16x128xf32>
    %636 = arith.addf %624, %635 : vector<16x128xf32>
    %c28_121 = arith.constant 28 : index
    %637 = memref.load %arg3[%c28_121] : memref<81xf32, #tpu.memory_space<smem>>
    %638 = vector.broadcast %637 : f32 to vector<16x128xf32>
    %639 = arith.mulf %638, %617 : vector<16x128xf32>
    %640 = arith.addf %628, %639 : vector<16x128xf32>
    %c55_122 = arith.constant 55 : index
    %641 = memref.load %arg3[%c55_122] : memref<81xf32, #tpu.memory_space<smem>>
    %642 = vector.broadcast %641 : f32 to vector<16x128xf32>
    %643 = arith.mulf %642, %617 : vector<16x128xf32>
    %644 = arith.addf %632, %643 : vector<16x128xf32>
    %c127_i32_123 = arith.constant 127 : i32
    %645 = tpu.dynamic_rotate %617 by %c127_i32_123 dim 1 : vector<16x128xf32>, i32 -> vector<16x128xf32>
    %cst_124 = arith.constant 0.000000e+00 : f32
    %646 = vector.broadcast %cst_124 : f32 to vector<16x128xf32>
    %647 = arith.select %4, %645, %646 : vector<16x128xi1>, vector<16x128xf32>
    %c2_125 = arith.constant 2 : index
    %648 = memref.load %arg3[%c2_125] : memref<81xf32, #tpu.memory_space<smem>>
    %649 = vector.broadcast %648 : f32 to vector<16x128xf32>
    %650 = arith.mulf %649, %647 : vector<16x128xf32>
    %651 = arith.addf %636, %650 : vector<16x128xf32>
    %c29_126 = arith.constant 29 : index
    %652 = memref.load %arg3[%c29_126] : memref<81xf32, #tpu.memory_space<smem>>
    %653 = vector.broadcast %652 : f32 to vector<16x128xf32>
    %654 = arith.mulf %653, %647 : vector<16x128xf32>
    %655 = arith.addf %640, %654 : vector<16x128xf32>
    %c56_127 = arith.constant 56 : index
    %656 = memref.load %arg3[%c56_127] : memref<81xf32, #tpu.memory_space<smem>>
    %657 = vector.broadcast %656 : f32 to vector<16x128xf32>
    %658 = arith.mulf %657, %647 : vector<16x128xf32>
    %659 = arith.addf %644, %658 : vector<16x128xf32>
    %660 = vector.extract_strided_slice %605 {offsets = [8, 0], sizes = [16, 128], strides = [1, 1]} : vector<32x128xf32> to vector<16x128xf32>
    %c1_i32_128 = arith.constant 1 : i32
    %661 = tpu.dynamic_rotate %660 by %c1_i32_128 dim 1 : vector<16x128xf32>, i32 -> vector<16x128xf32>
    %cst_129 = arith.constant 0.000000e+00 : f32
    %662 = vector.broadcast %cst_129 : f32 to vector<16x128xf32>
    %663 = arith.select %6, %661, %662 : vector<16x128xi1>, vector<16x128xf32>
    %c3_130 = arith.constant 3 : index
    %664 = memref.load %arg3[%c3_130] : memref<81xf32, #tpu.memory_space<smem>>
    %665 = vector.broadcast %664 : f32 to vector<16x128xf32>
    %666 = arith.mulf %665, %663 : vector<16x128xf32>
    %667 = arith.addf %651, %666 : vector<16x128xf32>
    %c30_131 = arith.constant 30 : index
    %668 = memref.load %arg3[%c30_131] : memref<81xf32, #tpu.memory_space<smem>>
    %669 = vector.broadcast %668 : f32 to vector<16x128xf32>
    %670 = arith.mulf %669, %663 : vector<16x128xf32>
    %671 = arith.addf %655, %670 : vector<16x128xf32>
    %c57_132 = arith.constant 57 : index
    %672 = memref.load %arg3[%c57_132] : memref<81xf32, #tpu.memory_space<smem>>
    %673 = vector.broadcast %672 : f32 to vector<16x128xf32>
    %674 = arith.mulf %673, %663 : vector<16x128xf32>
    %675 = arith.addf %659, %674 : vector<16x128xf32>
    %c4_133 = arith.constant 4 : index
    %676 = memref.load %arg3[%c4_133] : memref<81xf32, #tpu.memory_space<smem>>
    %677 = vector.broadcast %676 : f32 to vector<16x128xf32>
    %678 = arith.mulf %677, %660 : vector<16x128xf32>
    %679 = arith.addf %667, %678 : vector<16x128xf32>
    %c31_134 = arith.constant 31 : index
    %680 = memref.load %arg3[%c31_134] : memref<81xf32, #tpu.memory_space<smem>>
    %681 = vector.broadcast %680 : f32 to vector<16x128xf32>
    %682 = arith.mulf %681, %660 : vector<16x128xf32>
    %683 = arith.addf %671, %682 : vector<16x128xf32>
    %c58_135 = arith.constant 58 : index
    %684 = memref.load %arg3[%c58_135] : memref<81xf32, #tpu.memory_space<smem>>
    %685 = vector.broadcast %684 : f32 to vector<16x128xf32>
    %686 = arith.mulf %685, %660 : vector<16x128xf32>
    %687 = arith.addf %675, %686 : vector<16x128xf32>
    %c127_i32_136 = arith.constant 127 : i32
    %688 = tpu.dynamic_rotate %660 by %c127_i32_136 dim 1 : vector<16x128xf32>, i32 -> vector<16x128xf32>
    %cst_137 = arith.constant 0.000000e+00 : f32
    %689 = vector.broadcast %cst_137 : f32 to vector<16x128xf32>
    %690 = arith.select %4, %688, %689 : vector<16x128xi1>, vector<16x128xf32>
    %c5_138 = arith.constant 5 : index
    %691 = memref.load %arg3[%c5_138] : memref<81xf32, #tpu.memory_space<smem>>
    %692 = vector.broadcast %691 : f32 to vector<16x128xf32>
    %693 = arith.mulf %692, %690 : vector<16x128xf32>
    %694 = arith.addf %679, %693 : vector<16x128xf32>
    %c32_139 = arith.constant 32 : index
    %695 = memref.load %arg3[%c32_139] : memref<81xf32, #tpu.memory_space<smem>>
    %696 = vector.broadcast %695 : f32 to vector<16x128xf32>
    %697 = arith.mulf %696, %690 : vector<16x128xf32>
    %698 = arith.addf %683, %697 : vector<16x128xf32>
    %c59_140 = arith.constant 59 : index
    %699 = memref.load %arg3[%c59_140] : memref<81xf32, #tpu.memory_space<smem>>
    %700 = vector.broadcast %699 : f32 to vector<16x128xf32>
    %701 = arith.mulf %700, %690 : vector<16x128xf32>
    %702 = arith.addf %687, %701 : vector<16x128xf32>
    %c31_i32_141 = arith.constant 31 : i32
    %703 = tpu.dynamic_rotate %605 by %c31_i32_141 dim 0 : vector<32x128xf32>, i32 -> vector<32x128xf32>
    %704 = vector.extract_strided_slice %703 {offsets = [8, 0], sizes = [16, 128], strides = [1, 1]} : vector<32x128xf32> to vector<16x128xf32>
    %c1_i32_142 = arith.constant 1 : i32
    %705 = tpu.dynamic_rotate %704 by %c1_i32_142 dim 1 : vector<16x128xf32>, i32 -> vector<16x128xf32>
    %cst_143 = arith.constant 0.000000e+00 : f32
    %706 = vector.broadcast %cst_143 : f32 to vector<16x128xf32>
    %707 = arith.select %6, %705, %706 : vector<16x128xi1>, vector<16x128xf32>
    %c6_144 = arith.constant 6 : index
    %708 = memref.load %arg3[%c6_144] : memref<81xf32, #tpu.memory_space<smem>>
    %709 = vector.broadcast %708 : f32 to vector<16x128xf32>
    %710 = arith.mulf %709, %707 : vector<16x128xf32>
    %711 = arith.addf %694, %710 : vector<16x128xf32>
    %c33_145 = arith.constant 33 : index
    %712 = memref.load %arg3[%c33_145] : memref<81xf32, #tpu.memory_space<smem>>
    %713 = vector.broadcast %712 : f32 to vector<16x128xf32>
    %714 = arith.mulf %713, %707 : vector<16x128xf32>
    %715 = arith.addf %698, %714 : vector<16x128xf32>
    %c60_146 = arith.constant 60 : index
    %716 = memref.load %arg3[%c60_146] : memref<81xf32, #tpu.memory_space<smem>>
    %717 = vector.broadcast %716 : f32 to vector<16x128xf32>
    %718 = arith.mulf %717, %707 : vector<16x128xf32>
    %719 = arith.addf %702, %718 : vector<16x128xf32>
    %c7_147 = arith.constant 7 : index
    %720 = memref.load %arg3[%c7_147] : memref<81xf32, #tpu.memory_space<smem>>
    %721 = vector.broadcast %720 : f32 to vector<16x128xf32>
    %722 = arith.mulf %721, %704 : vector<16x128xf32>
    %723 = arith.addf %711, %722 : vector<16x128xf32>
    %c34_148 = arith.constant 34 : index
    %724 = memref.load %arg3[%c34_148] : memref<81xf32, #tpu.memory_space<smem>>
    %725 = vector.broadcast %724 : f32 to vector<16x128xf32>
    %726 = arith.mulf %725, %704 : vector<16x128xf32>
    %727 = arith.addf %715, %726 : vector<16x128xf32>
    %c61_149 = arith.constant 61 : index
    %728 = memref.load %arg3[%c61_149] : memref<81xf32, #tpu.memory_space<smem>>
    %729 = vector.broadcast %728 : f32 to vector<16x128xf32>
    %730 = arith.mulf %729, %704 : vector<16x128xf32>
    %731 = arith.addf %719, %730 : vector<16x128xf32>
    %c127_i32_150 = arith.constant 127 : i32
    %732 = tpu.dynamic_rotate %704 by %c127_i32_150 dim 1 : vector<16x128xf32>, i32 -> vector<16x128xf32>
    %cst_151 = arith.constant 0.000000e+00 : f32
    %733 = vector.broadcast %cst_151 : f32 to vector<16x128xf32>
    %734 = arith.select %4, %732, %733 : vector<16x128xi1>, vector<16x128xf32>
    %c8_152 = arith.constant 8 : index
    %735 = memref.load %arg3[%c8_152] : memref<81xf32, #tpu.memory_space<smem>>
    %736 = vector.broadcast %735 : f32 to vector<16x128xf32>
    %737 = arith.mulf %736, %734 : vector<16x128xf32>
    %738 = arith.addf %723, %737 : vector<16x128xf32>
    %c35_153 = arith.constant 35 : index
    %739 = memref.load %arg3[%c35_153] : memref<81xf32, #tpu.memory_space<smem>>
    %740 = vector.broadcast %739 : f32 to vector<16x128xf32>
    %741 = arith.mulf %740, %734 : vector<16x128xf32>
    %742 = arith.addf %727, %741 : vector<16x128xf32>
    %c62_154 = arith.constant 62 : index
    %743 = memref.load %arg3[%c62_154] : memref<81xf32, #tpu.memory_space<smem>>
    %744 = vector.broadcast %743 : f32 to vector<16x128xf32>
    %745 = arith.mulf %744, %734 : vector<16x128xf32>
    %746 = arith.addf %731, %745 : vector<16x128xf32>
    %c1_i32_155 = arith.constant 1 : i32
    %747 = tpu.dynamic_rotate %607 by %c1_i32_155 dim 0 : vector<32x128xf32>, i32 -> vector<32x128xf32>
    %748 = vector.extract_strided_slice %747 {offsets = [8, 0], sizes = [16, 128], strides = [1, 1]} : vector<32x128xf32> to vector<16x128xf32>
    %c1_i32_156 = arith.constant 1 : i32
    %749 = tpu.dynamic_rotate %748 by %c1_i32_156 dim 1 : vector<16x128xf32>, i32 -> vector<16x128xf32>
    %cst_157 = arith.constant 0.000000e+00 : f32
    %750 = vector.broadcast %cst_157 : f32 to vector<16x128xf32>
    %751 = arith.select %6, %749, %750 : vector<16x128xi1>, vector<16x128xf32>
    %c9_158 = arith.constant 9 : index
    %752 = memref.load %arg3[%c9_158] : memref<81xf32, #tpu.memory_space<smem>>
    %753 = vector.broadcast %752 : f32 to vector<16x128xf32>
    %754 = arith.mulf %753, %751 : vector<16x128xf32>
    %755 = arith.addf %738, %754 : vector<16x128xf32>
    %c36_159 = arith.constant 36 : index
    %756 = memref.load %arg3[%c36_159] : memref<81xf32, #tpu.memory_space<smem>>
    %757 = vector.broadcast %756 : f32 to vector<16x128xf32>
    %758 = arith.mulf %757, %751 : vector<16x128xf32>
    %759 = arith.addf %742, %758 : vector<16x128xf32>
    %c63_160 = arith.constant 63 : index
    %760 = memref.load %arg3[%c63_160] : memref<81xf32, #tpu.memory_space<smem>>
    %761 = vector.broadcast %760 : f32 to vector<16x128xf32>
    %762 = arith.mulf %761, %751 : vector<16x128xf32>
    %763 = arith.addf %746, %762 : vector<16x128xf32>
    %c10_161 = arith.constant 10 : index
    %764 = memref.load %arg3[%c10_161] : memref<81xf32, #tpu.memory_space<smem>>
    %765 = vector.broadcast %764 : f32 to vector<16x128xf32>
    %766 = arith.mulf %765, %748 : vector<16x128xf32>
    %767 = arith.addf %755, %766 : vector<16x128xf32>
    %c37_162 = arith.constant 37 : index
    %768 = memref.load %arg3[%c37_162] : memref<81xf32, #tpu.memory_space<smem>>
    %769 = vector.broadcast %768 : f32 to vector<16x128xf32>
    %770 = arith.mulf %769, %748 : vector<16x128xf32>
    %771 = arith.addf %759, %770 : vector<16x128xf32>
    %c64_163 = arith.constant 64 : index
    %772 = memref.load %arg3[%c64_163] : memref<81xf32, #tpu.memory_space<smem>>
    %773 = vector.broadcast %772 : f32 to vector<16x128xf32>
    %774 = arith.mulf %773, %748 : vector<16x128xf32>
    %775 = arith.addf %763, %774 : vector<16x128xf32>
    %c127_i32_164 = arith.constant 127 : i32
    %776 = tpu.dynamic_rotate %748 by %c127_i32_164 dim 1 : vector<16x128xf32>, i32 -> vector<16x128xf32>
    %cst_165 = arith.constant 0.000000e+00 : f32
    %777 = vector.broadcast %cst_165 : f32 to vector<16x128xf32>
    %778 = arith.select %4, %776, %777 : vector<16x128xi1>, vector<16x128xf32>
    %c11_166 = arith.constant 11 : index
    %779 = memref.load %arg3[%c11_166] : memref<81xf32, #tpu.memory_space<smem>>
    %780 = vector.broadcast %779 : f32 to vector<16x128xf32>
    %781 = arith.mulf %780, %778 : vector<16x128xf32>
    %782 = arith.addf %767, %781 : vector<16x128xf32>
    %c38_167 = arith.constant 38 : index
    %783 = memref.load %arg3[%c38_167] : memref<81xf32, #tpu.memory_space<smem>>
    %784 = vector.broadcast %783 : f32 to vector<16x128xf32>
    %785 = arith.mulf %784, %778 : vector<16x128xf32>
    %786 = arith.addf %771, %785 : vector<16x128xf32>
    %c65_168 = arith.constant 65 : index
    %787 = memref.load %arg3[%c65_168] : memref<81xf32, #tpu.memory_space<smem>>
    %788 = vector.broadcast %787 : f32 to vector<16x128xf32>
    %789 = arith.mulf %788, %778 : vector<16x128xf32>
    %790 = arith.addf %775, %789 : vector<16x128xf32>
    %791 = vector.extract_strided_slice %607 {offsets = [8, 0], sizes = [16, 128], strides = [1, 1]} : vector<32x128xf32> to vector<16x128xf32>
    %c1_i32_169 = arith.constant 1 : i32
    %792 = tpu.dynamic_rotate %791 by %c1_i32_169 dim 1 : vector<16x128xf32>, i32 -> vector<16x128xf32>
    %cst_170 = arith.constant 0.000000e+00 : f32
    %793 = vector.broadcast %cst_170 : f32 to vector<16x128xf32>
    %794 = arith.select %6, %792, %793 : vector<16x128xi1>, vector<16x128xf32>
    %c12_171 = arith.constant 12 : index
    %795 = memref.load %arg3[%c12_171] : memref<81xf32, #tpu.memory_space<smem>>
    %796 = vector.broadcast %795 : f32 to vector<16x128xf32>
    %797 = arith.mulf %796, %794 : vector<16x128xf32>
    %798 = arith.addf %782, %797 : vector<16x128xf32>
    %c39_172 = arith.constant 39 : index
    %799 = memref.load %arg3[%c39_172] : memref<81xf32, #tpu.memory_space<smem>>
    %800 = vector.broadcast %799 : f32 to vector<16x128xf32>
    %801 = arith.mulf %800, %794 : vector<16x128xf32>
    %802 = arith.addf %786, %801 : vector<16x128xf32>
    %c66_173 = arith.constant 66 : index
    %803 = memref.load %arg3[%c66_173] : memref<81xf32, #tpu.memory_space<smem>>
    %804 = vector.broadcast %803 : f32 to vector<16x128xf32>
    %805 = arith.mulf %804, %794 : vector<16x128xf32>
    %806 = arith.addf %790, %805 : vector<16x128xf32>
    %c13_174 = arith.constant 13 : index
    %807 = memref.load %arg3[%c13_174] : memref<81xf32, #tpu.memory_space<smem>>
    %808 = vector.broadcast %807 : f32 to vector<16x128xf32>
    %809 = arith.mulf %808, %791 : vector<16x128xf32>
    %810 = arith.addf %798, %809 : vector<16x128xf32>
    %c40_175 = arith.constant 40 : index
    %811 = memref.load %arg3[%c40_175] : memref<81xf32, #tpu.memory_space<smem>>
    %812 = vector.broadcast %811 : f32 to vector<16x128xf32>
    %813 = arith.mulf %812, %791 : vector<16x128xf32>
    %814 = arith.addf %802, %813 : vector<16x128xf32>
    %c67_176 = arith.constant 67 : index
    %815 = memref.load %arg3[%c67_176] : memref<81xf32, #tpu.memory_space<smem>>
    %816 = vector.broadcast %815 : f32 to vector<16x128xf32>
    %817 = arith.mulf %816, %791 : vector<16x128xf32>
    %818 = arith.addf %806, %817 : vector<16x128xf32>
    %c127_i32_177 = arith.constant 127 : i32
    %819 = tpu.dynamic_rotate %791 by %c127_i32_177 dim 1 : vector<16x128xf32>, i32 -> vector<16x128xf32>
    %cst_178 = arith.constant 0.000000e+00 : f32
    %820 = vector.broadcast %cst_178 : f32 to vector<16x128xf32>
    %821 = arith.select %4, %819, %820 : vector<16x128xi1>, vector<16x128xf32>
    %c14_179 = arith.constant 14 : index
    %822 = memref.load %arg3[%c14_179] : memref<81xf32, #tpu.memory_space<smem>>
    %823 = vector.broadcast %822 : f32 to vector<16x128xf32>
    %824 = arith.mulf %823, %821 : vector<16x128xf32>
    %825 = arith.addf %810, %824 : vector<16x128xf32>
    %c41_180 = arith.constant 41 : index
    %826 = memref.load %arg3[%c41_180] : memref<81xf32, #tpu.memory_space<smem>>
    %827 = vector.broadcast %826 : f32 to vector<16x128xf32>
    %828 = arith.mulf %827, %821 : vector<16x128xf32>
    %829 = arith.addf %814, %828 : vector<16x128xf32>
    %c68_181 = arith.constant 68 : index
    %830 = memref.load %arg3[%c68_181] : memref<81xf32, #tpu.memory_space<smem>>
    %831 = vector.broadcast %830 : f32 to vector<16x128xf32>
    %832 = arith.mulf %831, %821 : vector<16x128xf32>
    %833 = arith.addf %818, %832 : vector<16x128xf32>
    %c31_i32_182 = arith.constant 31 : i32
    %834 = tpu.dynamic_rotate %607 by %c31_i32_182 dim 0 : vector<32x128xf32>, i32 -> vector<32x128xf32>
    %835 = vector.extract_strided_slice %834 {offsets = [8, 0], sizes = [16, 128], strides = [1, 1]} : vector<32x128xf32> to vector<16x128xf32>
    %c1_i32_183 = arith.constant 1 : i32
    %836 = tpu.dynamic_rotate %835 by %c1_i32_183 dim 1 : vector<16x128xf32>, i32 -> vector<16x128xf32>
    %cst_184 = arith.constant 0.000000e+00 : f32
    %837 = vector.broadcast %cst_184 : f32 to vector<16x128xf32>
    %838 = arith.select %6, %836, %837 : vector<16x128xi1>, vector<16x128xf32>
    %c15_185 = arith.constant 15 : index
    %839 = memref.load %arg3[%c15_185] : memref<81xf32, #tpu.memory_space<smem>>
    %840 = vector.broadcast %839 : f32 to vector<16x128xf32>
    %841 = arith.mulf %840, %838 : vector<16x128xf32>
    %842 = arith.addf %825, %841 : vector<16x128xf32>
    %c42_186 = arith.constant 42 : index
    %843 = memref.load %arg3[%c42_186] : memref<81xf32, #tpu.memory_space<smem>>
    %844 = vector.broadcast %843 : f32 to vector<16x128xf32>
    %845 = arith.mulf %844, %838 : vector<16x128xf32>
    %846 = arith.addf %829, %845 : vector<16x128xf32>
    %c69_187 = arith.constant 69 : index
    %847 = memref.load %arg3[%c69_187] : memref<81xf32, #tpu.memory_space<smem>>
    %848 = vector.broadcast %847 : f32 to vector<16x128xf32>
    %849 = arith.mulf %848, %838 : vector<16x128xf32>
    %850 = arith.addf %833, %849 : vector<16x128xf32>
    %c16_188 = arith.constant 16 : index
    %851 = memref.load %arg3[%c16_188] : memref<81xf32, #tpu.memory_space<smem>>
    %852 = vector.broadcast %851 : f32 to vector<16x128xf32>
    %853 = arith.mulf %852, %835 : vector<16x128xf32>
    %854 = arith.addf %842, %853 : vector<16x128xf32>
    %c43_189 = arith.constant 43 : index
    %855 = memref.load %arg3[%c43_189] : memref<81xf32, #tpu.memory_space<smem>>
    %856 = vector.broadcast %855 : f32 to vector<16x128xf32>
    %857 = arith.mulf %856, %835 : vector<16x128xf32>
    %858 = arith.addf %846, %857 : vector<16x128xf32>
    %c70_190 = arith.constant 70 : index
    %859 = memref.load %arg3[%c70_190] : memref<81xf32, #tpu.memory_space<smem>>
    %860 = vector.broadcast %859 : f32 to vector<16x128xf32>
    %861 = arith.mulf %860, %835 : vector<16x128xf32>
    %862 = arith.addf %850, %861 : vector<16x128xf32>
    %c127_i32_191 = arith.constant 127 : i32
    %863 = tpu.dynamic_rotate %835 by %c127_i32_191 dim 1 : vector<16x128xf32>, i32 -> vector<16x128xf32>
    %cst_192 = arith.constant 0.000000e+00 : f32
    %864 = vector.broadcast %cst_192 : f32 to vector<16x128xf32>
    %865 = arith.select %4, %863, %864 : vector<16x128xi1>, vector<16x128xf32>
    %c17_193 = arith.constant 17 : index
    %866 = memref.load %arg3[%c17_193] : memref<81xf32, #tpu.memory_space<smem>>
    %867 = vector.broadcast %866 : f32 to vector<16x128xf32>
    %868 = arith.mulf %867, %865 : vector<16x128xf32>
    %869 = arith.addf %854, %868 : vector<16x128xf32>
    %c44_194 = arith.constant 44 : index
    %870 = memref.load %arg3[%c44_194] : memref<81xf32, #tpu.memory_space<smem>>
    %871 = vector.broadcast %870 : f32 to vector<16x128xf32>
    %872 = arith.mulf %871, %865 : vector<16x128xf32>
    %873 = arith.addf %858, %872 : vector<16x128xf32>
    %c71_195 = arith.constant 71 : index
    %874 = memref.load %arg3[%c71_195] : memref<81xf32, #tpu.memory_space<smem>>
    %875 = vector.broadcast %874 : f32 to vector<16x128xf32>
    %876 = arith.mulf %875, %865 : vector<16x128xf32>
    %877 = arith.addf %862, %876 : vector<16x128xf32>
    %c1_i32_196 = arith.constant 1 : i32
    %878 = tpu.dynamic_rotate %609 by %c1_i32_196 dim 0 : vector<32x128xf32>, i32 -> vector<32x128xf32>
    %879 = vector.extract_strided_slice %878 {offsets = [8, 0], sizes = [16, 128], strides = [1, 1]} : vector<32x128xf32> to vector<16x128xf32>
    %c1_i32_197 = arith.constant 1 : i32
    %880 = tpu.dynamic_rotate %879 by %c1_i32_197 dim 1 : vector<16x128xf32>, i32 -> vector<16x128xf32>
    %cst_198 = arith.constant 0.000000e+00 : f32
    %881 = vector.broadcast %cst_198 : f32 to vector<16x128xf32>
    %882 = arith.select %6, %880, %881 : vector<16x128xi1>, vector<16x128xf32>
    %c18_199 = arith.constant 18 : index
    %883 = memref.load %arg3[%c18_199] : memref<81xf32, #tpu.memory_space<smem>>
    %884 = vector.broadcast %883 : f32 to vector<16x128xf32>
    %885 = arith.mulf %884, %882 : vector<16x128xf32>
    %886 = arith.addf %869, %885 : vector<16x128xf32>
    %c45_200 = arith.constant 45 : index
    %887 = memref.load %arg3[%c45_200] : memref<81xf32, #tpu.memory_space<smem>>
    %888 = vector.broadcast %887 : f32 to vector<16x128xf32>
    %889 = arith.mulf %888, %882 : vector<16x128xf32>
    %890 = arith.addf %873, %889 : vector<16x128xf32>
    %c72_201 = arith.constant 72 : index
    %891 = memref.load %arg3[%c72_201] : memref<81xf32, #tpu.memory_space<smem>>
    %892 = vector.broadcast %891 : f32 to vector<16x128xf32>
    %893 = arith.mulf %892, %882 : vector<16x128xf32>
    %894 = arith.addf %877, %893 : vector<16x128xf32>
    %c19_202 = arith.constant 19 : index
    %895 = memref.load %arg3[%c19_202] : memref<81xf32, #tpu.memory_space<smem>>
    %896 = vector.broadcast %895 : f32 to vector<16x128xf32>
    %897 = arith.mulf %896, %879 : vector<16x128xf32>
    %898 = arith.addf %886, %897 : vector<16x128xf32>
    %c46_203 = arith.constant 46 : index
    %899 = memref.load %arg3[%c46_203] : memref<81xf32, #tpu.memory_space<smem>>
    %900 = vector.broadcast %899 : f32 to vector<16x128xf32>
    %901 = arith.mulf %900, %879 : vector<16x128xf32>
    %902 = arith.addf %890, %901 : vector<16x128xf32>
    %c73_204 = arith.constant 73 : index
    %903 = memref.load %arg3[%c73_204] : memref<81xf32, #tpu.memory_space<smem>>
    %904 = vector.broadcast %903 : f32 to vector<16x128xf32>
    %905 = arith.mulf %904, %879 : vector<16x128xf32>
    %906 = arith.addf %894, %905 : vector<16x128xf32>
    %c127_i32_205 = arith.constant 127 : i32
    %907 = tpu.dynamic_rotate %879 by %c127_i32_205 dim 1 : vector<16x128xf32>, i32 -> vector<16x128xf32>
    %cst_206 = arith.constant 0.000000e+00 : f32
    %908 = vector.broadcast %cst_206 : f32 to vector<16x128xf32>
    %909 = arith.select %4, %907, %908 : vector<16x128xi1>, vector<16x128xf32>
    %c20_207 = arith.constant 20 : index
    %910 = memref.load %arg3[%c20_207] : memref<81xf32, #tpu.memory_space<smem>>
    %911 = vector.broadcast %910 : f32 to vector<16x128xf32>
    %912 = arith.mulf %911, %909 : vector<16x128xf32>
    %913 = arith.addf %898, %912 : vector<16x128xf32>
    %c47_208 = arith.constant 47 : index
    %914 = memref.load %arg3[%c47_208] : memref<81xf32, #tpu.memory_space<smem>>
    %915 = vector.broadcast %914 : f32 to vector<16x128xf32>
    %916 = arith.mulf %915, %909 : vector<16x128xf32>
    %917 = arith.addf %902, %916 : vector<16x128xf32>
    %c74_209 = arith.constant 74 : index
    %918 = memref.load %arg3[%c74_209] : memref<81xf32, #tpu.memory_space<smem>>
    %919 = vector.broadcast %918 : f32 to vector<16x128xf32>
    %920 = arith.mulf %919, %909 : vector<16x128xf32>
    %921 = arith.addf %906, %920 : vector<16x128xf32>
    %922 = vector.extract_strided_slice %609 {offsets = [8, 0], sizes = [16, 128], strides = [1, 1]} : vector<32x128xf32> to vector<16x128xf32>
    %c1_i32_210 = arith.constant 1 : i32
    %923 = tpu.dynamic_rotate %922 by %c1_i32_210 dim 1 : vector<16x128xf32>, i32 -> vector<16x128xf32>
    %cst_211 = arith.constant 0.000000e+00 : f32
    %924 = vector.broadcast %cst_211 : f32 to vector<16x128xf32>
    %925 = arith.select %6, %923, %924 : vector<16x128xi1>, vector<16x128xf32>
    %c21_212 = arith.constant 21 : index
    %926 = memref.load %arg3[%c21_212] : memref<81xf32, #tpu.memory_space<smem>>
    %927 = vector.broadcast %926 : f32 to vector<16x128xf32>
    %928 = arith.mulf %927, %925 : vector<16x128xf32>
    %929 = arith.addf %913, %928 : vector<16x128xf32>
    %c48_213 = arith.constant 48 : index
    %930 = memref.load %arg3[%c48_213] : memref<81xf32, #tpu.memory_space<smem>>
    %931 = vector.broadcast %930 : f32 to vector<16x128xf32>
    %932 = arith.mulf %931, %925 : vector<16x128xf32>
    %933 = arith.addf %917, %932 : vector<16x128xf32>
    %c75_214 = arith.constant 75 : index
    %934 = memref.load %arg3[%c75_214] : memref<81xf32, #tpu.memory_space<smem>>
    %935 = vector.broadcast %934 : f32 to vector<16x128xf32>
    %936 = arith.mulf %935, %925 : vector<16x128xf32>
    %937 = arith.addf %921, %936 : vector<16x128xf32>
    %c22_215 = arith.constant 22 : index
    %938 = memref.load %arg3[%c22_215] : memref<81xf32, #tpu.memory_space<smem>>
    %939 = vector.broadcast %938 : f32 to vector<16x128xf32>
    %940 = arith.mulf %939, %922 : vector<16x128xf32>
    %941 = arith.addf %929, %940 : vector<16x128xf32>
    %c49_216 = arith.constant 49 : index
    %942 = memref.load %arg3[%c49_216] : memref<81xf32, #tpu.memory_space<smem>>
    %943 = vector.broadcast %942 : f32 to vector<16x128xf32>
    %944 = arith.mulf %943, %922 : vector<16x128xf32>
    %945 = arith.addf %933, %944 : vector<16x128xf32>
    %c76_217 = arith.constant 76 : index
    %946 = memref.load %arg3[%c76_217] : memref<81xf32, #tpu.memory_space<smem>>
    %947 = vector.broadcast %946 : f32 to vector<16x128xf32>
    %948 = arith.mulf %947, %922 : vector<16x128xf32>
    %949 = arith.addf %937, %948 : vector<16x128xf32>
    %c127_i32_218 = arith.constant 127 : i32
    %950 = tpu.dynamic_rotate %922 by %c127_i32_218 dim 1 : vector<16x128xf32>, i32 -> vector<16x128xf32>
    %cst_219 = arith.constant 0.000000e+00 : f32
    %951 = vector.broadcast %cst_219 : f32 to vector<16x128xf32>
    %952 = arith.select %4, %950, %951 : vector<16x128xi1>, vector<16x128xf32>
    %c23_220 = arith.constant 23 : index
    %953 = memref.load %arg3[%c23_220] : memref<81xf32, #tpu.memory_space<smem>>
    %954 = vector.broadcast %953 : f32 to vector<16x128xf32>
    %955 = arith.mulf %954, %952 : vector<16x128xf32>
    %956 = arith.addf %941, %955 : vector<16x128xf32>
    %c50_221 = arith.constant 50 : index
    %957 = memref.load %arg3[%c50_221] : memref<81xf32, #tpu.memory_space<smem>>
    %958 = vector.broadcast %957 : f32 to vector<16x128xf32>
    %959 = arith.mulf %958, %952 : vector<16x128xf32>
    %960 = arith.addf %945, %959 : vector<16x128xf32>
    %c77_222 = arith.constant 77 : index
    %961 = memref.load %arg3[%c77_222] : memref<81xf32, #tpu.memory_space<smem>>
    %962 = vector.broadcast %961 : f32 to vector<16x128xf32>
    %963 = arith.mulf %962, %952 : vector<16x128xf32>
    %964 = arith.addf %949, %963 : vector<16x128xf32>
    %c31_i32_223 = arith.constant 31 : i32
    %965 = tpu.dynamic_rotate %609 by %c31_i32_223 dim 0 : vector<32x128xf32>, i32 -> vector<32x128xf32>
    %966 = vector.extract_strided_slice %965 {offsets = [8, 0], sizes = [16, 128], strides = [1, 1]} : vector<32x128xf32> to vector<16x128xf32>
    %c1_i32_224 = arith.constant 1 : i32
    %967 = tpu.dynamic_rotate %966 by %c1_i32_224 dim 1 : vector<16x128xf32>, i32 -> vector<16x128xf32>
    %cst_225 = arith.constant 0.000000e+00 : f32
    %968 = vector.broadcast %cst_225 : f32 to vector<16x128xf32>
    %969 = arith.select %6, %967, %968 : vector<16x128xi1>, vector<16x128xf32>
    %c24_226 = arith.constant 24 : index
    %970 = memref.load %arg3[%c24_226] : memref<81xf32, #tpu.memory_space<smem>>
    %971 = vector.broadcast %970 : f32 to vector<16x128xf32>
    %972 = arith.mulf %971, %969 : vector<16x128xf32>
    %973 = arith.addf %956, %972 : vector<16x128xf32>
    %c51_227 = arith.constant 51 : index
    %974 = memref.load %arg3[%c51_227] : memref<81xf32, #tpu.memory_space<smem>>
    %975 = vector.broadcast %974 : f32 to vector<16x128xf32>
    %976 = arith.mulf %975, %969 : vector<16x128xf32>
    %977 = arith.addf %960, %976 : vector<16x128xf32>
    %c78_228 = arith.constant 78 : index
    %978 = memref.load %arg3[%c78_228] : memref<81xf32, #tpu.memory_space<smem>>
    %979 = vector.broadcast %978 : f32 to vector<16x128xf32>
    %980 = arith.mulf %979, %969 : vector<16x128xf32>
    %981 = arith.addf %964, %980 : vector<16x128xf32>
    %c25_229 = arith.constant 25 : index
    %982 = memref.load %arg3[%c25_229] : memref<81xf32, #tpu.memory_space<smem>>
    %983 = vector.broadcast %982 : f32 to vector<16x128xf32>
    %984 = arith.mulf %983, %966 : vector<16x128xf32>
    %985 = arith.addf %973, %984 : vector<16x128xf32>
    %c52_230 = arith.constant 52 : index
    %986 = memref.load %arg3[%c52_230] : memref<81xf32, #tpu.memory_space<smem>>
    %987 = vector.broadcast %986 : f32 to vector<16x128xf32>
    %988 = arith.mulf %987, %966 : vector<16x128xf32>
    %989 = arith.addf %977, %988 : vector<16x128xf32>
    %c79_231 = arith.constant 79 : index
    %990 = memref.load %arg3[%c79_231] : memref<81xf32, #tpu.memory_space<smem>>
    %991 = vector.broadcast %990 : f32 to vector<16x128xf32>
    %992 = arith.mulf %991, %966 : vector<16x128xf32>
    %993 = arith.addf %981, %992 : vector<16x128xf32>
    %c127_i32_232 = arith.constant 127 : i32
    %994 = tpu.dynamic_rotate %966 by %c127_i32_232 dim 1 : vector<16x128xf32>, i32 -> vector<16x128xf32>
    %cst_233 = arith.constant 0.000000e+00 : f32
    %995 = vector.broadcast %cst_233 : f32 to vector<16x128xf32>
    %996 = arith.select %4, %994, %995 : vector<16x128xi1>, vector<16x128xf32>
    %c26_234 = arith.constant 26 : index
    %997 = memref.load %arg3[%c26_234] : memref<81xf32, #tpu.memory_space<smem>>
    %998 = vector.broadcast %997 : f32 to vector<16x128xf32>
    %999 = arith.mulf %998, %996 : vector<16x128xf32>
    %1000 = arith.addf %985, %999 : vector<16x128xf32>
    %c53_235 = arith.constant 53 : index
    %1001 = memref.load %arg3[%c53_235] : memref<81xf32, #tpu.memory_space<smem>>
    %1002 = vector.broadcast %1001 : f32 to vector<16x128xf32>
    %1003 = arith.mulf %1002, %996 : vector<16x128xf32>
    %1004 = arith.addf %989, %1003 : vector<16x128xf32>
    %c80_236 = arith.constant 80 : index
    %1005 = memref.load %arg3[%c80_236] : memref<81xf32, #tpu.memory_space<smem>>
    %1006 = vector.broadcast %1005 : f32 to vector<16x128xf32>
    %1007 = arith.mulf %1006, %996 : vector<16x128xf32>
    %1008 = arith.addf %993, %1007 : vector<16x128xf32>
    %1009 = vector.extract_strided_slice %527 {offsets = [0, 8, 0], sizes = [3, 16, 128], strides = [1, 1, 1]} : vector<3x32x128xf32> to vector<3x16x128xf32>
    %1010 = vector.extract_strided_slice %1009 {offsets = [0, 0, 0], sizes = [1, 16, 128], strides = [1, 1, 1]} : vector<3x16x128xf32> to vector<1x16x128xf32>
    %1011 = vector.shape_cast %1010 : vector<1x16x128xf32> to vector<16x128xf32>
    %1012 = arith.addf %1011, %1000 : vector<16x128xf32>
    %1013 = vector.extract_strided_slice %1009 {offsets = [1, 0, 0], sizes = [1, 16, 128], strides = [1, 1, 1]} : vector<3x16x128xf32> to vector<1x16x128xf32>
    %1014 = vector.shape_cast %1013 : vector<1x16x128xf32> to vector<16x128xf32>
    %1015 = arith.addf %1014, %1004 : vector<16x128xf32>
    %1016 = vector.extract_strided_slice %1009 {offsets = [2, 0, 0], sizes = [1, 16, 128], strides = [1, 1, 1]} : vector<3x16x128xf32> to vector<1x16x128xf32>
    %1017 = vector.shape_cast %1016 : vector<1x16x128xf32> to vector<16x128xf32>
    %1018 = arith.addf %1017, %1008 : vector<16x128xf32>
    %1019 = vector.shape_cast %1012 : vector<16x128xf32> to vector<1x16x128xf32>
    %1020 = vector.shape_cast %1015 : vector<16x128xf32> to vector<1x16x128xf32>
    %1021 = vector.shape_cast %1018 : vector<16x128xf32> to vector<1x16x128xf32>
    %1022 = tpu.concatenate %1019, %1020, %1021 in 0 : vector<1x16x128xf32>, vector<1x16x128xf32>, vector<1x16x128xf32> -> vector<3x16x128xf32>
    %c1_237 = arith.constant 1 : index
    %c0_238 = arith.constant 0 : index
    %c0_239 = arith.constant 0 : index
    %c0_240 = arith.constant 0 : index
    %1023 = vector.load %arg5[%c1_237, %c0_238, %c0_239, %c0_240] : memref<2x3x16x128xf32, #tpu.memory_space<vmem>>, vector<1x3x16x128xf32>
    %1024 = vector.shape_cast %1023 : vector<1x3x16x128xf32> to vector<3x16x128xf32>
    %1025 = vector.shape_cast %1022 : vector<3x16x128xf32> to vector<1x3x16x128xf32>
    tpu.vector_store %arg5[%c1_237, %c0_238, %c0_239, %c0_240], %1025 {strides = array<i32>} : memref<2x3x16x128xf32, #tpu.memory_space<vmem>>, vector<1x3x16x128xf32>,
    return
  }
  func.func @transform_0(%arg0: i32, %arg1: i32) -> (i32, i32, i32, i32) {
    %c0_i32 = arith.constant 0 : i32
    %c0_i32_0 = arith.constant 0 : i32
    %c0_i32_1 = arith.constant 0 : i32
    %c0_i32_2 = arith.constant 0 : i32
    return %arg0, %c0_i32, %c0_i32_0, %c0_i32_1 : i32, i32, i32, i32
  }
  func.func @transform_1(%arg0: i32, %arg1: i32) -> i32 {
    %c0_i32 = arith.constant 0 : i32
    %c0_i32_0 = arith.constant 0 : i32
    return %c0_i32 : i32
  }
  func.func @transform_2(%arg0: i32, %arg1: i32) -> i32 {
    %c0_i32 = arith.constant 0 : i32
    %c0_i32_0 = arith.constant 0 : i32
    return %c0_i32 : i32
  }
  func.func @transform_3(%arg0: i32, %arg1: i32) -> (i32, i32, i32, i32) {
    %c0_i32 = arith.constant 0 : i32
    %c0_i32_0 = arith.constant 0 : i32
    %c0_i32_1 = arith.constant 0 : i32
    return %arg0, %c0_i32, %arg1, %c0_i32_0 : i32, i32, i32, i32
  }
}

</mosaic_0001>

<bundles_post_ra>
// kernel: tpu_custom_call.1
= control target key start
LH: loop header
LB: loop body
LE: loop exit
PB: predicated region body
PF: predicated region fallthrough
CT: control target
= control target key end

     0   :  { %8 = vsyncpa [#allocation3], 0  ;;  %s4358_s0 = inlined_call_operand.hbm [shape: f32[2,3,32,128], index: 0, kind: input, shape index: {}]   ;;  %s4359_s1 = inlined_call_operand.vmem [shape: f32[81], index: 1, kind: input, shape index: {}]   ;;  %s4360_s2 = inlined_call_operand.vmem [shape: f32[3], index: 2, kind: input, shape index: {}]   ;;  %s4361_s3 = inlined_call_operand.hbm [shape: f32[2,3,16,128], index: 3, kind: output, shape index: {}]  }
   0x1   :  { %9 = vsyncpa [#allocation5], 0 }
   0x2   :  { %10 = vsyncpa [#allocation8], 0 }
   0x3   :  { %11 = vsyncpa [#allocation4], 0  ;;  %s2190_s12 = smov [#allocation2]   ;;  %s30_s16 = sshll.u32 %s4359_s1, 4  ;;  %s31_s16 = int_to_ptr.vmem [resolvable:$true] %s30_s16 }
   0x4   :  { %s17_s13 = sshll.u32 %s2190_s12, 4  ;;  %s18_s13 = int_to_ptr.vmem [resolvable:$true] %s17_s13 }
   0x5   :  { %s2126_s17 = scalar_lea.vmem %s18_s13, 3072  ;;  %p2131_p1 = scmp.lt.s32.totalorder %s18_s13, %s18_s13 }
   0x6   :  { %p2127_p0 = scmp.ne.s32.totalorder %s18_s13, %s2126_s17  ;;  %p2132_p2 = scmp.lt.s32.totalorder %s2126_s17, %s2126_s17 }
   0x8   :  { %p2133_p3 = por %p2132_p2, %p2131_p1 }
   0xa   :  { %p2134_p4 = pnand %p2133_p3, %p2127_p0 }
   0xc   :  { %2137 = shalt.err (!%p2134_p4)
}
   0xd   :  { %s2191_s18 = smov 128   ;;  %s2192_s19 = smov 8  }
   0xe   :  { %23 = dma.hbm_to_vmem [thread:$0]  %s4358_s0, 3072, %s18_s13, [#allocation3], %s2191_s18, %s2191_s18, %s2192_s19  }
   0xf   :  { %s2138_s22 = scalar_lea.vmem %s31_s16, 16  ;;  %p2143_p6 = scmp.lt.s32.totalorder %s31_s16, %s31_s16 }
  0x10   :  { %p2139_p5 = scmp.ne.s32.totalorder %s31_s16, %s2138_s22  ;;  %p2144_p7 = scmp.lt.s32.totalorder %s2138_s22, %s2138_s22 }
  0x12   :  { %p2145_p8 = por %p2144_p7, %p2143_p6 }
  0x14   :  { %p2146_p9 = pnand %p2145_p8, %p2139_p5 }
  0x16   :  { %2149 = shalt.err (!%p2146_p9)
}
  0x17   :  { %s2193_s1 = smov [#allocation6]   ;;  %s40_s25 = sshll.u32 %s4360_s2, 4  ;;  %s41_s25 = int_to_ptr.vmem [resolvable:$true] %s40_s25 }
  0x18   :  { %33 = dma.vmem_to_smem %s31_s16, 16, %s2193_s1, [#allocation5]  }
  0x19   :  { %s2150_s26 = scalar_lea.vmem %s41_s25, 16  ;;  %p2155_p11 = scmp.lt.s32.totalorder %s41_s25, %s41_s25 }
  0x1a   :  { %p2151_p10 = scmp.ne.s32.totalorder %s41_s25, %s2150_s26  ;;  %p2156_p12 = scmp.lt.s32.totalorder %s2150_s26, %s2150_s26 }
  0x1c   :  { %p2157_p13 = por %p2156_p12, %p2155_p11 }
  0x1e   :  { %p2158_p0 = pnand %p2157_p13, %p2151_p10 }
  0x20   :  { %2161 = shalt.err (!%p2158_p0)
}
  0x21   :  { %s2194_s0 = smov [#allocation7]  }
  0x22   :  { %43 = dma.vmem_to_smem %s41_s25, 16, %s2194_s0, [#allocation8]  }
  0x23   :  { %2182 = dma.done.wait [#allocation3], 3072  }
  0x24   :  { %2183 = vsyncadd [#allocation3], 4294964224 }
  0x25   :  { %2184 = dma.done.wait [#allocation5], 16  }
  0x26   :  { %2185 = vsyncadd [#allocation5], 4294967280 }
  0x27   :  { %2186 = dma.done.wait [#allocation8], 16  }
  0x28   :  { %2187 = vsyncadd [#allocation8], 4294967280 }
  0x29   :  { %53 = sfence }
  0x2a   :  { %v2231_v0 = vld [vmem:[#allocation2 + $0x8] sm:$0xff]  ;;  %v2240_v6 = vld [vmem:[#allocation2 + $0x10] sm:$0xff]  ;;  %s2195_s2 = smov 1   ;;  %s2196_s27 = smov 127   ;;  %v55_v52 = vlaneseq }
  0x2b   :  { %v2233_v1 = vld [vmem:[#allocation2 + $0x28] sm:$0xff]  ;;  %v217_v3 = vmul.f32 0.299, %v2231_v0  ;;  %v2242_v7 = vld [vmem:[#allocation2 + $0x30] sm:$0xff]  ;;  %v218_v10 = vmul.f32 0.299, %v2240_v6 }
  0x2c   :  { %v2235_v2 = vld [vmem:[#allocation2 + $0x48] sm:$0xff]  ;;  %v221_v4 = vmul.f32 0.587, %v2233_v1  ;;  %v2244_v8 = vld [vmem:[#allocation2 + $0x50] sm:$0xff]  ;;  %v222_v11 = vmul.f32 0.587, %v2242_v7  ;;  %v102_v24 = vmax.f32 %v2240_v6, %v2242_v7  ;;  %v110_v25 = vmin.f32 %v2240_v6, %v2242_v7 }
  0x2d   :  { %v229_v5 = vmul.f32 0.114, %v2235_v2  ;;  %v230_v12 = vmul.f32 0.114, %v2244_v8  ;;  %v2249_v13 = vld [vmem:[#allocation2 + $0x70] sm:$0xff]  ;;  %v2265_v21 = vld [vmem:[#allocation2 + $0x68] sm:$0xff]  ;;  %v101_v38 = vmax.f32 %v2231_v0, %v2233_v1  ;;  %v109_v39 = vmin.f32 %v2231_v0, %v2233_v1 }
  0x2e   :  { %v225_v9 = vadd.f32 %v221_v4, %v217_v3  ;;  %v2251_v14 = vld [vmem:[#allocation2 + $0x90] sm:$0xff]  ;;  %v226_v16 = vadd.f32 %v222_v11, %v218_v10  ;;  %v1124_v18 = vmul.f32 0.299, %v2249_v13  ;;  %v2267_v22 = vld [vmem:[#allocation2 + $0x88] sm:$0xff]  ;;  %v1123_v28 = vmul.f32 0.299, %v2265_v21 }
  0x2f   :  { %v2255_v17 = vld [vmem:[#allocation2 + $0xb0] sm:$0xff]  ;;  %v1128_v20 = vmul.f32 0.587, %v2251_v14  ;;  %v1003_v27 = vld [vmem:[#allocation2 + $0xa8] sm:$0xff]  ;;  %v1127_v29 = vmul.f32 0.587, %v2267_v22  ;;  %v1007_v31 = vmax.f32 %v2265_v21, %v2267_v22  ;;  %v2285_v34 = vmax.f32 %v102_v24, %v2244_v8 }
  0x30   :  { %v2253_v15 = vadd.f32 %v229_v5, %v225_v9  ;;  %v2262_v19 = vadd.f32 %v230_v12, %v226_v16  ;;  %v1136_v23 = vmul.f32 0.114, %v2255_v17  ;;  %v1135_v33 = vmul.f32 0.114, %v1003_v27  ;;  %v92_v4 = vld [vmem:[#allocation2 + $0x20] sm:$0xff]  ;;  %s2622_s28 = sld [smem:[#allocation6 + $0x3]] }
  0x31   :  { %v1132_v26 = vadd.f32 %v1128_v20, %v1124_v18  ;;  %v1131_v32 = vadd.f32 %v1127_v29, %v1123_v28  ;;  %v114_v35 = vmin.f32 %v110_v25, %v2244_v8  ;;  %v1008_v36 = vmax.f32 %v2249_v13, %v2251_v14  ;;  %v88_v11 = vld [vmem:[#allocation2] sm:$0xff]  ;;  %s2630_s29 = sld [smem:[#allocation6 + $0x1e]] }
  0x32   :  { %250 = vrot.lane.b32.xlu1 %v2253_v15, %s2195_s2  ;;  %238 = vrot.lane.b32.xlu0 %v2253_v15, %s2196_s27  ;;  %v1015_v37 = vmin.f32 %v2265_v21, %v2267_v22  ;;  %v1016_v40 = vmin.f32 %v2249_v13, %v2251_v14  ;;  %v2308_v44 = vmax.f32 %v1007_v31, %v1003_v27  ;;  %v2363_v62 = vand.u32 127, %v55_v52  ;;  %v96_v20 = vld [vmem:[#allocation2 + $0x40] sm:$0xff]  ;;  %s2632_s30 = sld [smem:[#allocation6 + $0x39]] }
  0x33   :  { %v2280_v30 = vadd.f32 %v1136_v23, %v1132_v26  ;;  %v2298_v41 = vadd.f32 %v1135_v33, %v1131_v32  ;;  %v2301_v42 = vadd.f32 %v114_v35, %v2285_v34  ;;  %v2304_v43 = vsub.f32 %v2285_v34, %v114_v35  ;;  %s2634_s4 = sld [smem:[#allocation6 + $0x5]] }
  0x34   :  { %v2313_v45 = vmin.f32 %v1015_v37, %v1003_v27  ;;  %v2319_v47 = vmax.f32 %v101_v38, %v2235_v2  ;;  %v2322_v48 = vmin.f32 %v109_v39, %v2235_v2  ;;  %v2325_v49 = vmax.f32 %v1008_v36, %v2255_v17  ;;  %s2638_s5 = sld [smem:[#allocation6 + $0x20]] }
  0x35   :  { %vm130_vm0 = vcmp.eq.f32.partialorder %v2304_v43, 0.0  ;;  %v2328_v50 = vmin.f32 %v1016_v40, %v2255_v17  ;;  %v1068_v54 = vsub.f32 %v2255_v17, %v2249_v13  ;;  %v1051_v57 = vsub.f32 %v2267_v22, %v1003_v27  ;;  %s2642_s6 = sld [smem:[#allocation6 + $0x3b]] }
  0x36   :  { %252 = vrot.lane.b32.xlu1 %v2262_v19, %s2195_s2  ;;  %240 = vrot.lane.b32.xlu0 %v2262_v19, %s2196_s27  ;;  %v134_v46 = vsel %vm130_vm0, 1.0, %v2304_v43  ;;  %v2334_v51 = vsub.f32 %v2319_v47, %v2322_v48  ;;  %v2341_v53 = vsub.f32 %v2308_v44, %v2313_v45  ;;  %v1067_v58 = vsub.f32 %v1003_v27, %v2265_v21  ;;  %v1001_v43 = vld [vmem:[#allocation2 + $0x98] sm:$0xff]  ;;  %s2649_s7 = sld [smem:[#allocation7]] }
  0x37   :  { %2090 = vrcp.f32 %v134_v46  ;;  %v2350_v56 = vsub.f32 %v2325_v49, %v2328_v50  ;;  %v162_v59 = vsub.f32 %v2244_v8, %v2240_v6  ;;  %v178_v60 = vsub.f32 %v2240_v6, %v2242_v7  ;;  %s2651_s8 = sld [smem:[#allocation7 + $0x1]] }
  0x38   :  { %vm129_vm1 = vcmp.eq.f32.partialorder %v2334_v51, 0.0  ;;  %vm1035_vm2 = vcmp.eq.f32.partialorder %v2341_v53, 0.0  ;;  %v146_v63 = vsub.f32 %v2242_v7, %v2244_v8  ;;  %v1052_v5 = vsub.f32 %v2251_v14, %v2255_v17  ;;  %s2655_s9 = sld [smem:[#allocation7 + $0x2]] }
  0x39   :  { %v133_v55 = vsel %vm129_vm1, 1.0, %v2334_v51  ;;  %v1039_v61 = vsel %vm1035_vm2, 1.0, %v2341_v53  ;;  %vm1036_vm3 = vcmp.eq.f32.partialorder %v2350_v56, 0.0  ;;  %v2372_v9 = vshrl.u32 %v55_v52, 7  ;;  %s2659_s10 = sld [smem:[#allocation6]] }
  0x3a   :  { %1146 = vrot.lane.b32.xlu1 %v2280_v30, %s2196_s27  ;;  %1144 = vrot.lane.b32.xlu0 %v2298_v41, %s2196_s27  ;;  %2092 = vrcp.f32 %v133_v55  ;;  %v1040_v3 = vsel %vm1036_vm3, 1.0, %v2350_v56  ;;  %v145_v10 = vsub.f32 %v2233_v1, %v2235_v2  ;;  %v2376_v12 = vmul.f32 60.0, %v1068_v54  ;;  %v91_v54 = vld [vmem:[#allocation2 + $0x18] sm:$0xff]  ;;  %s2661_s11 = sld [smem:[#allocation6 + $0x1b]] }
  0x3b   :  { %2094 = vrcp.f32 %v1039_v61  ;;  %v1084_v8 = vsub.f32 %v2249_v13, %v2251_v14  ;;  %v1055_v16 = vmul.f32 60.0, %v1051_v57  ;;  %v1083_v18 = vsub.f32 %v2265_v21, %v2267_v22  ;;  %v95_v55 = vld [vmem:[#allocation2 + $0x38] sm:$0xff]  ;;  %s2663_s12 = sld [smem:[#allocation6 + $0x36]] }
  0x3c   :  { %2096 = vrcp.f32 %v1040_v3  ;;  %v1071_v23 = vmul.f32 60.0, %v1067_v58  ;;  %v166_v24 = vmul.f32 60.0, %v162_v59  ;;  %v182_v25 = vmul.f32 60.0, %v178_v60  ;;  %v99_v61 = vld [vmem:[#allocation2 + $0x58] sm:$0xff]  ;;  %s2667_s13 = sld [smem:[#allocation6 + $0x1]] }
  0x3d   :  { %v220_v26 = vmul.f32 0.587, %v92_v4  ;;  %v150_v27 = vmul.f32 60.0, %v146_v63  ;;  %v161_v28 = vsub.f32 %v2235_v2, %v2231_v0  ;;  %v177_v29 = vsub.f32 %v2231_v0, %v2233_v1  ;;  %s2671_s14 = sld [smem:[#allocation6 + $0x1c]] }
  0x3e   :  { %1158 = vrot.lane.b32.xlu1 %v2280_v30, %s2195_s2  ;;  %1156 = vrot.lane.b32.xlu0 %v2298_v41, %s2195_s2  ;;  %v216_v31 = vmul.f32 0.299, %v88_v11  ;;  %vm264_vm4 = vcmp.lt.s32.totalorder %v2372_v9, 7  ;;  %v228_v32 = vmul.f32 0.114, %v96_v20  ;;  %v262_v33 = vrot.slane %v2262_v19, 1 }
  0x3f   :  { %v261_v35 = vrot.slane %v2253_v15, 1  ;;  %vm82_vm5 = vcmp.lt.s32.totalorder %v2363_v62, 16  ;;  %vm142_vm6 = vcmp.eq.f32.partialorder %v2285_v34, %v2240_v6  ;;  %vm158_vm7 = vcmp.eq.f32.partialorder %v2285_v34, %v2242_v7  ;;  %s2673_s15 = sld [smem:[#allocation6 + $0x37]] }
  0x40   :  { %vm273_vm8 = vcmp.lt.s32.totalorder %v2372_v9, 1  ;;  %v149_v2 = vmul.f32 60.0, %v145_v10  ;;  %vm141_vm9 = vcmp.eq.f32.partialorder %v2319_v47, %v2231_v0  ;;  %v224_v39 = vadd.f32 %v220_v26, %v216_v31  ;;  %s2675_s16 = sld [smem:[#allocation6 + $0x2]] }
  0x41   :  { %vm157_vm10 = vcmp.eq.f32.partialorder %v2319_v47, %v2233_v1  ;;  %v165_v46 = vmul.f32 60.0, %v161_v28  ;;  %v181_v52 = vmul.f32 60.0, %v177_v29  ;;  %vm1047_vm11 = vcmp.eq.f32.partialorder %v2308_v44, %v2265_v21  ;;  %s2679_s17 = sld [smem:[#allocation6 + $0x1d]] }
  0x42   :  { %v232_v59 = vadd.f32 %v228_v32, %v224_v39  ;;  %v266_v60 = vsel %vm264_vm4, %v261_v35, %v262_v33  ;;  %vm1063_vm12 = vcmp.eq.f32.partialorder %v2308_v44, %v2267_v22  ;;  %v1087_v63 = vmul.f32 60.0, %v1083_v18  ;;  %s2683_s20 = sld [smem:[#allocation6 + $0x38]] }
  0x43   :  { %v1088_v3 = vmul.f32 60.0, %v1084_v8  ;;  %v270_v4 = vrot.slane %v2253_v15, 7  ;;  %v231_v29 = vmul.f32 0.114, %v99_v61  ;;  %v271_v15 = vrot.slane %v2262_v19, 7  ;;  %s2687_s21 = sld [smem:[#allocation6 + $0x4]] }
  0x44   :  { %v2091_v36 = vpop.eup %2090  ;;  %v269_v20 = vrot.slane %v232_v59, 7  ;;  %v1056_v1 = vmul.f32 60.0, %v1052_v5  ;;  %v1129_v5 = vmul.f32 0.587, %v1001_v43  ;;  %vm1064_vm15 = vcmp.eq.f32.partialorder %v2325_v49, %v2251_v14  ;;  %s2691_s22 = sld [smem:[#allocation6 + $0x1f]] }
  0x45   :  { %v170_v37 = vmul.f32 %v2091_v36, %v166_v24  ;;  %v186_v38 = vmul.f32 %v2091_v36, %v182_v25  ;;  %v154_v40 = vmul.f32 %v2091_v36, %v150_v27  ;;  %v219_v24 = vmul.f32 0.299, %v91_v54  ;;  %v997_v54 = vld [vmem:[#allocation2 + $0x78] sm:$0xff]  ;;  %s2695_s1 = sld [smem:[#allocation6 + $0x3a]] }
  0x46   :  { %v223_v25 = vmul.f32 0.587, %v95_v55  ;;  %v1125_v61 = vmul.f32 0.299, %v997_v54  ;;  %v275_v17 = vsel %vm273_vm8, %v270_v4, %v271_v15  ;;  %s2699_s23 = sld [smem:[#allocation6 + $0x6]] }
  0x47   :  { %v174_v57 = vadd.f32 120.0, %v170_v37  ;;  %v190_v58 = vadd.f32 240.0, %v186_v38  ;;  %v2093_v10 = vpop.eup %2092  ;;  %v276_v37 = vsel %vm273_vm8, %v269_v20, %v270_v4  ;;  %s2707_s24 = sld [smem:[#allocation6 + $0x21]] }
  0x48   :  { %v169_v27 = vmul.f32 %v2093_v10, %v165_v46  ;;  %v185_v28 = vmul.f32 %v2093_v10, %v181_v52  ;;  %v2095_v31 = vpop.eup %2094  ;;  %v153_v18 = vmul.f32 %v2093_v10, %v149_v2  ;;  %v227_v34 = vadd.f32 %v223_v25, %v219_v24  ;;  %s2726_s25 = sld [smem:[#allocation6 + $0x3c]] }
  0x49   :  { %v194_v11 = vsel %vm158_vm7, %v174_v57, %v190_v58  ;;  %v2097_v32 = vpop.eup %2096  ;;  %v1075_v36 = vmul.f32 %v2095_v31, %v1071_v23  ;;  %v1059_v39 = vmul.f32 %v2095_v31, %v1055_v16  ;;  %v1091_v6 = vmul.f32 %v2095_v31, %v1087_v63  ;;  %s2743_s26 = sld [smem:[#allocation6 + $0x7]] }
  0x4a   :  { %v198_v26 = vsel %vm142_vm6, %v154_v40, %v194_v11  ;;  %v173_v35 = vadd.f32 120.0, %v169_v27  ;;  %v189_v7 = vadd.f32 240.0, %v185_v28  ;;  %v1076_v52 = vmul.f32 %v2097_v32, %v2376_v12  ;;  %v1005_v28 = vld [vmem:[#allocation2 + $0xb8] sm:$0xff]  ;;  %s2760_s0 = sld [smem:[#allocation6 + $0x22]] }
  0x4b   :  { %vm202_vm13 = vcmp.lt.f32.partialorder %v198_v26, 0.0  ;;  %v206_v8 = vadd.f32 360.0, %v198_v26  ;;  %v1079_v46 = vadd.f32 120.0, %v1075_v36  ;;  %v1095_v55 = vadd.f32 240.0, %v1091_v6 }
  0x4c   :  { %v193_v2 = vsel %vm157_vm10, %v173_v35, %v189_v7  ;;  %v1092_v57 = vmul.f32 %v2097_v32, %v1088_v3  ;;  %v2438_v59 = vsub.f32 %v266_v60, %v276_v37  ;;  %v235_v0 = vadd.f32 %v231_v29, %v227_v34  ;;  %v1002_v37 = vld [vmem:[#allocation2 + $0xa0] sm:$0xff] }
  0x4d   :  { %v210_v38 = vsel %vm202_vm13, %v206_v8, %v198_v26  ;;  %v197_v16 = vsel %vm141_vm9, %v153_v18, %v193_v2  ;;  %v1099_v58 = vsel %vm1063_vm12, %v1079_v46, %v1095_v55  ;;  %v1080_v22 = vadd.f32 120.0, %v1076_v52  ;;  %v994_v8 = vld [vmem:[#allocation2 + $0x60] sm:$0xff] }
  0x4e   :  { %v214_v40 = vsel %vm130_vm0, 0.0, %v210_v38  ;;  %vm201_vm14 = vcmp.lt.f32.partialorder %v197_v16, 0.0  ;;  %v205_v12 = vadd.f32 360.0, %v197_v16  ;;  %v1103_v3 = vsel %vm1047_vm11, %v1059_v39, %v1099_v58 }
  0x4f   :  { %v2425_v23 = vsel %vm82_vm5, %v214_v40, 0.0  ;;  %v1096_v20 = vadd.f32 240.0, %v1092_v57  ;;  %v1111_v21 = vadd.f32 360.0, %v1103_v3  ;;  %v263_v4 = vrot.slane %v235_v0, 1 }
  0x50   :  { %429 = vrot.lane.b32.xlu1 %v2425_v23, %s2195_s2  ;;  %v209_v63 = vsel %vm201_vm14, %v205_v12, %v197_v16  ;;  %v358_v11 = vrot.slane %v2425_v23, 7  ;;  %vm1107_vm0 = vcmp.lt.f32.partialorder %v1103_v3, 0.0  ;;  %v2197_v24 = vmov 0.0  }
  0x51   :  { %v213_v10 = vsel %vm129_vm1, 0.0, %v209_v63  ;;  %v2459_v25 = vrot.slane %v2197_v24, 7  ;;  %v1060_v26 = vmul.f32 %v2097_v32, %v1056_v1  ;;  %v265_v27 = vsel %vm264_vm4, %v262_v33, %v263_v4  ;;  %v998_v33 = vld [vmem:[#allocation2 + $0x80] sm:$0xff] }
  0x52   :  { %v2450_v60 = vsel %vm82_vm5, %v213_v10, 0.0  ;;  %vm1048_vm1 = vcmp.eq.f32.partialorder %v2325_v49, %v2249_v13  ;;  %v1100_v29 = vsel %vm1064_vm15, %v1080_v22, %v1096_v20  ;;  %v1133_v31 = vadd.f32 %v1129_v5, %v1125_v61 }
  0x53   :  { %427 = vrot.lane.b32.xlu0 %v2450_v60, %s2195_s2  ;;  %v357_v51 = vrot.slane %v2450_v60, 7  ;;  %v2473_v18 = vrot.slane %v2197_v24, 1  ;;  %v1115_v19 = vsel %vm1107_vm0, %v1111_v21, %v1103_v3  ;;  %v2475_v15 = vsub.f32 %v265_v27, %v275_v17 }
  0x54   :  { %471 = vrot.lane.b32.xlu1 %v2425_v23, %s2196_s27  ;;  %v494_v32 = vrot.slane %v2425_v23, 1  ;;  %v1137_v35 = vmul.f32 0.114, %v1005_v28  ;;  %v1175_v7 = vrot.slane %v2298_v41, 7  ;;  %v1176_v36 = vrot.slane %v2280_v30, 7 }
  0x55   :  { %v2467_v14 = vsel %vm273_vm8, %v357_v51, %v358_v11  ;;  %4408 = vst [vmem:[#allocation14_spill] sm:$0xff] %v2473_v18  ;;  %v2485_v38 = vsel %vm273_vm8, %v2459_v25, %v357_v51  ;;  %v1104_v39 = vsel %vm1048_vm1, %v1060_v26, %v1100_v29  ;;  %v1168_v6 = vrot.slane %v2280_v30, 1 }
  0x56   :  { %v1122_v34 = vmul.f32 0.299, %v994_v8  ;;  %v117_v40 = vadd.f32 %v2322_v48, %v2319_v47  ;;  %v1119_v2 = vsel %vm1035_vm2, 0.0, %v1115_v19  ;;  %v1141_v46 = vadd.f32 %v1137_v35, %v1133_v31 }
  0x57   :  { %469 = vrot.lane.b32.xlu0 %v2450_v60, %s2196_s27  ;;  %v1179_v52 = vsel %vm273_vm8, %v1175_v7, %v1176_v36  ;;  %v1126_v54 = vmul.f32 0.587, %v998_v33  ;;  %v1134_v16 = vmul.f32 0.114, %v1002_v37  ;;  %v1167_v13 = vrot.slane %v2298_v41, 1 }
  0x58   :  { %363 = vrot.lane.b32.xlu1 %v2467_v14, %s2195_s2  ;;  %v493_v30 = vrot.slane %v2450_v60, 1  ;;  %v2506_v47 = vsel %vm264_vm4, %v494_v32, %v2473_v18  ;;  %v1112_v48 = vadd.f32 360.0, %v1104_v39  ;;  %v1169_v53 = vrot.slane %v1141_v46, 1 }
  0x59   :  { %v2510_v55 = vsel %vm82_vm5, %v1119_v2, 0.0  ;;  %vm1108_vm2 = vcmp.lt.f32.partialorder %v1104_v39, 0.0  ;;  %v1130_v57 = vadd.f32 %v1126_v54, %v1122_v34  ;;  %v1171_v41 = vsel %vm264_vm4, %v1167_v13, %v1168_v6 }
  0x5a   :  { %v121_v43 = vmul.f32 0.5, %v117_v40  ;;  %v1170_v1 = vsel %vm264_vm4, %v1168_v6, %v1169_v53  ;;  %v1261_v0 = vrot.slane %v2510_v55, 7  ;;  %v1116_v61 = vsel %vm1108_vm2, %v1112_v48, %v1104_v39 }
  0x5b   :  { %361 = vrot.lane.b32.xlu0 %v2485_v38, %s2195_s2  ;;  %v2518_v12 = vsub.f32 %v1170_v1, %v1179_v52  ;;  %v1138_v58 = vadd.f32 %v1134_v16, %v1130_v57  ;;  %v2525_v63 = vsel %vm264_vm4, %v493_v30, %v494_v32  ;;  %v1120_v5 = vsel %vm1036_vm3, 0.0, %v1116_v61 }
  0x5c   :  { %405 = vrot.lane.b32.xlu1 %v2467_v14, %s2196_s27  ;;  %v2529_v17 = vsel %vm82_vm5, %v121_v43, 0.0  ;;  %v2542_v11 = vsel %vm273_vm8, %v2459_v25, %v1261_v0  ;;  %v2549_v21 = vsel %vm82_vm5, %v1120_v5, 0.0  ;;  %v1397_v24 = vrot.slane %v2510_v55, 1 }
  0x5d   :  { %v1174_v3 = vrot.slane %v1138_v58, 7  ;;  %v565_v20 = vrot.slane %v2529_v17, 7  ;;  %v1262_v4 = vrot.slane %v2549_v21, 7  ;;  %v1398_v26 = vrot.slane %v2549_v21, 1 }
  0x5e   :  { %v122_v27 = vmul.f32 0.5, %v2301_v42  ;;  %v1023_v28 = vadd.f32 %v2313_v45, %v2308_v44  ;;  %v1024_v29 = vadd.f32 %v2328_v50, %v2325_v49  ;;  %v701_v37 = vrot.slane %v2529_v17, 1 }
  0x5f   :  { %403 = vrot.lane.b32.xlu0 %v2485_v38, %s2196_s27  ;;  %v1180_v10 = vsel %vm273_vm8, %v1174_v3, %v1175_v7  ;;  %v2558_v56 = vsel %vm273_vm8, %v2459_v25, %v565_v20  ;;  %v2567_v51 = vsel %vm273_vm8, %v1261_v0, %v1262_v4  ;;  %v2586_v31 = vsel %vm264_vm4, %v1397_v24, %v1398_v26 }
  0x60   :  { %500 = vrot.lane.b32.xlu1 %v2506_v47, %s2195_s2  ;;  %v2544_v22 = vsub.f32 %v1171_v41, %v1180_v10  ;;  %v2590_v8 = vsel %vm82_vm5, %v122_v27, 0.0  ;;  %v1027_v42 = vmul.f32 0.5, %v1023_v28  ;;  %v1028_v19 = vmul.f32 0.5, %v1024_v29 }
  0x61   :  { %v566_v44 = vrot.slane %v2590_v8, 7  ;;  %v2618_v35 = vsel %vm264_vm4, %v1398_v26, %v2473_v18  ;;  %v702_v39 = vrot.slane %v2590_v8, 1  ;;  %vm57_vm3 = vcmp.lt.s32.totalorder %v2363_v62, 127 }
  0x62   :  { %v2599_v45 = vsel %vm82_vm5, %v1027_v42, 0.0  ;;  %v2603_v49 = vsel %vm82_vm5, %v1028_v19, 0.0  ;;  %vm58_vm6 = vcmp.ge.s32.totalorder %v2363_v62, 1  ;;  %v2724_v54 = vstv %s2622_s28  ;;  %s2774_s28 = sld [smem:[#allocation6 + $0x3d]] }
  0x63   :  { %498 = vrot.lane.b32.xlu0 %v2525_v63, %s2195_s2  ;;  %v2611_v50 = vsel %vm273_vm8, %v565_v20, %v566_v44  ;;  %v1469_v33 = vrot.slane %v2599_v45, 7  ;;  %v1470_v32 = vrot.slane %v2603_v49, 7  ;;  %v1605_v6 = vrot.slane %v2599_v45, 1 }
  0x64   :  { %542 = vrot.lane.b32.xlu1 %v2506_v47, %s2196_s27  ;;  %v1606_v34 = vrot.slane %v2603_v49, 1  ;;  %v2705_v40 = vsel %vm264_vm4, %v701_v37, %v702_v39  ;;  %v2712_v2 = vsel %vm264_vm4, %v702_v39, %v2473_v18  ;;  %v2732_v16 = vmul.f32 %v2438_v59, %v2438_v59 }
  0x65   :  { %v2628_v7 = vsel %vm273_vm8, %v1469_v33, %v1470_v32  ;;  %v2647_v36 = vsel %vm273_vm8, %v2459_v25, %v1469_v33  ;;  %v2735_v13 = vstv %s2630_s29  ;;  %v2738_v30 = vstv %s2632_s30  ;;  %s2803_s29 = sld [smem:[#allocation6 + $0x8]] }
  0x66   :  { %v2716_v46 = vsel %vm264_vm4, %v1605_v6, %v1606_v34  ;;  %v2721_v52 = vsel %vm264_vm4, %v1606_v34, %v2473_v18  ;;  %v2741_v48 = vstv %s2634_s4  ;;  %v2749_v53 = vmul.f32 %v2475_v15, %v2475_v15  ;;  %s2821_s30 = sld [smem:[#allocation6 + $0x23]] }
  0x67   :  { %540 = vrot.lane.b32.xlu0 %v2525_v63, %s2196_s27  ;;  %4409 = vst [vmem:[#allocation15_spill] sm:$0xff] %v2721_v52  ;;  %4410 = vst [vmem:[#allocation16_spill] sm:$0xff] %v2741_v48  ;;  %v2752_v59 = vstv %s2638_s5  ;;  %v2755_v57 = vstv %s2642_s6  ;;  %v2758_v41 = vstv %s2649_s7  ;;  %v2792_v10 = vmul.f32 %v2518_v12, %v2518_v12  ;;  %s2838_s4 = sld [smem:[#allocation6 + $0x3e]] }
  0x68   :  { %1265 = vrot.lane.b32.xlu1 %v2542_v11, %s2195_s2  ;;  %4411 = vst [vmem:[#allocation17_spill] sm:$0xff] %v2752_v59  ;;  %4412 = vst [vmem:[#allocation18_spill] sm:$0xff] %v2755_v57  ;;  %v2763_v43 = vstv %s2651_s8  ;;  %v2766_v1 = vstv %s2655_s9  ;;  %v2769_v58 = vstv %s2667_s13  ;;  %v2846_v39 = vmul.f32 %v2544_v22, %v2544_v22  ;;  %s2852_s5 = sld [smem:[#allocation6 + $0x9]] }
  0x69   :  { %v2772_v15 = vstv %s2671_s14  ;;  %v2777_v0 = vstv %s2659_s10  ;;  %v2780_v61 = vstv %s2661_s11  ;;  %v2783_v3 = vstv %s2663_s12  ;;  %s2867_s6 = sld [smem:[#allocation6 + $0x24]] }
  0x6a   :  { %v2786_v5 = vstv %s2673_s15  ;;  %v2795_v20 = vstv %s2675_s16  ;;  %v2798_v4 = vstv %s2679_s17  ;;  %v2801_v24 = vstv %s2683_s20  ;;  %s2884_s7 = sld [smem:[#allocation6 + $0x3f]] }
  0x6b   :  { %569 = vrot.lane.b32.xlu0 %v2558_v56, %s2195_s2  ;;  %4413 = vst [vmem:[#allocation19_spill] sm:$0xff] %v2801_v24  ;;  %v2809_v26 = vmul.f32 %v2769_v58, %v2485_v38  ;;  %v2813_v12 = vmul.f32 %v2772_v15, %v2485_v38  ;;  %v2816_v27 = vstv %s2687_s21  ;;  %v2819_v28 = vstv %s2691_s22  ;;  %s2921_s8 = sld [smem:[#allocation6 + $0xa]] }
  0x6c   :  { %1307 = vrot.lane.b32.xlu1 %v2542_v11, %s2196_s27  ;;  %v2825_v19 = vmul.f32 %v2786_v5, %v2485_v38  ;;  %v2829_v44 = vmul.f32 %v2769_v58, %v2467_v14  ;;  %v2833_v33 = vmul.f32 %v2772_v15, %v2467_v14  ;;  %v2836_v32 = vstv %s2695_s1  ;;  %s2939_s9 = sld [smem:[#allocation6 + $0x25]] }
  0x6d   :  { %4414 = vst [vmem:[#allocation20_spill] sm:$0xff] %v2809_v26  ;;  %4415 = vst [vmem:[#allocation21_spill] sm:$0xff] %v2813_v12  ;;  %v2850_v6 = vmul.f32 %v2786_v5, %v2467_v14  ;;  %v2862_v22 = vmul.f32 %v2819_v28, %v2450_v60  ;;  %v2873_v14 = vmul.f32 %v2836_v32, %v2450_v60  ;;  %v2887_v12 = vstv %s2726_s25  ;;  %s2949_s10 = sld [smem:[#allocation6 + $0x40]] }
  0x6e   :  { %4416 = vst [vmem:[#allocation22_spill] sm:$0xff] %v2825_v19  ;;  %4422 = vst [vmem:[#allocation28_spill] sm:$0xff] %v2887_v12  ;;  %v2891_v26 = vmul.f32 %v2816_v27, %v2425_v23  ;;  %v2906_v12 = vmul.f32 %v2836_v32, %v2425_v23  ;;  %s2966_s11 = sld [smem:[#allocation6 + $0xb]] }
  0x6f   :  { %1267 = vrot.lane.b32.xlu0 %v2567_v51, %s2195_s2  ;;  %4418 = vst [vmem:[#allocation24_spill] sm:$0xff] %v2862_v22  ;;  %4420 = vst [vmem:[#allocation26_spill] sm:$0xff] %v2873_v14  ;;  %s2985_s12 = sld [smem:[#allocation6 + $0x26]] }
  0x70   :  { %1331 = vrot.lane.b32.xlu1 %v2510_v55, %s2195_s2  ;;  %4423 = vst [vmem:[#allocation29_spill] sm:$0xff] %v2891_v26  ;;  %s3003_s13 = sld [smem:[#allocation6 + $0x41]] }
  0x71   :  { %s3018_s14 = sld [smem:[#allocation6 + $0xc]] }
  0x72   :  { %s3032_s15 = sld [smem:[#allocation6 + $0x27]] }
  0x73   :  { %1309 = vrot.lane.b32.xlu0 %v2567_v51, %s2196_s27  ;;  %s3041_s16 = sld [smem:[#allocation6 + $0xd]] }
  0x74   :  { %1373 = vrot.lane.b32.xlu1 %v2510_v55, %s2196_s27  ;;  %s3054_s17 = sld [smem:[#allocation6 + $0x28]] }
  0x75   :  { %s3065_s20 = sld [smem:[#allocation6 + $0x42]] }
  0x76   :  { %s3078_s21 = sld [smem:[#allocation6 + $0x43]] }
  0x77   :  { %1333 = vrot.lane.b32.xlu0 %v2549_v21, %s2195_s2  ;;  %s3092_s22 = sld [smem:[#allocation6 + $0xe]] }
  0x78   :  { %1402 = vrot.lane.b32.xlu1 %v2586_v31, %s2195_s2  ;;  %s3108_s1 = sld [smem:[#allocation6 + $0x29]] }
  0x79   :  { %s3142_s25 = sld [smem:[#allocation6 + $0x10]] }
  0x7b   :  { %1375 = vrot.lane.b32.xlu0 %v2549_v21, %s2196_s27 }
  0x7c   :  { %1444 = vrot.lane.b32.xlu1 %v2586_v31, %s2196_s27 }
  0x7f   :  { %1404 = vrot.lane.b32.xlu0 %v2618_v35, %s2195_s2 }
  0x80   :  { %571 = vrot.lane.b32.xlu1 %v2611_v50, %s2195_s2 }
  0x83   :  { %1446 = vrot.lane.b32.xlu0 %v2618_v35, %s2196_s27 }
  0x84   :  { %1475 = vrot.lane.b32.xlu1 %v2628_v7, %s2195_s2 }
  0x87   :  { %1473 = vrot.lane.b32.xlu0 %v2647_v36, %s2195_s2 }
  0x88   :  { %613 = vrot.lane.b32.xlu1 %v2611_v50, %s2196_s27 }
  0x8b   :  { %611 = vrot.lane.b32.xlu0 %v2558_v56, %s2196_s27 }
  0x8c   :  { %1517 = vrot.lane.b32.xlu1 %v2628_v7, %s2196_s27 }
  0x8f   :  { %1515 = vrot.lane.b32.xlu0 %v2647_v36, %s2196_s27 }
  0x90   :  { %637 = vrot.lane.b32.xlu1 %v2590_v8, %s2195_s2 }
  0x93   :  { %635 = vrot.lane.b32.xlu0 %v2529_v17, %s2195_s2 }
  0x94   :  { %1541 = vrot.lane.b32.xlu1 %v2603_v49, %s2195_s2 }
  0x97   :  { %1539 = vrot.lane.b32.xlu0 %v2599_v45, %s2195_s2 }
  0x98   :  { %679 = vrot.lane.b32.xlu1 %v2590_v8, %s2196_s27 }
  0x9b   :  { %677 = vrot.lane.b32.xlu0 %v2529_v17, %s2196_s27 }
  0x9c   :  { %1583 = vrot.lane.b32.xlu1 %v2603_v49, %s2196_s27 }
  0x9f   :  { %1581 = vrot.lane.b32.xlu0 %v2599_v45, %s2196_s27 }
  0xa0   :  { %708 = vrot.lane.b32.xlu1 %v2712_v2, %s2195_s2 }
  0xa3   :  { %706 = vrot.lane.b32.xlu0 %v2705_v40, %s2195_s2 }
  0xa4   :  { %v251_v29 = vpop.permute.xlu1 %250  ;;  %v239_v42 = vpop.permute.xlu0 %238  ;;  %1612 = vrot.lane.b32.xlu1 %v2721_v52, %s2195_s2 }
  0xa5   :  { %v257_v37 = vsel %vm58_vm6, %v251_v29, 0.0  ;;  %v245_v38 = vsel %vm57_vm3, %v239_v42, 0.0  ;;  %v2858_v29 = vmul.f32 %v2816_v27, %v2450_v60  ;;  %v2865_v42 = vstv %s2699_s23  ;;  %s3120_s23 = sld [smem:[#allocation6 + $0x44]] }
  0xa6   :  { %v279_v34 = vsub.f32 %v245_v38, %v257_v37  ;;  %4419 = vst [vmem:[#allocation25_spill] sm:$0xff] %v2865_v42  ;;  %v2876_v37 = vstv %s2707_s24  ;;  %v2879_v38 = vstv %s2743_s26  ;;  %v2894_v60 = vstv %s2774_s28  ;;  %s3132_s24 = sld [smem:[#allocation6 + $0xf]] }
  0xa7   :  { %4417 = vst [vmem:[#allocation23_spill] sm:$0xff] %v2858_v29  ;;  %4421 = vst [vmem:[#allocation27_spill] sm:$0xff] %v2876_v37  ;;  %v2882_v29 = vstv %s2760_s0  ;;  %1610 = vrot.lane.b32.xlu0 %v2716_v46, %s2195_s2  ;;  %s3150_s26 = sld [smem:[#allocation6 + $0x2b]] }
  0xa8   :  { %v287_v22 = vmul.f32 %v279_v34, %v279_v34  ;;  %v253_v19 = vpop.permute.xlu1 %252  ;;  %v241_v42 = vpop.permute.xlu0 %240  ;;  %v2902_v34 = vmul.f32 %v2819_v28, %v2425_v23  ;;  %v2927_v23 = vmul.f32 %v2894_v60, %v2525_v63  ;;  %750 = vrot.lane.b32.xlu1 %v2712_v2, %s2196_s27  ;;  %s3160_s0 = sld [smem:[#allocation6 + $0x2a]] }
  0xa9   :  { %v258_v14 = vsel %vm58_vm6, %v253_v19, 0.0  ;;  %v246_v37 = vsel %vm57_vm3, %v241_v42, 0.0  ;;  %v2915_v19 = vmul.f32 %v2879_v38, %v2525_v63  ;;  %v2919_v42 = vmul.f32 %v2882_v29, %v2525_v63  ;;  %s3169_s28 = sld [smem:[#allocation6 + $0x45]] }
  0xaa   :  { %v2911_v26 = vadd.f32 %v2732_v16, %v287_v22  ;;  %v280_v24 = vsub.f32 %v246_v37, %v258_v14  ;;  %4426 = vst [vmem:[#allocation32_spill] sm:$0xff] %v2927_v23  ;;  %v2930_v16 = vstv %s2803_s29  ;;  %v2933_v22 = vstv %s2821_s30  ;;  %s3178_s29 = sld [smem:[#allocation6 + $0x46]] }
  0xab   :  { %4424 = vst [vmem:[#allocation30_spill] sm:$0xff] %v2915_v19  ;;  %4425 = vst [vmem:[#allocation31_spill] sm:$0xff] %v2919_v42  ;;  %v2937_v14 = vmul.f32 %v2879_v38, %v2506_v47  ;;  %v2943_v19 = vstv %s2838_s4  ;;  %v2947_v63 = vmul.f32 %v2882_v29, %v2506_v47  ;;  %748 = vrot.lane.b32.xlu0 %v2705_v40, %s2196_s27  ;;  %s1977_s30 = sld [smem:[#allocation6 + $0x49]] }
  0xac   :  { %4427 = vst [vmem:[#allocation33_spill] sm:$0xff] %v2933_v22  ;;  %2098 = vrsqrt.f32 %v2911_v26  ;;  %v288_v37 = vmul.f32 %v280_v24, %v280_v24  ;;  %v1147_v42 = vpop.permute.xlu1 %1146  ;;  %4429 = vst [vmem:[#allocation35_spill] sm:$0xff] %v2943_v19  ;;  %v1145_v23 = vpop.permute.xlu0 %1144  ;;  %v2956_v22 = vstv %s2852_s5  ;;  %v2960_v24 = vmul.f32 %v2542_v11, %v2769_v58  ;;  %1654 = vrot.lane.b32.xlu1 %v2721_v52, %s2196_s27  ;;  %s1984_s4 = sld [smem:[#allocation6 + $0x16]] }
  0xad   :  { %4428 = vst [vmem:[#allocation34_spill] sm:$0xff] %v2937_v14  ;;  %4430 = vst [vmem:[#allocation36_spill] sm:$0xff] %v2947_v63  ;;  %v2953_v14 = vmul.f32 %v2894_v60, %v2506_v47  ;;  %v2964_v19 = vmul.f32 %v2542_v11, %v2772_v15  ;;  %v2975_v47 = vmul.f32 %v2542_v11, %v2786_v5  ;;  %vm307_vm7 = vcmp.eq.f32.partialorder %v2911_v26, inf  ;;  %s1985_s5 = sld [smem:[#allocation6 + $0x31]] }
  0xae   :  { %4431 = vst [vmem:[#allocation37_spill] sm:$0xff] %v2956_v22  ;;  %4432 = vst [vmem:[#allocation38_spill] sm:$0xff] %v2960_v24  ;;  %v2971_v63 = vadd.f32 %v2749_v53, %v288_v37  ;;  %v2979_v22 = vmul.f32 %v2567_v51, %v2769_v58  ;;  %v2983_v24 = vmul.f32 %v2567_v51, %v2772_v15  ;;  %v2993_v53 = vstv %s2884_s7  ;;  %s1969_s7 = sld [smem:[#allocation6 + $0x11]] }
  0xaf   :  { %4433 = vst [vmem:[#allocation39_spill] sm:$0xff] %v2964_v19  ;;  %v2990_v19 = vstv %s2867_s6  ;;  %v2997_v11 = vmul.f32 %v2567_v51, %v2786_v5  ;;  %v3001_v58 = vmul.f32 %v2510_v55, %v2816_v27  ;;  %v3008_v37 = vmul.f32 %v2510_v55, %v2819_v28  ;;  %1652 = vrot.lane.b32.xlu0 %v2716_v46, %s2196_s27  ;;  %s1986_s6 = sld [smem:[#allocation6 + $0x4c]] }
  0xb0   :  { %4434 = vst [vmem:[#allocation40_spill] sm:$0xff] %v2983_v24  ;;  %2100 = vrsqrt.f32 %v2971_v63  ;;  %v1159_v15 = vpop.permute.xlu1 %1158  ;;  %v3012_v24 = vmul.f32 %v2510_v55, %v2836_v32  ;;  %v3016_v51 = vmul.f32 %v2549_v21, %v2816_v27  ;;  %v1152_v5 = vsel %vm57_vm3, %v1147_v42, 0.0 }
  0xb1   :  { %4435 = vst [vmem:[#allocation41_spill] sm:$0xff] %v2997_v11  ;;  %4436 = vst [vmem:[#allocation42_spill] sm:$0xff] %v3001_v58  ;;  %v1164_v58 = vsel %vm58_vm6, %v1159_v15, 0.0  ;;  %v1157_v11 = vpop.permute.xlu0 %1156  ;;  %v3030_v55 = vmul.f32 %v2549_v21, %v2836_v32  ;;  %v1151_v27 = vsel %vm57_vm3, %v1145_v23, 0.0  ;;  %v3051_v32 = vmul.f32 %v2586_v31, %v2882_v29 }
  0xb2   :  { %4437 = vst [vmem:[#allocation43_spill] sm:$0xff] %v3008_v37  ;;  %4438 = vst [vmem:[#allocation44_spill] sm:$0xff] %v3012_v24  ;;  %v3026_v37 = vmul.f32 %v2549_v21, %v2819_v28  ;;  %v1184_v42 = vsub.f32 %v1152_v5, %v1164_v58  ;;  %v1163_v15 = vsel %vm58_vm6, %v1157_v11, 0.0  ;;  %v3047_v28 = vmul.f32 %v2586_v31, %v2879_v38  ;;  %v4506_v24 = vld [vmem:[#allocation29_spill] sm:$0xff] }
  0xb3   :  { %4439 = vst [vmem:[#allocation45_spill] sm:$0xff] %v3016_v51  ;;  %4441 = vst [vmem:[#allocation47_spill] sm:$0xff] %v3030_v55  ;;  %v594_v51 = vstv %s2921_s8  ;;  %v1183_v21 = vsub.f32 %v1151_v27, %v1163_v15  ;;  %v600_v23 = vstv %s2939_s9  ;;  %v3058_v11 = vmul.f32 %v2586_v31, %v2894_v60  ;;  %s1970_s8 = sld [smem:[#allocation6 + $0x2c]] }
  0xb4   :  { %4440 = vst [vmem:[#allocation46_spill] sm:$0xff] %v3026_v37  ;;  %4442 = vst [vmem:[#allocation48_spill] sm:$0xff] %v3047_v28  ;;  %v1192_v58 = vmul.f32 %v1184_v42, %v1184_v42  ;;  %v3062_v5 = vmul.f32 %v2618_v35, %v2879_v38  ;;  %v606_v27 = vstv %s2949_s10  ;;  %v3069_v52 = vmul.f32 %v2618_v35, %v2882_v29  ;;  %s1971_s9 = sld [smem:[#allocation6 + $0x47]] }
  0xb5   :  { %4443 = vst [vmem:[#allocation49_spill] sm:$0xff] %v3051_v32  ;;  %4444 = vst [vmem:[#allocation50_spill] sm:$0xff] %v3058_v11  ;;  %v1191_v15 = vmul.f32 %v1183_v21, %v1183_v21  ;;  %v3073_v42 = vmul.f32 %v2618_v35, %v2894_v60  ;;  %v3076_v31 = vmul.f32 %v594_v51, %v2558_v56  ;;  %vm309_vm9 = vcmp.eq.f32.partialorder %v2911_v26, 0.0  ;;  %s1993_s10 = sld [smem:[#allocation6 + $0x19]] }
  0xb6   :  { %4445 = vst [vmem:[#allocation51_spill] sm:$0xff] %v3062_v5  ;;  %4446 = vst [vmem:[#allocation52_spill] sm:$0xff] %v3069_v52  ;;  %v3081_v38 = vadd.f32 %v2792_v10, %v1192_v58  ;;  %v3084_v5 = vmul.f32 %v600_v23, %v2558_v56  ;;  %v3087_v21 = vmul.f32 %v594_v51, %v2611_v50  ;;  %vm314_vm10 = vcmp.eq.f32.partialorder %v2971_v63, inf }
  0xb7   :  { %4447 = vst [vmem:[#allocation53_spill] sm:$0xff] %v3073_v42  ;;  %4448 = vst [vmem:[#allocation54_spill] sm:$0xff] %v3076_v31  ;;  %v3090_v29 = vmul.f32 %v2647_v36, %v594_v51  ;;  %v3097_v35 = vadd.f32 %v2846_v39, %v1191_v15  ;;  %v3100_v10 = vmul.f32 %v606_v27, %v2558_v56  ;;  %vm316_vm11 = vcmp.eq.f32.partialorder %v2971_v63, 0.0 }
  0xb8   :  { %4449 = vst [vmem:[#allocation55_spill] sm:$0xff] %v3084_v5  ;;  %4450 = vst [vmem:[#allocation56_spill] sm:$0xff] %v3087_v21  ;;  %v3103_v60 = vmul.f32 %v600_v23, %v2611_v50  ;;  %v3106_v58 = vmul.f32 %v2647_v36, %v600_v23  ;;  %2102 = vrsqrt.f32 %v3081_v38  ;;  %v3115_v39 = vmul.f32 %v606_v27, %v2611_v50 }
  0xb9   :  { %4451 = vst [vmem:[#allocation57_spill] sm:$0xff] %v3090_v29  ;;  %4452 = vst [vmem:[#allocation58_spill] sm:$0xff] %v3100_v10  ;;  %v3112_v29 = vstv %s2966_s11  ;;  %v3118_v56 = vmul.f32 %v2647_v36, %v606_v27  ;;  %v2099_v15 = vpop.eup %2098  ;;  %2104 = vrsqrt.f32 %v3097_v35  ;;  %v3130_v50 = vmul.f32 %v2628_v7, %v600_v23  ;;  %s1994_s11 = sld [smem:[#allocation6 + $0x34]] }
  0xba   :  { %4453 = vst [vmem:[#allocation59_spill] sm:$0xff] %v3103_v60  ;;  %4454 = vst [vmem:[#allocation60_spill] sm:$0xff] %v3106_v58  ;;  %v3124_v58 = vstv %s2985_s12  ;;  %v3127_v60 = vmul.f32 %v2628_v7, %v594_v51  ;;  %v306_v36 = vmul.f32 %v2099_v15, %v2911_v26  ;;  %v310_v51 = vand.u32 2147483648, %v2911_v26  ;;  %s1981_s12 = sld [smem:[#allocation6 + $0x15]] }
  0xbb   :  { %4455 = vst [vmem:[#allocation61_spill] sm:$0xff] %v3112_v29  ;;  %4456 = vst [vmem:[#allocation62_spill] sm:$0xff] %v3115_v39  ;;  %v3139_v39 = vmul.f32 %v2628_v7, %v606_v27  ;;  %v660_v29 = vstv %s3041_s16  ;;  %v666_v23 = vstv %s3054_s17  ;;  %v3158_v7 = vstv %s3065_s20  ;;  %s3794_s16 = sld [smem:[#allocation6 + $0x17]] }
  0xbc   :  { %4457 = vst [vmem:[#allocation63_spill] sm:$0xff] %v3118_v56  ;;  %4458 = vst [vmem:[#allocation64_spill] sm:$0xff] %v3124_v58  ;;  %v3136_v56 = vstv %s3003_s13  ;;  %v308_v15 = vsel %vm307_vm7, %v2911_v26, %v306_v36  ;;  %v672_v58 = vstv %s3078_s21  ;;  %v3197_v21 = vstv %s3108_s1  ;;  %s1982_s13 = sld [smem:[#allocation6 + $0x30]] }
  0xbd   :  { %4459 = vst [vmem:[#allocation65_spill] sm:$0xff] %v3127_v60  ;;  %4460 = vst [vmem:[#allocation66_spill] sm:$0xff] %v3130_v50  ;;  %v3147_v60 = vstv %s3018_s14  ;;  %v3155_v50 = vstv %s3032_s15  ;;  %v2101_v27 = vpop.eup %2100  ;;  %vm1218_vm12 = vcmp.eq.f32.partialorder %v3081_v38, inf  ;;  %vm1220_vm13 = vcmp.eq.f32.partialorder %v3081_v38, 0.0  ;;  %s1983_s14 = sld [smem:[#allocation6 + $0x4b]] }
  0xbe   :  { %4461 = vst [vmem:[#allocation67_spill] sm:$0xff] %v3136_v56  ;;  %4462 = vst [vmem:[#allocation68_spill] sm:$0xff] %v3139_v39  ;;  %v311_v39 = vsel %vm309_vm9, %v310_v51, %v308_v15  ;;  %v3163_v56 = vmul.f32 %v660_v29, %v2529_v17  ;;  %v313_v36 = vmul.f32 %v2101_v27, %v2971_v63  ;;  %v317_v51 = vand.u32 2147483648, %v2971_v63  ;;  %s1995_s15 = sld [smem:[#allocation6 + $0x4f]] }
  0xbf   :  { %4463 = vst [vmem:[#allocation69_spill] sm:$0xff] %v3147_v60  ;;  %4464 = vst [vmem:[#allocation70_spill] sm:$0xff] %v3155_v50  ;;  %v3167_v60 = vmul.f32 %v660_v29, %v2590_v8  ;;  %v327_v26 = vmul.f32 0.05, %v311_v39  ;;  %v3176_v50 = vmul.f32 %v2599_v45, %v660_v29  ;;  %v3183_v15 = vmul.f32 %v666_v23, %v2590_v8  ;;  %s3800_s17 = sld [smem:[#allocation6 + $0x32]] }
  0xc0   :  { %4465 = vst [vmem:[#allocation71_spill] sm:$0xff] %v3158_v7  ;;  %4466 = vst [vmem:[#allocation72_spill] sm:$0xff] %v3163_v56  ;;  %v3173_v7 = vmul.f32 %v666_v23, %v2529_v17  ;;  %v3186_v39 = vmul.f32 %v2599_v45, %v666_v23  ;;  %v3194_v56 = vstv %s3092_s22  ;;  %vm1211_vm14 = vcmp.eq.f32.partialorder %v3097_v35, inf  ;;  %s3806_s20 = sld [smem:[#allocation6 + $0x4d]] }
  0xc1   :  { %4467 = vst [vmem:[#allocation73_spill] sm:$0xff] %v3167_v60  ;;  %4469 = vst [vmem:[#allocation75_spill] sm:$0xff] %v3176_v50  ;;  %v331_v27 = vmax.f32 %v327_v26, 0.0  ;;  %v315_v60 = vsel %vm314_vm10, %v2971_v63, %v313_v36  ;;  %v3191_v50 = vmul.f32 %v672_v58, %v2529_v17  ;;  %v3203_v36 = vmul.f32 %v2599_v45, %v672_v58  ;;  %s3820_s21 = sld [smem:[#allocation6 + $0x12]] }
  0xc2   :  { %4468 = vst [vmem:[#allocation74_spill] sm:$0xff] %v3173_v7  ;;  %4470 = vst [vmem:[#allocation76_spill] sm:$0xff] %v3183_v15  ;;  %v318_v7 = vsel %vm316_vm11, %v317_v51, %v315_v60  ;;  %v3200_v15 = vmul.f32 %v672_v58, %v2590_v8  ;;  %v3206_v63 = vstv %s3142_s25  ;;  %v3209_v17 = vstv %s3120_s23  ;;  %s3830_s22 = sld [smem:[#allocation6 + $0x2d]] }
  0xc3   :  { %4471 = vst [vmem:[#allocation77_spill] sm:$0xff] %v3186_v39  ;;  %4472 = vst [vmem:[#allocation78_spill] sm:$0xff] %v3191_v50  ;;  %v335_v39 = vmin.f32 %v331_v27, 1.0  ;;  %v328_v26 = vmul.f32 0.05, %v318_v7  ;;  %v3212_v60 = vmul.f32 %v2603_v49, %v660_v29  ;;  %v3215_v51 = vmul.f32 %v2603_v49, %v666_v23  ;;  %s3840_s1 = sld [smem:[#allocation6 + $0x48]] }
  0xc4   :  { %4473 = vst [vmem:[#allocation79_spill] sm:$0xff] %v3194_v56  ;;  %4474 = vst [vmem:[#allocation80_spill] sm:$0xff] %v3197_v21  ;;  %v3218_v21 = vstv %s3150_s26  ;;  %v3225_v45 = vmul.f32 %v2603_v49, %v672_v58  ;;  %v3228_v27 = vstv %s3132_s24  ;;  %v3233_v29 = vstv %s3160_s0  ;;  %s3886_s23 = sld [smem:[#allocation6 + $0x14]] }
  0xc5   :  { %4475 = vst [vmem:[#allocation81_spill] sm:$0xff] %v3200_v15  ;;  %4476 = vst [vmem:[#allocation82_spill] sm:$0xff] %v3203_v36  ;;  %v3222_v8 = vsel %vm82_vm5, %v335_v39, 0.0  ;;  %v332_v7 = vmax.f32 %v328_v26, 0.0  ;;  %v2103_v36 = vpop.eup %2102  ;;  %v3236_v23 = vstv %s3169_s28  ;;  %v3244_v39 = vmul.f32 %v3206_v63, %v2712_v2  ;;  %v428_v10 = vpop.permute.xlu0 %427  ;;  %s3896_s24 = sld [smem:[#allocation6 + $0x2f]] }
  0xc6   :  { %4477 = vst [vmem:[#allocation83_spill] sm:$0xff] %v3206_v63  ;;  %4478 = vst [vmem:[#allocation84_spill] sm:$0xff] %v3209_v17  ;;  %843 = vrot.lane.b32.xlu0 %v3222_v8, %s2195_s2  ;;  %v2105_v49 = vpop.eup %2104  ;;  %v1217_v26 = vmul.f32 %v2103_v36, %v3081_v38  ;;  %v773_v15 = vrot.slane %v3222_v8, 7  ;;  %vm1213_vm15 = vcmp.eq.f32.partialorder %v3097_v35, 0.0  ;;  %s3938_s25 = sld [smem:[#allocation6 + $0x4a]] }
  0xc7   :  { %4479 = vst [vmem:[#allocation85_spill] sm:$0xff] %v3212_v60  ;;  %4480 = vst [vmem:[#allocation86_spill] sm:$0xff] %v3215_v51  ;;  %v3240_v51 = vmul.f32 %v3206_v63, %v2705_v40  ;;  %v336_v58 = vmin.f32 %v332_v7, 1.0  ;;  %s3950_s26 = sld [smem:[#allocation6 + $0x18]] }
  0xc8   :  { %4481 = vst [vmem:[#allocation87_spill] sm:$0xff] %v3218_v21  ;;  %4482 = vst [vmem:[#allocation88_spill] sm:$0xff] %v3222_v8  ;;  %v1219_v36 = vsel %vm1218_vm12, %v3081_v38, %v1217_v26  ;;  %s3956_s0 = sld [smem:[#allocation6 + $0x33]] }
  0xc9   :  { %4483 = vst [vmem:[#allocation89_spill] sm:$0xff] %v3225_v45  ;;  %4484 = vst [vmem:[#allocation90_spill] sm:$0xff] %v3228_v27  ;;  %v3249_v27 = vmul.f32 %v3218_v21, %v2705_v40  ;;  %v3252_v45 = vstv %s3178_s29  ;;  %v3260_v7 = vsel %vm82_vm5, %v336_v58, 0.0  ;;  %v909_v58 = vrot.slane %v3222_v8, 1  ;;  %s3967_s28 = sld [smem:[#allocation6 + $0x4e]] }
  0xca   :  { %4485 = vst [vmem:[#allocation91_spill] sm:$0xff] %v3233_v29  ;;  %4486 = vst [vmem:[#allocation92_spill] sm:$0xff] %v3236_v23  ;;  %v1210_v23 = vmul.f32 %v2105_v49, %v3097_v35  ;;  %v430_v29 = vpop.permute.xlu1 %429  ;;  %845 = vrot.lane.b32.xlu1 %v3260_v7, %s2195_s2  ;;  %v774_v49 = vrot.slane %v3260_v7, 7  ;;  %s3979_s29 = sld [smem:[#allocation6 + $0x1a]] }
  0xcb   :  { %4487 = vst [vmem:[#allocation93_spill] sm:$0xff] %v3240_v51  ;;  %4488 = vst [vmem:[#allocation94_spill] sm:$0xff] %v3244_v39  ;;  %v1221_v51 = vand.u32 2147483648, %v3081_v38  ;;  %v1214_v39 = vand.u32 2147483648, %v3097_v35  ;;  %v3274_v38 = vmul.f32 %v3218_v21, %v2712_v2  ;;  %v432_v26 = vsel %vm58_vm6, %v430_v29, 0.0 }
  0xcc   :  { %4489 = vst [vmem:[#allocation95_spill] sm:$0xff] %v3249_v27  ;;  %4490 = vst [vmem:[#allocation96_spill] sm:$0xff] %v3252_v45  ;;  %v1212_v60 = vsel %vm1211_vm14, %v3097_v35, %v1210_v23  ;;  %v910_v23 = vrot.slane %v3260_v7, 1  ;;  %v3285_v35 = vmul.f32 %v3252_v45, %v2705_v40  ;;  %v3303_v40 = vmul.f32 %v2716_v46, %v3218_v21  ;;  %v470_v21 = vpop.permute.xlu0 %469 }
  0xcd   :  { %4491 = vst [vmem:[#allocation97_spill] sm:$0xff] %v3260_v7  ;;  %v1222_v27 = vsel %vm1220_vm13, %v1221_v51, %v1219_v36  ;;  %4492 = vst [vmem:[#allocation98_spill] sm:$0xff] %v3274_v38  ;;  %v1215_v56 = vsel %vm1213_vm15, %v1214_v39, %v1212_v60  ;;  %v3280_v51 = vsel %vm273_vm8, %v773_v15, %v774_v49 }
  0xce   :  { %v1232_v17 = vmul.f32 0.05, %v1222_v27  ;;  %v472_v36 = vpop.permute.xlu1 %471  ;;  %v1231_v50 = vmul.f32 0.05, %v1215_v56  ;;  %4493 = vst [vmem:[#allocation99_spill] sm:$0xff] %v3285_v35  ;;  %v3289_v38 = vmul.f32 %v3252_v45, %v2712_v2  ;;  %v3295_v29 = vsel %vm264_vm4, %v909_v58, %v910_v23  ;;  %4497 = vst [vmem:[#allocation103_spill] sm:$0xff] %v3303_v40 }
  0xcf   :  { %v474_v60 = vsel %vm57_vm3, %v472_v36, 0.0  ;;  %4495 = vst [vmem:[#allocation101_spill] sm:$0xff] %v3295_v29  ;;  %v3306_v56 = vmul.f32 %v2724_v54, %v432_v26  ;;  %v431_v2 = vsel %vm58_vm6, %v428_v10, 0.0  ;;  %v3313_v39 = vsel %vm273_vm8, %v2459_v25, %v773_v15 }
  0xd0   :  { %v1236_v27 = vmax.f32 %v1232_v17, 0.0  ;;  %4494 = vst [vmem:[#allocation100_spill] sm:$0xff] %v3289_v38  ;;  %v3299_v17 = vmul.f32 %v2716_v46, %v3206_v63  ;;  %v3317_v49 = vmul.f32 %v2716_v46, %v3252_v45  ;;  %v3320_v58 = vmul.f32 %v2735_v13, %v432_v26 }
  0xd1   :  { %v3323_v36 = vmul.f32 %v2738_v30, %v432_v26  ;;  %v3328_v10 = vsel %vm264_vm4, %v910_v23, %v2473_v18  ;;  %v3334_v15 = vmul.f32 %v2752_v59, %v474_v60  ;;  %v3337_v46 = vmul.f32 %v2755_v57, %v474_v60 }
  0xd2   :  { %4496 = vst [vmem:[#allocation102_spill] sm:$0xff] %v3299_v17  ;;  %4498 = vst [vmem:[#allocation104_spill] sm:$0xff] %v3317_v49  ;;  %v1240_v40 = vmin.f32 %v1236_v27, 1.0  ;;  %v3331_v17 = vmul.f32 %v2741_v48, %v474_v60  ;;  %v364_v49 = vpop.permute.xlu1 %363  ;;  %v1235_v45 = vmax.f32 %v1231_v50, 0.0  ;;  %v3340_v26 = vmul.f32 %v2724_v54, %v431_v2 }
  0xd3   :  { %4499 = vst [vmem:[#allocation105_spill] sm:$0xff] %v3328_v10  ;;  %v3343_v27 = vmul.f32 %v2735_v13, %v431_v2  ;;  %v366_v23 = vsel %vm58_vm6, %v364_v49, 0.0  ;;  %v473_v60 = vsel %vm57_vm3, %v470_v21, 0.0  ;;  %v3359_v5 = vmul.f32 %v2738_v30, %v431_v2  ;;  %v362_v10 = vpop.permute.xlu0 %361 }
  0xd4   :  { %v3349_v38 = vsel %vm82_vm5, %v1240_v40, 0.0  ;;  %v370_v35 = vmul.f32 %v2777_v0, %v366_v23  ;;  %v376_v50 = vmul.f32 %v2780_v61, %v366_v23  ;;  %v382_v63 = vmul.f32 %v2783_v3, %v366_v23 }
  0xd5   :  { %1749 = vrot.lane.b32.xlu1 %v3349_v38, %s2195_s2  ;;  %v3362_v49 = vmul.f32 %v2741_v48, %v473_v60  ;;  %v3365_v40 = vmul.f32 %v2752_v59, %v473_v60  ;;  %v1239_v31 = vmin.f32 %v1235_v45, 1.0  ;;  %v3368_v21 = vmul.f32 %v2755_v57, %v473_v60 }
  0xd6   :  { %v372_v18 = vadd.f32 %v370_v35, %v2758_v41  ;;  %v378_v23 = vadd.f32 %v376_v50, %v2763_v43  ;;  %v384_v42 = vadd.f32 %v382_v63, %v2766_v1  ;;  %v406_v52 = vpop.permute.xlu1 %405  ;;  %v365_v35 = vsel %vm58_vm6, %v362_v10, 0.0 }
  0xd7   :  { %v408_v2 = vsel %vm57_vm3, %v406_v52, 0.0  ;;  %v3377_v11 = vsel %vm82_vm5, %v1239_v31, 0.0  ;;  %v369_v52 = vmul.f32 %v2777_v0, %v365_v35  ;;  %v375_v31 = vmul.f32 %v2780_v61, %v365_v35  ;;  %v404_v29 = vpop.permute.xlu0 %403 }
  0xd8   :  { %v390_v50 = vadd.f32 %v2829_v44, %v372_v18  ;;  %v396_v63 = vadd.f32 %v2833_v33, %v378_v23  ;;  %v402_v32 = vadd.f32 %v2850_v6, %v384_v42  ;;  %1747 = vrot.lane.b32.xlu0 %v3377_v11, %s2195_s2  ;;  %v381_v60 = vmul.f32 %v2783_v3, %v365_v35  ;;  %v4500_v44 = vld [vmem:[#allocation19_spill] sm:$0xff]  ;;  %v4502_v42 = vld [vmem:[#allocation21_spill] sm:$0xff]  ;;  %v4503_v6 = vld [vmem:[#allocation22_spill] sm:$0xff] }
  0xd9   :  { %887 = vrot.lane.b32.xlu1 %v3260_v7, %s2196_s27  ;;  %v412_v10 = vmul.f32 %v2795_v20, %v408_v2  ;;  %v418_v18 = vmul.f32 %v2798_v4, %v408_v2  ;;  %v424_v33 = vmul.f32 %v4500_v44, %v408_v2  ;;  %v371_v45 = vadd.f32 %v369_v52, %v2758_v41  ;;  %v4501_v52 = vld [vmem:[#allocation20_spill] sm:$0xff] }
  0xda   :  { %v501_v23 = vpop.permute.xlu1 %500  ;;  %v377_v7 = vadd.f32 %v375_v31, %v2763_v43  ;;  %v383_v28 = vadd.f32 %v381_v60, %v2766_v1  ;;  %v407_v35 = vsel %vm57_vm3, %v404_v29, 0.0 }
  0xdb   :  { %v414_v55 = vadd.f32 %v412_v10, %v390_v50  ;;  %v420_v37 = vadd.f32 %v418_v18, %v396_v63  ;;  %v426_v57 = vadd.f32 %v424_v33, %v402_v32  ;;  %v503_v2 = vsel %vm58_vm6, %v501_v23, 0.0  ;;  %v499_v59 = vpop.permute.xlu0 %498 }
  0xdc   :  { %885 = vrot.lane.b32.xlu0 %v3222_v8, %s2196_s27  ;;  %v389_v31 = vadd.f32 %v4501_v52, %v371_v45  ;;  %v395_v60 = vadd.f32 %v4502_v42, %v377_v7  ;;  %v401_v50 = vadd.f32 %v4503_v6, %v383_v28  ;;  %v411_v10 = vmul.f32 %v2795_v20, %v407_v35  ;;  %v4504_v45 = vld [vmem:[#allocation25_spill] sm:$0xff]  ;;  %v4505_v7 = vld [vmem:[#allocation27_spill] sm:$0xff] }
  0xdd   :  { %1791 = vrot.lane.b32.xlu1 %v3349_v38, %s2196_s27  ;;  %v417_v29 = vmul.f32 %v2798_v4, %v407_v35  ;;  %v423_v32 = vmul.f32 %v4500_v44, %v407_v35  ;;  %v438_v63 = vadd.f32 %v3306_v56, %v414_v55  ;;  %v444_v18 = vadd.f32 %v3320_v58, %v420_v37  ;;  %v4507_v56 = vld [vmem:[#allocation28_spill] sm:$0xff] }
  0xde   :  { %v543_v33 = vpop.permute.xlu1 %542  ;;  %v413_v23 = vadd.f32 %v411_v10, %v389_v31  ;;  %v450_v8 = vadd.f32 %v3323_v36, %v426_v57  ;;  %v507_v52 = vmul.f32 %v4504_v45, %v503_v2  ;;  %v513_v42 = vmul.f32 %v4505_v7, %v503_v2 }
  0xdf   :  { %v419_v28 = vadd.f32 %v417_v29, %v395_v60  ;;  %v425_v6 = vadd.f32 %v423_v32, %v401_v50  ;;  %v502_v48 = vsel %vm58_vm6, %v499_v59, 0.0  ;;  %v456_v35 = vadd.f32 %v4506_v24, %v438_v63  ;;  %v4508_v50 = vld [vmem:[#allocation23_spill] sm:$0xff]  ;;  %v541_v32 = vpop.permute.xlu0 %540 }
  0xe0   :  { %1789 = vrot.lane.b32.xlu0 %v3377_v11, %s2196_s27  ;;  %v437_v57 = vadd.f32 %v3340_v26, %v413_v23  ;;  %v506_v37 = vmul.f32 %v4504_v45, %v502_v48  ;;  %v512_v55 = vmul.f32 %v4505_v7, %v502_v48  ;;  %v518_v58 = vmul.f32 %v4507_v56, %v502_v48  ;;  %v4509_v48 = vld [vmem:[#allocation24_spill] sm:$0xff] }
  0xe1   :  { %779 = vrot.lane.b32.xlu1 %v3280_v51, %s2195_s2  ;;  %v443_v36 = vadd.f32 %v3343_v27, %v419_v28  ;;  %v449_v59 = vadd.f32 %v3359_v5, %v425_v6  ;;  %v462_v24 = vadd.f32 %v2902_v34, %v444_v18  ;;  %v468_v31 = vadd.f32 %v2906_v12, %v450_v8  ;;  %v4510_v27 = vld [vmem:[#allocation26_spill] sm:$0xff] }
  0xe2   :  { %v1266_v60 = vpop.permute.xlu1 %1265  ;;  %v455_v10 = vadd.f32 %v4508_v50, %v437_v57  ;;  %v480_v29 = vadd.f32 %v3331_v17, %v456_v35  ;;  %v519_v26 = vmul.f32 %v4507_v56, %v503_v2  ;;  %v545_v63 = vsel %vm57_vm3, %v543_v33, 0.0 }
  0xe3   :  { %v461_v23 = vadd.f32 %v4509_v48, %v443_v36  ;;  %v467_v28 = vadd.f32 %v4510_v27, %v449_v59  ;;  %v486_v5 = vadd.f32 %v3334_v15, %v462_v24  ;;  %v492_v34 = vadd.f32 %v3337_v46, %v468_v31  ;;  %v4511_v36 = vld [vmem:[#allocation33_spill] sm:$0xff]  ;;  %v4512_v24 = vld [vmem:[#allocation35_spill] sm:$0xff] }
  0xe4   :  { %777 = vrot.lane.b32.xlu0 %v3313_v39, %s2195_s2  ;;  %v479_v12 = vadd.f32 %v3362_v49, %v455_v10  ;;  %v509_v8 = vadd.f32 %v507_v52, %v480_v29  ;;  %v544_v17 = vsel %vm57_vm3, %v541_v32, 0.0  ;;  %v549_v2 = vmul.f32 %v2930_v16, %v545_v63  ;;  %v570_v52 = vpop.permute.xlu0 %569  ;;  %v4513_v10 = vld [vmem:[#allocation34_spill] sm:$0xff]  ;;  %v4514_v32 = vld [vmem:[#allocation36_spill] sm:$0xff] }
  0xe5   :  { %v485_v18 = vadd.f32 %v3365_v40, %v461_v23  ;;  %v491_v33 = vadd.f32 %v3368_v21, %v467_v28  ;;  %v515_v6 = vadd.f32 %v513_v42, %v486_v5  ;;  %v521_v35 = vadd.f32 %v519_v26, %v492_v34  ;;  %v4515_v40 = vld [vmem:[#allocation30_spill] sm:$0xff]  ;;  %v4516_v26 = vld [vmem:[#allocation31_spill] sm:$0xff]  ;;  %v4517_v28 = vld [vmem:[#allocation32_spill] sm:$0xff] }
  0xe6   :  { %v1308_v15 = vpop.permute.xlu1 %1307  ;;  %v508_v57 = vadd.f32 %v506_v37, %v479_v12  ;;  %v548_v46 = vmul.f32 %v2930_v16, %v544_v17  ;;  %v554_v59 = vmul.f32 %v4511_v36, %v544_v17  ;;  %v560_v49 = vmul.f32 %v4512_v24, %v544_v17 }
  0xe7   :  { %v514_v31 = vadd.f32 %v512_v55, %v485_v18  ;;  %v520_v50 = vadd.f32 %v518_v58, %v491_v33  ;;  %v527_v29 = vadd.f32 %v4513_v10, %v509_v8  ;;  %v533_v48 = vadd.f32 %v4514_v32, %v515_v6 }
  0xe8   :  { %v526_v23 = vadd.f32 %v4515_v40, %v508_v57  ;;  %v539_v21 = vadd.f32 %v2953_v14, %v521_v35  ;;  %v555_v42 = vmul.f32 %v4511_v36, %v545_v63  ;;  %v561_v37 = vmul.f32 %v4512_v24, %v545_v63  ;;  %v4518_v14 = vld [vmem:[#allocation37_spill] sm:$0xff]  ;;  %v1268_v33 = vpop.permute.xlu0 %1267 }
  0xe9   :  { %v532_v27 = vadd.f32 %v4516_v26, %v514_v31  ;;  %v538_v5 = vadd.f32 %v4517_v28, %v520_v50  ;;  %v3463_v34 = vadd.f32 %v549_v2, %v527_v29  ;;  %v573_v55 = vsel %vm58_vm6, %v570_v52, 0.0 }
  0xea   :  { %v1332_v58 = vpop.permute.xlu1 %1331  ;;  %v550_v12 = vadd.f32 %v548_v46, %v526_v23  ;;  %v3467_v8 = vadd.f32 %v555_v42, %v533_v48  ;;  %v3469_v17 = vadd.f32 %v561_v37, %v539_v21  ;;  %v577_v18 = vmul.f32 %v4518_v14, %v573_v55 }
  0xeb   :  { %v556_v6 = vadd.f32 %v554_v59, %v532_v27  ;;  %v562_v63 = vadd.f32 %v560_v49, %v538_v5  ;;  %v583_v35 = vmul.f32 %v2990_v19, %v573_v55  ;;  %v589_v57 = vmul.f32 %v2993_v53, %v573_v55 }
  0xec   :  { %v3474_v2 = vadd.f32 %v577_v18, %v550_v12  ;;  %v1269_v52 = vsel %vm58_vm6, %v1266_v60, 0.0  ;;  %v1270_v46 = vsel %vm58_vm6, %v1268_v33, 0.0  ;;  %v1311_v31 = vsel %vm57_vm3, %v1308_v15, 0.0  ;;  %v1310_v23 = vpop.permute.xlu0 %1309 }
  0xed   :  { %v3482_v50 = vadd.f32 %v583_v35, %v556_v6  ;;  %v3484_v10 = vadd.f32 %v589_v57, %v562_v63  ;;  %v1273_v59 = vmul.f32 %v1269_v52, %v2777_v0  ;;  %v1279_v49 = vmul.f32 %v1269_v52, %v2780_v61  ;;  %v4521_v35 = vld [vmem:[#allocation40_spill] sm:$0xff]  ;;  %v4522_v57 = vld [vmem:[#allocation41_spill] sm:$0xff] }
  0xee   :  { %v1374_v29 = vpop.permute.xlu1 %1373  ;;  %v1285_v32 = vmul.f32 %v1269_v52, %v2783_v3  ;;  %v1274_v48 = vmul.f32 %v1270_v46, %v2777_v0  ;;  %v1280_v60 = vmul.f32 %v1270_v46, %v2780_v61  ;;  %v1286_v40 = vmul.f32 %v1270_v46, %v2783_v3  ;;  %v4519_v61 = vld [vmem:[#allocation38_spill] sm:$0xff]  ;;  %v4520_v3 = vld [vmem:[#allocation39_spill] sm:$0xff] }
  0xef   :  { %v1275_v15 = vadd.f32 %v1273_v59, %v2758_v41  ;;  %v1281_v21 = vadd.f32 %v1279_v49, %v2763_v43  ;;  %v1315_v42 = vmul.f32 %v1311_v31, %v2795_v20  ;;  %v1321_v37 = vmul.f32 %v1311_v31, %v2798_v4 }
  0xf0   :  { %v1287_v26 = vadd.f32 %v1285_v32, %v2766_v1  ;;  %v1276_v27 = vadd.f32 %v1274_v48, %v2758_v41  ;;  %v1282_v28 = vadd.f32 %v1280_v60, %v2763_v43  ;;  %v1288_v0 = vadd.f32 %v1286_v40, %v2766_v1  ;;  %v1334_v52 = vpop.permute.xlu0 %1333 }
  0xf1   :  { %v1293_v5 = vadd.f32 %v4519_v61, %v1275_v15  ;;  %v1299_v55 = vadd.f32 %v4520_v3, %v1281_v21  ;;  %v1327_v12 = vmul.f32 %v1311_v31, %v4500_v44  ;;  %v1312_v18 = vsel %vm57_vm3, %v1310_v23, 0.0 }
  0xf2   :  { %v1403_v33 = vpop.permute.xlu1 %1402  ;;  %v1305_v6 = vadd.f32 %v2975_v47, %v1287_v26  ;;  %v1294_v63 = vadd.f32 %v2979_v22, %v1276_v27  ;;  %v1300_v41 = vadd.f32 %v4521_v35, %v1282_v28  ;;  %v1306_v43 = vadd.f32 %v4522_v57, %v1288_v0  ;;  %v4527_v35 = vld [vmem:[#allocation43_spill] sm:$0xff]  ;;  %v4528_v57 = vld [vmem:[#allocation44_spill] sm:$0xff] }
  0xf3   :  { %v1317_v1 = vadd.f32 %v1315_v42, %v1293_v5  ;;  %v1323_v46 = vadd.f32 %v1321_v37, %v1299_v55  ;;  %v1316_v59 = vmul.f32 %v1312_v18, %v2795_v20  ;;  %v1322_v49 = vmul.f32 %v1312_v18, %v2798_v4 }
  0xf4   :  { %v1329_v31 = vadd.f32 %v1327_v12, %v1305_v6  ;;  %v1328_v32 = vmul.f32 %v1312_v18, %v4500_v44  ;;  %v1335_v48 = vsel %vm58_vm6, %v1332_v58, 0.0  ;;  %v4523_v47 = vrot.slane %v3377_v11, 7  ;;  %v1376_v37 = vpop.permute.xlu0 %1375  ;;  %v4526_v6 = vld [vmem:[#allocation42_spill] sm:$0xff] }
  0xf5   :  { %v1318_v60 = vadd.f32 %v1316_v59, %v1294_v63  ;;  %v1324_v40 = vadd.f32 %v1322_v49, %v1300_v41  ;;  %v1339_v23 = vmul.f32 %v1335_v48, %v2724_v54  ;;  %v1345_v20 = vmul.f32 %v1335_v48, %v2735_v13  ;;  %v4531_v59 = vld [vmem:[#allocation18_spill] sm:$0xff] }
  0xf6   :  { %v3519_v22 = vsel %vm273_vm8, %v2459_v25, %v4523_v47  ;;  %v1445_v4 = vpop.permute.xlu1 %1444  ;;  %v1330_v44 = vadd.f32 %v1328_v32, %v1306_v43  ;;  %v1351_v58 = vmul.f32 %v1335_v48, %v2738_v30  ;;  %v4524_v15 = vrot.slane %v3349_v38, 7  ;;  %v4533_v48 = vld [vmem:[#allocation46_spill] sm:$0xff] }
  0xf7   :  { %1681 = vrot.lane.b32.xlu0 %v3519_v22, %s2195_s2  ;;  %v4525_v21 = vmov %v4523_v47  ;;  %v1336_v42 = vsel %vm58_vm6, %v1334_v52, 0.0  ;;  %v1341_v26 = vadd.f32 %v1339_v23, %v1317_v1  ;;  %v1347_v27 = vadd.f32 %v1345_v20, %v1323_v46  ;;  %v4530_v1 = vld [vmem:[#allocation17_spill] sm:$0xff]  ;;  %v4534_v20 = vld [vmem:[#allocation47_spill] sm:$0xff] }
  0xf8   :  { %v3532_v25 = vsel %vm273_vm8, %v4525_v21, %v4524_v15  ;;  %v1340_v28 = vmul.f32 %v1336_v42, %v2724_v54  ;;  %v1346_v0 = vmul.f32 %v1336_v42, %v2735_v13  ;;  %v1353_v61 = vadd.f32 %v1351_v58, %v1329_v31  ;;  %v1405_v46 = vpop.permute.xlu0 %1404  ;;  %v4532_v31 = vld [vmem:[#allocation45_spill] sm:$0xff] }
  0xf9   :  { %1683 = vrot.lane.b32.xlu1 %v3532_v25, %s2195_s2  ;;  %v1352_v5 = vmul.f32 %v1336_v42, %v2738_v30  ;;  %v1377_v3 = vsel %vm57_vm3, %v1374_v29, 0.0  ;;  %v1378_v55 = vsel %vm57_vm3, %v1376_v37, 0.0  ;;  %v1359_v63 = vadd.f32 %v4526_v6, %v1341_v26  ;;  %v4529_v30 = vld [vmem:[#allocation16_spill] sm:$0xff] }
  0xfa   :  { %v1342_v12 = vadd.f32 %v1340_v28, %v1318_v60  ;;  %v1348_v18 = vadd.f32 %v1346_v0, %v1324_v40  ;;  %v1365_v41 = vadd.f32 %v4527_v35, %v1347_v27  ;;  %v572_v54 = vpop.permute.xlu1 %571  ;;  %v1371_v43 = vadd.f32 %v4528_v57, %v1353_v61 }
  0xfb   :  { %819 = vrot.lane.b32.xlu0 %v3313_v39, %s2196_s27  ;;  %v1354_v13 = vadd.f32 %v1352_v5, %v1330_v44  ;;  %v1381_v52 = vmul.f32 %v1377_v3, %v4529_v30  ;;  %v1387_v29 = vmul.f32 %v1377_v3, %v4530_v1  ;;  %v1393_v49 = vmul.f32 %v1377_v3, %v4531_v59 }
  0xfc   :  { %v1360_v32 = vadd.f32 %v4532_v31, %v1342_v12  ;;  %v1366_v47 = vadd.f32 %v4533_v48, %v1348_v18  ;;  %v1382_v60 = vmul.f32 %v1378_v55, %v4529_v30  ;;  %v1388_v58 = vmul.f32 %v1378_v55, %v4530_v1  ;;  %v1447_v5 = vpop.permute.xlu0 %1446  ;;  %v4535_v30 = vld [vmem:[#allocation101_spill] sm:$0xff]  ;;  %v4536_v1 = vld [vmem:[#allocation48_spill] sm:$0xff] }
  0xfd   :  { %821 = vrot.lane.b32.xlu1 %v3280_v51, %s2196_s27  ;;  %v1383_v40 = vadd.f32 %v1381_v52, %v1359_v63  ;;  %v1389_v23 = vadd.f32 %v1387_v29, %v1365_v41  ;;  %v1372_v44 = vadd.f32 %v4534_v20, %v1354_v13  ;;  %v1395_v15 = vadd.f32 %v1393_v49, %v1371_v43  ;;  %v4538_v49 = vld [vmem:[#allocation50_spill] sm:$0xff]  ;;  %v4539_v48 = vld [vmem:[#allocation105_spill] sm:$0xff] }
  0xfe   :  { %v1384_v21 = vadd.f32 %v1382_v60, %v1360_v32  ;;  %v1394_v42 = vmul.f32 %v1378_v55, %v4531_v59  ;;  %v1406_v37 = vsel %vm58_vm6, %v1403_v33, 0.0  ;;  %v1476_v26 = vpop.permute.xlu1 %1475  ;;  %v1390_v27 = vadd.f32 %v1388_v58, %v1366_v47 }
  0xff   :  { %1723 = vrot.lane.b32.xlu0 %v3519_v22, %s2196_s27  ;;  %v1410_v28 = vmul.f32 %v1406_v37, %v4504_v45  ;;  %v1416_v0 = vmul.f32 %v1406_v37, %v4505_v7  ;;  %v1422_v61 = vmul.f32 %v1406_v37, %v4507_v56  ;;  %v1407_v55 = vsel %vm58_vm6, %v1405_v46, 0.0  ;;  %v4537_v46 = vld [vmem:[#allocation49_spill] sm:$0xff] }
 0x100   :  { %v1396_v3 = vadd.f32 %v1394_v42, %v1372_v44  ;;  %v1448_v33 = vsel %vm57_vm3, %v1445_v4, 0.0  ;;  %v1449_v12 = vsel %vm57_vm3, %v1447_v5, 0.0  ;;  %v1411_v35 = vmul.f32 %v1407_v55, %v4504_v45  ;;  %v1474_v31 = vpop.permute.xlu0 %1473  ;;  %v4542_v42 = vld [vmem:[#allocation53_spill] sm:$0xff] }
 0x101   :  { %1725 = vrot.lane.b32.xlu1 %v3532_v25, %s2196_s27  ;;  %v1412_v18 = vadd.f32 %v1410_v28, %v1383_v40  ;;  %v1418_v6 = vadd.f32 %v1416_v0, %v1389_v23  ;;  %v1424_v63 = vadd.f32 %v1422_v61, %v1395_v15  ;;  %v1417_v41 = vmul.f32 %v1407_v55, %v4505_v7  ;;  %v4540_v23 = vld [vmem:[#allocation51_spill] sm:$0xff]  ;;  %v4541_v15 = vld [vmem:[#allocation52_spill] sm:$0xff] }
 0x102   :  { %v1423_v13 = vmul.f32 %v1407_v55, %v4507_v56  ;;  %v1452_v57 = vmul.f32 %v1448_v33, %v2930_v16  ;;  %v1458_v43 = vmul.f32 %v1448_v33, %v4511_v36  ;;  %v3583_v4 = vpop.permute.xlu1 %613  ;;  %v1413_v52 = vadd.f32 %v1411_v35, %v1384_v21 }
 0x103   :  { %914 = vrot.lane.b32.xlu0 %v4535_v30, %s2195_s2  ;;  %v1430_v29 = vadd.f32 %v4536_v1, %v1412_v18  ;;  %v1436_v59 = vadd.f32 %v4537_v46, %v1418_v6  ;;  %v1442_v45 = vadd.f32 %v4538_v49, %v1424_v63  ;;  %v1419_v7 = vadd.f32 %v1417_v41, %v1390_v27  ;;  %v4549_v41 = vld [vmem:[#allocation54_spill] sm:$0xff] }
 0x104   :  { %v1425_v32 = vadd.f32 %v1423_v13, %v1396_v3  ;;  %v1464_v56 = vmul.f32 %v1448_v33, %v4512_v24  ;;  %v1453_v47 = vmul.f32 %v1449_v12, %v2930_v16  ;;  %v1431_v20 = vadd.f32 %v4540_v23, %v1413_v52  ;;  %v4546_v3 = vld [vmem:[#allocation14_spill] sm:$0xff]  ;;  %v612_v33 = vpop.permute.xlu0 %611  ;;  %v4553_v23 = vld [vmem:[#allocation59_spill] sm:$0xff] }
 0x105   :  { %916 = vrot.lane.b32.xlu1 %v4539_v48, %s2195_s2  ;;  %v1454_v60 = vadd.f32 %v1452_v57, %v1430_v29  ;;  %v1460_v40 = vadd.f32 %v1458_v43, %v1436_v59  ;;  %v1459_v44 = vmul.f32 %v1449_v12, %v4511_v36  ;;  %v1437_v21 = vadd.f32 %v4541_v15, %v1419_v7  ;;  %v4555_v15 = vld [vmem:[#allocation64_spill] sm:$0xff] }
 0x106   :  { %v1466_v58 = vadd.f32 %v1464_v56, %v1442_v45  ;;  %v1443_v37 = vadd.f32 %v4542_v42, %v1425_v32  ;;  %v1465_v27 = vmul.f32 %v1449_v12, %v4512_v24  ;;  %v3597_v28 = vpop.permute.xlu1 %1517  ;;  %v1455_v0 = vadd.f32 %v1453_v47, %v1431_v20 }
 0x107   :  { %v574_v61 = vsel %vm58_vm6, %v572_v54, 0.0  ;;  %v4543_v16 = vrot.slane %v3349_v38, 1  ;;  %v4544_v5 = vrot.slane %v3377_v11, 1  ;;  %v1461_v12 = vadd.f32 %v1459_v44, %v1437_v21  ;;  %v4554_v44 = vld [vmem:[#allocation61_spill] sm:$0xff]  ;;  %v4556_v21 = vld [vmem:[#allocation67_spill] sm:$0xff] }
 0x108   :  { %v1467_v18 = vadd.f32 %v1465_v27, %v1443_v37  ;;  %v578_v54 = vmul.f32 %v4518_v14, %v574_v61  ;;  %v584_v6 = vmul.f32 %v2990_v19, %v574_v61  ;;  %v590_v63 = vmul.f32 %v2993_v53, %v574_v61  ;;  %v4557_v37 = vld [vmem:[#allocation62_spill] sm:$0xff]  ;;  %v4558_v61 = vld [vmem:[#allocation57_spill] sm:$0xff] }
 0x109   :  { %v3607_v36 = vsel %vm264_vm4, %v4544_v5, %v4543_v16  ;;  %v4547_v55 = vmov %v4543_v16  ;;  %v1477_v9 = vsel %vm58_vm6, %v1474_v31, 0.0  ;;  %v1478_v35 = vsel %vm58_vm6, %v1476_v26, 0.0  ;;  %v1516_v26 = vpop.permute.xlu0 %1515  ;;  %v4559_v5 = vld [vmem:[#allocation60_spill] sm:$0xff] }
 0x10a   :  { %4545 = vst [vmem:[#allocation19_spill] sm:$0xff] %v3607_v36  ;;  %v3614_v24 = vsel %vm264_vm4, %v4547_v55, %v4546_v3  ;;  %1818 = vrot.lane.b32.xlu0 %v3607_v36, %s2195_s2  ;;  %v597_v13 = vadd.f32 %v4549_v41, %v3474_v2  ;;  %v580_v57 = vadd.f32 %v578_v54, %v3463_v34  ;;  %v4550_v34 = vld [vmem:[#allocation55_spill] sm:$0xff]  ;;  %v638_v7 = vpop.permute.xlu1 %637 }
 0x10b   :  { %4548 = vst [vmem:[#allocation20_spill] sm:$0xff] %v3614_v24  ;;  %1820 = vrot.lane.b32.xlu1 %v3614_v24, %s2195_s2  ;;  %v586_v43 = vadd.f32 %v584_v6, %v3467_v8  ;;  %v1481_v52 = vmul.f32 %v1477_v9, %v4518_v14  ;;  %v1487_v1 = vmul.f32 %v1477_v9, %v2990_v19  ;;  %v4560_v55 = vld [vmem:[#allocation63_spill] sm:$0xff]  ;;  %s1975_s2 = sld [smem:[#allocation6 + $0x13]] }
 0x10c   :  { %v592_v29 = vadd.f32 %v590_v63, %v3469_v17  ;;  %v1493_v46 = vmul.f32 %v1477_v9, %v2993_v53  ;;  %v1482_v59 = vmul.f32 %v1478_v35, %v4518_v14  ;;  %v1488_v49 = vmul.f32 %v1478_v35, %v2990_v19  ;;  %v4551_v19 = vld [vmem:[#allocation58_spill] sm:$0xff] }
 0x10d   :  { %v1483_v45 = vadd.f32 %v1481_v52, %v1454_v60  ;;  %v1489_v31 = vadd.f32 %v1487_v1, %v1460_v40  ;;  %v1494_v2 = vmul.f32 %v1478_v35, %v2993_v53  ;;  %v603_v8 = vadd.f32 %v4550_v34, %v3482_v50  ;;  %v4552_v60 = vld [vmem:[#allocation56_spill] sm:$0xff]  ;;  %v4561_v35 = vld [vmem:[#allocation65_spill] sm:$0xff] }
 0x10e   :  { %956 = vrot.lane.b32.xlu0 %v4535_v30, %s2196_s27  ;;  %v1495_v32 = vadd.f32 %v1493_v46, %v1466_v58  ;;  %v1484_v17 = vadd.f32 %v1482_v59, %v1455_v0  ;;  %v1490_v56 = vadd.f32 %v1488_v49, %v1461_v12  ;;  %v609_v14 = vadd.f32 %v4551_v19, %v3484_v10  ;;  %v636_v0 = vpop.permute.xlu0 %635  ;;  %v4562_v49 = vld [vmem:[#allocation66_spill] sm:$0xff] }
 0x10f   :  { %958 = vrot.lane.b32.xlu1 %v4539_v48, %s2196_s27  ;;  %v1496_v47 = vadd.f32 %v1494_v2, %v1467_v18  ;;  %v615_v53 = vsel %vm57_vm3, %v612_v33, 0.0  ;;  %v598_v40 = vadd.f32 %v4552_v60, %v580_v57  ;;  %v604_v20 = vadd.f32 %v4553_v23, %v586_v43  ;;  %v1542_v57 = vpop.permute.xlu1 %1541  ;;  %v4564_v60 = vld [vmem:[#allocation69_spill] sm:$0xff]  ;;  %v4566_v23 = vld [vmem:[#allocation71_spill] sm:$0xff] }
 0x110   :  { %v619_v50 = vmul.f32 %v4554_v44, %v615_v53  ;;  %v625_v58 = vmul.f32 %v4555_v15, %v615_v53  ;;  %v631_v42 = vmul.f32 %v4556_v21, %v615_v53  ;;  %v610_v27 = vadd.f32 %v4557_v37, %v592_v29 }
 0x111   :  { %v616_v10 = vsel %vm57_vm3, %v3583_v4, 0.0  ;;  %v1501_v16 = vadd.f32 %v4558_v61, %v1483_v45  ;;  %v1507_v3 = vadd.f32 %v4559_v5, %v1489_v31  ;;  %v1513_v33 = vadd.f32 %v4560_v55, %v1495_v32  ;;  %v4563_v31 = vld [vmem:[#allocation68_spill] sm:$0xff] }
 0x112   :  { %1860 = vrot.lane.b32.xlu0 %v3607_v36, %s2196_s27  ;;  %v621_v12 = vadd.f32 %v619_v50, %v597_v13  ;;  %v627_v18 = vadd.f32 %v625_v58, %v603_v8  ;;  %v633_v54 = vadd.f32 %v631_v42, %v609_v14  ;;  %v620_v6 = vmul.f32 %v4554_v44, %v616_v10  ;;  %v1540_v29 = vpop.permute.xlu0 %1539 }
 0x113   :  { %1862 = vrot.lane.b32.xlu1 %v3614_v24, %s2196_s27  ;;  %v626_v63 = vmul.f32 %v4555_v15, %v616_v10  ;;  %v632_v4 = vmul.f32 %v4556_v21, %v616_v10  ;;  %v1519_v9 = vsel %vm57_vm3, %v1516_v26, 0.0  ;;  %v1502_v41 = vadd.f32 %v4561_v35, %v1484_v17  ;;  %v680_v37 = vpop.permute.xlu1 %679  ;;  %s1976_s27 = sld [smem:[#allocation6 + $0x2e]] }
 0x114   :  { %v622_v43 = vadd.f32 %v620_v6, %v598_v40  ;;  %v1523_v13 = vmul.f32 %v1519_v9, %v4554_v44  ;;  %v1529_v52 = vmul.f32 %v1519_v9, %v4555_v15  ;;  %v1535_v1 = vmul.f32 %v1519_v9, %v4556_v21  ;;  %v4565_v40 = vld [vmem:[#allocation70_spill] sm:$0xff] }
 0x115   :  { %v628_v46 = vadd.f32 %v626_v63, %v604_v20  ;;  %v634_v59 = vadd.f32 %v632_v4, %v610_v27  ;;  %v1508_v45 = vadd.f32 %v4562_v49, %v1490_v56  ;;  %v1514_v2 = vadd.f32 %v4563_v31, %v1496_v47 }
 0x116   :  { %v1525_v34 = vadd.f32 %v1523_v13, %v1501_v16  ;;  %v1531_v8 = vadd.f32 %v1529_v52, %v1507_v3  ;;  %v1537_v26 = vadd.f32 %v1535_v1, %v1513_v33  ;;  %v1520_v32 = vsel %vm57_vm3, %v3597_v28, 0.0  ;;  %v4568_v1 = vld [vmem:[#allocation74_spill] sm:$0xff] }
 0x117   :  { %v1524_v17 = vmul.f32 %v1520_v32, %v4554_v44  ;;  %v1530_v19 = vmul.f32 %v1520_v32, %v4555_v15  ;;  %v1536_v14 = vmul.f32 %v1520_v32, %v4556_v21  ;;  %v639_v53 = vsel %vm58_vm6, %v636_v0, 0.0  ;;  %v678_v15 = vpop.permute.xlu0 %677  ;;  %v1584_v49 = vpop.permute.xlu1 %1583 }
 0x118   :  { %v643_v56 = vmul.f32 %v4564_v60, %v639_v53  ;;  %v649_v47 = vmul.f32 %v4565_v40, %v639_v53  ;;  %v655_v20 = vmul.f32 %v4566_v23, %v639_v53  ;;  %v640_v50 = vsel %vm58_vm6, %v638_v7, 0.0  ;;  %v4574_v53 = vld [vmem:[#allocation84_spill] sm:$0xff] }
 0x119   :  { %v1526_v58 = vadd.f32 %v1524_v17, %v1502_v41  ;;  %v1532_v28 = vadd.f32 %v1530_v19, %v1508_v45  ;;  %v1538_v42 = vadd.f32 %v1536_v14, %v1514_v2  ;;  %v644_v44 = vmul.f32 %v4564_v60, %v640_v50  ;;  %v4567_v41 = vld [vmem:[#allocation72_spill] sm:$0xff]  ;;  %v4569_v45 = vld [vmem:[#allocation78_spill] sm:$0xff]  ;;  %v4570_v2 = vld [vmem:[#allocation73_spill] sm:$0xff] }
 0x11a   :  { %v645_v21 = vadd.f32 %v643_v56, %v621_v12  ;;  %v651_v27 = vadd.f32 %v649_v47, %v627_v18  ;;  %v657_v10 = vadd.f32 %v655_v20, %v633_v54  ;;  %v650_v0 = vmul.f32 %v4565_v40, %v640_v50  ;;  %v4571_v17 = vld [vmem:[#allocation76_spill] sm:$0xff]  ;;  %v4575_v56 = vld [vmem:[#allocation81_spill] sm:$0xff] }
 0x11b   :  { %v646_v61 = vadd.f32 %v644_v44, %v622_v43  ;;  %v656_v16 = vmul.f32 %v4566_v23, %v640_v50  ;;  %v1543_v5 = vsel %vm58_vm6, %v1540_v29, 0.0  ;;  %v1544_v7 = vsel %vm58_vm6, %v1542_v57, 0.0  ;;  %v4573_v19 = vld [vmem:[#allocation80_spill] sm:$0xff]  ;;  %v4577_v50 = vld [vmem:[#allocation77_spill] sm:$0xff] }
 0x11c   :  { %v652_v3 = vadd.f32 %v650_v0, %v628_v46  ;;  %v1547_v55 = vmul.f32 %v1543_v5, %v4564_v60  ;;  %v1553_v33 = vmul.f32 %v1543_v5, %v4565_v40  ;;  %v1559_v12 = vmul.f32 %v1543_v5, %v4566_v23  ;;  %v1582_v46 = vpop.permute.xlu0 %1581 }
 0x11d   :  { %v658_v18 = vadd.f32 %v656_v16, %v634_v59  ;;  %v1548_v54 = vmul.f32 %v1544_v7, %v4564_v60  ;;  %v1554_v6 = vmul.f32 %v1544_v7, %v4565_v40  ;;  %v1560_v63 = vmul.f32 %v1544_v7, %v4566_v23  ;;  %v4576_v23 = vld [vmem:[#allocation75_spill] sm:$0xff]  ;;  %v4579_v16 = vld [vmem:[#allocation85_spill] sm:$0xff] }
 0x11e   :  { %v1549_v4 = vadd.f32 %v1547_v55, %v1525_v34  ;;  %v1555_v9 = vadd.f32 %v1553_v33, %v1531_v8  ;;  %v1561_v35 = vadd.f32 %v1559_v12, %v1537_v26  ;;  %v663_v43 = vadd.f32 %v4567_v41, %v645_v21  ;;  %v4572_v8 = vld [vmem:[#allocation79_spill] sm:$0xff]  ;;  %v709_v12 = vpop.permute.xlu1 %708 }
 0x11f   :  { %v1550_v57 = vadd.f32 %v1548_v54, %v1526_v58  ;;  %v1556_v13 = vadd.f32 %v1554_v6, %v1532_v28  ;;  %v1562_v52 = vadd.f32 %v1560_v63, %v1538_v42  ;;  %v669_v29 = vadd.f32 %v4568_v1, %v651_v27  ;;  %v4578_v28 = vld [vmem:[#allocation82_spill] sm:$0xff] }
 0x120   :  { %v675_v59 = vadd.f32 %v4569_v45, %v657_v10  ;;  %v681_v31 = vsel %vm57_vm3, %v678_v15, 0.0  ;;  %v664_v32 = vadd.f32 %v4570_v2, %v646_v61  ;;  %v670_v34 = vadd.f32 %v4571_v17, %v652_v3  ;;  %v707_v33 = vpop.permute.xlu0 %706  ;;  %v4580_v6 = vld [vmem:[#allocation86_spill] sm:$0xff] }
 0x121   :  { %v685_v26 = vmul.f32 %v4572_v8, %v681_v31  ;;  %v691_v14 = vmul.f32 %v4573_v19, %v681_v31  ;;  %v697_v60 = vmul.f32 %v4574_v53, %v681_v31  ;;  %v676_v40 = vadd.f32 %v4575_v56, %v658_v18 }
 0x122   :  { %v682_v47 = vsel %vm57_vm3, %v680_v37, 0.0  ;;  %v1567_v20 = vadd.f32 %v4576_v23, %v1549_v4  ;;  %v1573_v58 = vadd.f32 %v4577_v50, %v1555_v9  ;;  %v1579_v42 = vadd.f32 %v4578_v28, %v1561_v35  ;;  %v4581_v4 = vld [vmem:[#allocation89_spill] sm:$0xff] }
 0x123   :  { %v687_v44 = vadd.f32 %v685_v26, %v663_v43  ;;  %v693_v15 = vadd.f32 %v691_v14, %v669_v29  ;;  %v699_v21 = vadd.f32 %v697_v60, %v675_v59  ;;  %v686_v27 = vmul.f32 %v4572_v8, %v682_v47  ;;  %v4582_v59 = vld [vmem:[#allocation90_spill] sm:$0xff] }
 0x124   :  { %v692_v10 = vmul.f32 %v4573_v19, %v682_v47  ;;  %v698_v0 = vmul.f32 %v4574_v53, %v682_v47  ;;  %v1585_v61 = vsel %vm57_vm3, %v1582_v46, 0.0  ;;  %v1568_v37 = vadd.f32 %v4579_v16, %v1550_v57  ;;  %v1611_v56 = vpop.permute.xlu0 %1610 }
 0x125   :  { %v688_v5 = vadd.f32 %v686_v27, %v664_v32  ;;  %v1589_v7 = vmul.f32 %v1585_v61, %v4572_v8  ;;  %v1595_v3 = vmul.f32 %v1585_v61, %v4573_v19  ;;  %v1601_v55 = vmul.f32 %v1585_v61, %v4574_v53 }
 0x126   :  { %v694_v18 = vadd.f32 %v692_v10, %v670_v34  ;;  %v700_v54 = vadd.f32 %v698_v0, %v676_v40  ;;  %v1574_v63 = vadd.f32 %v4580_v6, %v1556_v13  ;;  %v1580_v9 = vadd.f32 %v4581_v4, %v1562_v52  ;;  %v4583_v13 = vld [vmem:[#allocation91_spill] sm:$0xff]  ;;  %v4584_v52 = vld [vmem:[#allocation92_spill] sm:$0xff]  ;;  %v1613_v40 = vpop.permute.xlu1 %1612 }
 0x127   :  { %v1591_v35 = vadd.f32 %v1589_v7, %v1567_v20  ;;  %v1597_v41 = vadd.f32 %v1595_v3, %v1573_v58  ;;  %v1603_v43 = vadd.f32 %v1601_v55, %v1579_v42  ;;  %v1586_v57 = vsel %vm57_vm3, %v1584_v49, 0.0  ;;  %v4586_v7 = vld [vmem:[#allocation95_spill] sm:$0xff] }
 0x128   :  { %v1590_v1 = vmul.f32 %v1586_v57, %v4572_v8  ;;  %v1596_v29 = vmul.f32 %v1586_v57, %v4573_v19  ;;  %v1602_v46 = vmul.f32 %v1586_v57, %v4574_v53  ;;  %v710_v45 = vsel %vm58_vm6, %v707_v33, 0.0  ;;  %v4587_v55 = vld [vmem:[#allocation83_spill] sm:$0xff] }
 0x129   :  { %v714_v31 = vmul.f32 %v4582_v59, %v710_v45  ;;  %v720_v2 = vmul.f32 %v4583_v13, %v710_v45  ;;  %v726_v32 = vmul.f32 %v4584_v52, %v710_v45  ;;  %v711_v17 = vsel %vm58_vm6, %v709_v12, 0.0  ;;  %v4588_v33 = vld [vmem:[#allocation15_spill] sm:$0xff] }
 0x12a   :  { %v1592_v34 = vadd.f32 %v1590_v1, %v1568_v37  ;;  %v1598_v49 = vadd.f32 %v1596_v29, %v1574_v63  ;;  %v1604_v26 = vadd.f32 %v1602_v46, %v1580_v9  ;;  %v715_v8 = vmul.f32 %v4582_v59, %v711_v17  ;;  %v4585_v37 = vld [vmem:[#allocation93_spill] sm:$0xff]  ;;  %v4590_v63 = vld [vmem:[#allocation94_spill] sm:$0xff]  ;;  %v4593_v1 = vld [vmem:[#allocation87_spill] sm:$0xff] }
 0x12b   :  { %v716_v19 = vadd.f32 %v714_v31, %v687_v44  ;;  %v722_v14 = vadd.f32 %v720_v2, %v693_v15  ;;  %v728_v53 = vadd.f32 %v726_v32, %v699_v21  ;;  %v721_v60 = vmul.f32 %v4583_v13, %v711_v17  ;;  %v4591_v9 = vld [vmem:[#allocation98_spill] sm:$0xff]  ;;  %v4594_v46 = vld [vmem:[#allocation96_spill] sm:$0xff]  ;;  %v4596_v2 = vld [vmem:[#allocation103_spill] sm:$0xff] }
 0x12c   :  { %v717_v47 = vadd.f32 %v715_v8, %v688_v5  ;;  %v727_v23 = vmul.f32 %v4584_v52, %v711_v17  ;;  %v1614_v20 = vsel %vm58_vm6, %v1611_v56, 0.0  ;;  %v1615_v50 = vsel %vm58_vm6, %v1613_v40, 0.0  ;;  %v4595_v31 = vld [vmem:[#allocation102_spill] sm:$0xff]  ;;  %v4597_v32 = vld [vmem:[#allocation104_spill] sm:$0xff] }
 0x12d   :  { %v723_v58 = vadd.f32 %v721_v60, %v694_v18  ;;  %v1618_v28 = vmul.f32 %v1614_v20, %v4582_v59  ;;  %v1624_v42 = vmul.f32 %v1614_v20, %v4583_v13  ;;  %v1630_v44 = vmul.f32 %v1614_v20, %v4584_v52 }
 0x12e   :  { %v729_v15 = vadd.f32 %v727_v23, %v700_v54  ;;  %v1619_v21 = vmul.f32 %v1615_v50, %v4582_v59  ;;  %v1625_v27 = vmul.f32 %v1615_v50, %v4583_v13  ;;  %v1631_v10 = vmul.f32 %v1615_v50, %v4584_v52  ;;  %v4589_v54 = vld [vmem:[#allocation99_spill] sm:$0xff] }
 0x12f   :  { %v1620_v0 = vadd.f32 %v1618_v28, %v1591_v35  ;;  %v1626_v61 = vadd.f32 %v1624_v42, %v1597_v41  ;;  %v1632_v16 = vadd.f32 %v1630_v44, %v1603_v43  ;;  %v3754_v5 = vadd.f32 %v4585_v37, %v716_v19  ;;  %v4592_v43 = vld [vmem:[#allocation100_spill] sm:$0xff]  ;;  %v749_v19 = vpop.permute.xlu0 %748 }
 0x130   :  { %v3757_v3 = vadd.f32 %v4586_v7, %v722_v14  ;;  %v1637_v12 = vmul.f32 %v4588_v33, %v4587_v55  ;;  %v1621_v18 = vadd.f32 %v1619_v21, %v1592_v34  ;;  %v3762_v6 = vadd.f32 %v4589_v54, %v728_v53  ;;  %v4601_v55 = vld [vmem:[#allocation88_spill] sm:$0xff] }
 0x131   :  { %v3765_v4 = vadd.f32 %v4590_v63, %v717_v47  ;;  %v3768_v35 = vadd.f32 %v4591_v9, %v723_v58  ;;  %v1627_v41 = vadd.f32 %v1625_v27, %v1598_v49  ;;  %v3771_v57 = vadd.f32 %v4592_v43, %v729_v15 }
 0x132   :  { %v1643_v29 = vmul.f32 %v4588_v33, %v4593_v1  ;;  %v1649_v45 = vmul.f32 %v4588_v33, %v4594_v46  ;;  %v1633_v59 = vadd.f32 %v1631_v10, %v1604_v26  ;;  %v3778_v13 = vadd.f32 %v4595_v31, %v1620_v0  ;;  %v751_v26 = vpop.permute.xlu1 %750 }
 0x133   :  { %v3781_v52 = vadd.f32 %v4596_v2, %v1626_v61  ;;  %v3784_v17 = vadd.f32 %v4597_v32, %v1632_v16  ;;  %v3786_v34 = vadd.f32 %v1637_v12, %v1621_v18  ;;  %v1653_v53 = vpop.permute.xlu0 %1652  ;;  %v3802_v47 = vstv %s1975_s2  ;;  %s3993_s2 = sld [smem:[#allocation6 + $0x35]] }
 0x134   :  { %v3788_v49 = vadd.f32 %v1643_v29, %v1627_v41  ;;  %v3790_v8 = vadd.f32 %v1649_v45, %v1633_v59  ;;  %v3804_v23 = vstv %s1976_s27  ;;  %v3808_v20 = vstv %s1977_s30  ;;  %s3998_s27 = sld [smem:[#allocation6 + $0x50]]  ;;  %s2198_s30 = smov [#allocation9]  }
 0x135   :  { %v3810_v50 = vstv %s1984_s4  ;;  %v3812_v58 = vstv %s1985_s5  ;;  %v3814_v28 = vstv %s1986_s6  ;;  %v755_v42 = vstv %s1969_s7  ;;  %s1902_s4 = sshll.u32 %s2198_s30, 4  ;;  %s1903_s4 = int_to_ptr.vmem [resolvable:$true] %s1902_s4 }
 0x136   :  { %v1655_v14 = vpop.permute.xlu1 %1654  ;;  %v3816_v44 = vstv %s1970_s8  ;;  %v3818_v15 = vstv %s1971_s9  ;;  %v3822_v21 = vstv %s1993_s10  ;;  %v3824_v27 = vstv %s1981_s12  ;;  %s2162_s5 = scalar_lea.vmem %s1903_s4, 1536  ;;  %p2167_p2 = scmp.lt.s32.totalorder %s1903_s4, %s1903_s4 }
 0x137   :  { %v3826_v10 = vstv %s1982_s13  ;;  %v3828_v0 = vstv %s1983_s14  ;;  %v3832_v61 = vstv %s1994_s11  ;;  %v752_v16 = vsel %vm57_vm3, %v749_v19, 0.0  ;;  %v4609_v19 = vld [vmem:[#allocation97_spill] sm:$0xff]  ;;  %p2163_p1 = scmp.ne.s32.totalorder %s1903_s4, %s2162_s5  ;;  %p2168_p3 = scmp.lt.s32.totalorder %s2162_s5, %s2162_s5 }
 0x138   :  { %v3796_v56 = vpop.permute.xlu0 %843  ;;  %v3844_v33 = vmul.f32 %v3810_v50, %v4601_v55  ;;  %v3848_v12 = vmul.f32 %v3812_v58, %v4601_v55  ;;  %v3850_v18 = vstv %s1995_s15  ;;  %v3854_v54 = vmul.f32 %v3802_v47, %v3313_v39 }
 0x139   :  { %v3858_v63 = vmul.f32 %v3804_v23, %v3313_v39  ;;  %v3862_v9 = vmul.f32 %v3808_v20, %v3313_v39  ;;  %v3866_v41 = vmul.f32 %v3814_v28, %v4601_v55  ;;  %v753_v43 = vsel %vm57_vm3, %v751_v26, 0.0  ;;  %p2169_p4 = por %p2168_p3, %p2167_p2 }
 0x13a   :  { %4602 = vst [vmem:[#allocation27_spill] sm:$0xff] %v3844_v33  ;;  %4603 = vst [vmem:[#allocation29_spill] sm:$0xff] %v3848_v12  ;;  %v804_v1 = vmul.f32 %v3802_v47, %v3280_v51  ;;  %v3874_v29 = vmul.f32 %v3804_v23, %v3280_v51  ;;  %v3878_v46 = vmul.f32 %v3808_v20, %v3280_v51  ;;  %v1656_v59 = vsel %vm57_vm3, %v1653_v53, 0.0 }
 0x13b   :  { %4604 = vst [vmem:[#allocation28_spill] sm:$0xff] %v3866_v41  ;;  %v756_v39 = vmul.f32 %v755_v42, %v752_v16  ;;  %v762_v45 = vmul.f32 %v3816_v44, %v752_v16  ;;  %v3884_v31 = vstv %s3794_s16  ;;  %v768_v2 = vmul.f32 %v3818_v15, %v752_v16  ;;  %p2170_p5 = pnand %p2169_p4, %p2163_p1 }
 0x13c   :  { %v3792_v60 = vpop.permute.xlu1 %845  ;;  %4605 = vst [vmem:[#allocation23_spill] sm:$0xff] %v3884_v31  ;;  %v3890_v32 = vstv %s3800_s17  ;;  %v3900_v55 = vmul.f32 %v3810_v50, %v4609_v19  ;;  %v3904_v53 = vmul.f32 %v3812_v58, %v4609_v19  ;;  %v757_v16 = vmul.f32 %v755_v42, %v753_v43 }
 0x13d   :  { %4606 = vst [vmem:[#allocation24_spill] sm:$0xff] %v3890_v32  ;;  %v763_v41 = vmul.f32 %v3816_v44, %v753_v43  ;;  %v769_v12 = vmul.f32 %v3818_v15, %v753_v43  ;;  %v1657_v33 = vsel %vm57_vm3, %v1655_v14, 0.0  ;;  %v1660_v32 = vmul.f32 %v1656_v59, %v755_v42 }
 0x13e   :  { %4610 = vst [vmem:[#allocation35_spill] sm:$0xff] %v3900_v55  ;;  %4611 = vst [vmem:[#allocation34_spill] sm:$0xff] %v3904_v53  ;;  %v1666_v31 = vmul.f32 %v1656_v59, %v3816_v44  ;;  %v3914_v55 = vmul.f32 %v3814_v28, %v4609_v19  ;;  %v758_v53 = vadd.f32 %v756_v39, %v3754_v5  ;;  %v3928_v36 = vstv %s3830_s22 }
 0x13f   :  { %v764_v24 = vadd.f32 %v762_v45, %v3757_v3  ;;  %v770_v43 = vadd.f32 %v768_v2, %v3762_v6  ;;  %v1661_v14 = vmul.f32 %v1657_v33, %v755_v42  ;;  %v759_v19 = vadd.f32 %v757_v16, %v3765_v4 }
 0x140   :  { %v765_v5 = vadd.f32 %v763_v41, %v3768_v35  ;;  %v771_v3 = vadd.f32 %v769_v12, %v3771_v57  ;;  %v3941_v6 = vadd.f32 %v1660_v32, %v3778_v13  ;;  %v3944_v42 = vadd.f32 %v1666_v31, %v3781_v52 }
 0x141   :  { %v1667_v35 = vmul.f32 %v1657_v33, %v3816_v44  ;;  %v1673_v57 = vmul.f32 %v1657_v33, %v3818_v15  ;;  %v3959_v13 = vadd.f32 %v1661_v14, %v3786_v34  ;;  %v3962_v41 = vstv %s3886_s23 }
 0x142   :  { %v3965_v31 = vstv %s3896_s24  ;;  %v847_v44 = vsel %vm58_vm6, %v3796_v56, 0.0 }
 0x143   :  { %v3982_v14 = vadd.f32 %v1667_v35, %v3788_v49  ;;  %v3985_v56 = vadd.f32 %v1673_v57, %v3790_v8  ;;  %v4001_v49 = vmul.f32 %v3826_v10, %v847_v44  ;;  %v4004_v8 = vmul.f32 %v3828_v0, %v847_v44 }
 0x144   :  { %v4027_v57 = vmul.f32 %v3519_v22, %v3804_v23 }
 0x147   :  { %v3798_v40 = vpop.permute.xlu1 %1749 }
 0x148   :  { %4598 = vst [vmem:[#allocation21_spill] sm:$0xff] %v3798_v40 }
 0x14a   :  { %v3836_v37 = vpop.permute.xlu0 %1747 }
 0x14b   :  { %4599 = vst [vmem:[#allocation22_spill] sm:$0xff] %v3836_v37  ;;  %v3838_v7 = vpop.permute.xlu1 %887 }
 0x14c   :  { %4600 = vst [vmem:[#allocation25_spill] sm:$0xff] %v3838_v7  ;;  %v3922_v7 = vstv %s3820_s21 }
 0x14e   :  { %v3892_v26 = vpop.permute.xlu0 %885 }
 0x14f   :  { %4607 = vst [vmem:[#allocation26_spill] sm:$0xff] %v3892_v26  ;;  %v3894_v51 = vpop.permute.xlu1 %1791  ;;  %v3919_v26 = vstv %s3806_s20 }
 0x150   :  { %4608 = vst [vmem:[#allocation33_spill] sm:$0xff] %v3894_v51  ;;  %v1672_v51 = vmul.f32 %v1656_v59, %v3818_v15  ;;  %v3931_v59 = vstv %s3840_s1 }
 0x152   :  { %v3925_v37 = vpop.permute.xlu0 %1789  ;;  %v3947_v45 = vadd.f32 %v1672_v51, %v3784_v17 }
 0x153   :  { %v780_v40 = vpop.permute.xlu1 %779 }
 0x154   :  { %v782_v39 = vsel %vm58_vm6, %v780_v40, 0.0 }
 0x155   :  { %v786_v4 = vmul.f32 %v3922_v7, %v782_v39  ;;  %v792_v40 = vmul.f32 %v3928_v36, %v782_v39  ;;  %v798_v12 = vmul.f32 %v3931_v59, %v782_v39 }
 0x156   :  { %v778_v52 = vpop.permute.xlu0 %777 }
 0x157   :  { %v788_v17 = vadd.f32 %v786_v4, %v759_v19  ;;  %v781_v15 = vsel %vm58_vm6, %v778_v52, 0.0  ;;  %v794_v33 = vadd.f32 %v792_v40, %v765_v5  ;;  %v800_v2 = vadd.f32 %v798_v12, %v771_v3 }
 0x158   :  { %v785_v34 = vmul.f32 %v3922_v7, %v781_v15  ;;  %v791_v32 = vmul.f32 %v3928_v36, %v781_v15  ;;  %v797_v51 = vmul.f32 %v3931_v59, %v781_v15  ;;  %v3996_v3 = vmul.f32 %v3824_v27, %v847_v44 }
 0x159   :  { %v3977_v16 = vadd.f32 %v804_v1, %v788_v17  ;;  %v3988_v19 = vadd.f32 %v3874_v29, %v794_v33  ;;  %v3991_v5 = vadd.f32 %v3878_v46, %v800_v2  ;;  %v4007_v29 = vstv %s3938_s25 }
 0x15a   :  { %v787_v1 = vadd.f32 %v785_v34, %v758_v53  ;;  %v793_v39 = vadd.f32 %v791_v32, %v764_v24  ;;  %v799_v4 = vadd.f32 %v797_v51, %v770_v43  ;;  %v4011_v46 = vmul.f32 %v3519_v22, %v3802_v47 }
 0x15b   :  { %v848_v24 = vsel %vm58_vm6, %v3792_v60, 0.0  ;;  %v4031_v40 = vmul.f32 %v3519_v22, %v3808_v20  ;;  %v4035_v60 = vmul.f32 %v3532_v25, %v3802_v47  ;;  %v4049_v12 = vstv %s3956_s0 }
 0x15c   :  { %v4017_v53 = vadd.f32 %v3854_v54, %v787_v1  ;;  %v4020_v43 = vadd.f32 %v3858_v63, %v793_v39  ;;  %v4023_v35 = vadd.f32 %v3862_v9, %v799_v4  ;;  %v4039_v54 = vmul.f32 %v3532_v25, %v3804_v23  ;;  %v4627_v39 = vld [vmem:[#allocation19_spill] sm:$0xff] }
 0x15d   :  { %v4043_v63 = vmul.f32 %v3532_v25, %v3808_v20  ;;  %v4046_v9 = vstv %s3950_s26  ;;  %v4052_v22 = vstv %s3967_s28  ;;  %v4055_v47 = vmul.f32 %v3824_v27, %v848_v24 }
 0x15e   :  { %v4058_v52 = vmul.f32 %v3826_v10, %v848_v24  ;;  %v4062_v23 = vmul.f32 %v3377_v11, %v3810_v50  ;;  %v4066_v25 = vmul.f32 %v3377_v11, %v3812_v58  ;;  %v4069_v20 = vmul.f32 %v3828_v0, %v848_v24  ;;  %v4629_v24 = vld [vmem:[#allocation22_spill] sm:$0xff] }
 0x15f   :  { %v4073_v17 = vmul.f32 %v3377_v11, %v3814_v28  ;;  %v4077_v44 = vmul.f32 %v3349_v38, %v3810_v50  ;;  %v4081_v15 = vmul.f32 %v3349_v38, %v3812_v58  ;;  %v4085_v33 = vmul.f32 %v3349_v38, %v3814_v28  ;;  %v4624_v28 = vld [vmem:[#allocation21_spill] sm:$0xff] }
 0x160   :  { %4612 = vst [vmem:[#allocation36_spill] sm:$0xff] %v4066_v25  ;;  %v4089_v2 = vmul.f32 %v3822_v21, %v4535_v30  ;;  %v4093_v11 = vmul.f32 %v3832_v61, %v4535_v30  ;;  %v4097_v50 = vmul.f32 %v3850_v18, %v4535_v30  ;;  %v4100_v34 = vstv %s3979_s29 }
 0x161   :  { %4613 = vst [vmem:[#allocation30_spill] sm:$0xff] %v4073_v17  ;;  %4614 = vst [vmem:[#allocation31_spill] sm:$0xff] %v4077_v44  ;;  %v4103_v58 = vstv %s3993_s2  ;;  %v4106_v32 = vstv %s3998_s27  ;;  %v4110_v38 = vmul.f32 %v3822_v21, %v4539_v48  ;;  %v1752_v51 = vsel %vm58_vm6, %v4624_v28, 0.0 }
 0x162   :  { %4615 = vst [vmem:[#allocation32_spill] sm:$0xff] %v4081_v15  ;;  %4616 = vst [vmem:[#allocation37_spill] sm:$0xff] %v4085_v33  ;;  %v4117_v1 = vmul.f32 %v3832_v61, %v4539_v48  ;;  %v4121_v30 = vmul.f32 %v3850_v18, %v4539_v48  ;;  %v4125_v4 = vmul.f32 %v4627_v39, %v3822_v21 }
 0x163   :  { %4617 = vst [vmem:[#allocation38_spill] sm:$0xff] %v4089_v2  ;;  %4618 = vst [vmem:[#allocation39_spill] sm:$0xff] %v4093_v11  ;;  %v4139_v48 = vmul.f32 %v4627_v39, %v3850_v18 }
 0x164   :  { %4619 = vst [vmem:[#allocation40_spill] sm:$0xff] %v4097_v50  ;;  %4620 = vst [vmem:[#allocation41_spill] sm:$0xff] %v4100_v34  ;;  %v4135_v34 = vmul.f32 %v4627_v39, %v3832_v61  ;;  %v4160_v39 = vmul.f32 %v1752_v51, %v3826_v10 }
 0x165   :  { %4621 = vst [vmem:[#allocation42_spill] sm:$0xff] %v4103_v58  ;;  %4622 = vst [vmem:[#allocation43_spill] sm:$0xff] %v4106_v32  ;;  %v1751_v32 = vsel %vm58_vm6, %v4629_v24, 0.0  ;;  %v4630_v58 = vld [vmem:[#allocation25_spill] sm:$0xff] }
 0x166   :  { %4623 = vst [vmem:[#allocation44_spill] sm:$0xff] %v4110_v38  ;;  %4625 = vst [vmem:[#allocation16_spill] sm:$0xff] %v4117_v1  ;;  %v890_v28 = vsel %vm57_vm3, %v4630_v58, 0.0  ;;  %v4634_v1 = vld [vmem:[#allocation20_spill] sm:$0xff] }
 0x167   :  { %4626 = vst [vmem:[#allocation17_spill] sm:$0xff] %v4121_v30  ;;  %4628 = vst [vmem:[#allocation18_spill] sm:$0xff] %v4125_v4  ;;  %v4633_v30 = vld [vmem:[#allocation26_spill] sm:$0xff]  ;;  %v4146_v38 = vmul.f32 %v4634_v1, %v3822_v21  ;;  %v4150_v24 = vmul.f32 %v4634_v1, %v3832_v61  ;;  %v4154_v58 = vmul.f32 %v4634_v1, %v3850_v18  ;;  %v4639_v1 = vld [vmem:[#allocation23_spill] sm:$0xff] }
 0x168   :  { %4631 = vst [vmem:[#allocation45_spill] sm:$0xff] %v4135_v34  ;;  %4632 = vst [vmem:[#allocation46_spill] sm:$0xff] %v4139_v48  ;;  %v889_v4 = vsel %vm57_vm3, %v4633_v30, 0.0  ;;  %v4157_v34 = vmul.f32 %v1752_v51, %v3824_v27  ;;  %v4163_v30 = vmul.f32 %v1752_v51, %v3828_v0  ;;  %v4638_v48 = vld [vmem:[#allocation33_spill] sm:$0xff]  ;;  %v4169_v61 = vmul.f32 %v1751_v32, %v3824_v27 }
 0x169   :  { %4635 = vst [vmem:[#allocation47_spill] sm:$0xff] %v4146_v38  ;;  %4636 = vst [vmem:[#allocation101_spill] sm:$0xff] %v4150_v24  ;;  %v1794_v21 = vsel %vm57_vm3, %v4638_v48, 0.0  ;;  %v4172_v24 = vmul.f32 %v1751_v32, %v3826_v10  ;;  %v4175_v18 = vmul.f32 %v1751_v32, %v3828_v0  ;;  %v4640_v38 = vld [vmem:[#allocation24_spill] sm:$0xff]  ;;  %v4184_v51 = vmul.f32 %v3919_v26, %v890_v28  ;;  %v1682_v10 = vpop.permute.xlu0 %1681 }
 0x16a   :  { %4637 = vst [vmem:[#allocation48_spill] sm:$0xff] %v4154_v58  ;;  %v4178_v58 = vmul.f32 %v4639_v1, %v890_v28  ;;  %v4181_v50 = vmul.f32 %v4640_v38, %v890_v28  ;;  %v4187_v48 = vmul.f32 %v4639_v1, %v889_v4  ;;  %v1793_v27 = vsel %vm57_vm3, %v3925_v37, 0.0 }
 0x16b   :  { %4641 = vst [vmem:[#allocation49_spill] sm:$0xff] %v4184_v51  ;;  %v4193_v0 = vmul.f32 %v4640_v38, %v889_v4  ;;  %v4196_v32 = vmul.f32 %v3919_v26, %v889_v4  ;;  %v4199_v11 = vmul.f32 %v1794_v21, %v4639_v1  ;;  %v1685_v28 = vsel %vm58_vm6, %v1682_v10, 0.0  ;;  %v1684_v44 = vpop.permute.xlu1 %1683 }
 0x16c   :  { %v4204_v2 = vmul.f32 %v1794_v21, %v4640_v38  ;;  %v1689_v33 = vmul.f32 %v1685_v28, %v3922_v7  ;;  %v1695_v37 = vmul.f32 %v1685_v28, %v3928_v36  ;;  %v1701_v15 = vmul.f32 %v1685_v28, %v3931_v59 }
 0x16d   :  { %4642 = vst [vmem:[#allocation50_spill] sm:$0xff] %v4199_v11  ;;  %v4210_v17 = vmul.f32 %v1794_v21, %v3919_v26  ;;  %v4213_v4 = vmul.f32 %v1793_v27, %v4639_v1  ;;  %v4216_v11 = vmul.f32 %v1793_v27, %v4640_v38  ;;  %v1686_v10 = vsel %vm58_vm6, %v1684_v44, 0.0  ;;  %v820_v21 = vpop.permute.xlu0 %819 }
 0x16e   :  { %4643 = vst [vmem:[#allocation105_spill] sm:$0xff] %v4204_v2  ;;  %v4221_v2 = vmul.f32 %v1793_v27, %v3919_v26  ;;  %v1691_v25 = vadd.f32 %v1689_v33, %v3941_v6  ;;  %v1697_v28 = vadd.f32 %v1695_v37, %v3944_v42  ;;  %v1690_v51 = vmul.f32 %v1686_v10, %v3922_v7 }
 0x16f   :  { %4644 = vst [vmem:[#allocation51_spill] sm:$0xff] %v4210_v17  ;;  %4645 = vst [vmem:[#allocation52_spill] sm:$0xff] %v4216_v11  ;;  %v1703_v17 = vadd.f32 %v1701_v15, %v3947_v45  ;;  %v1696_v1 = vmul.f32 %v1686_v10, %v3928_v36  ;;  %v1702_v38 = vmul.f32 %v1686_v10, %v3931_v59  ;;  %v823_v11 = vsel %vm57_vm3, %v820_v21, 0.0  ;;  %v822_v33 = vpop.permute.xlu1 %821 }
 0x170   :  { %v1692_v44 = vadd.f32 %v1690_v51, %v3959_v13  ;;  %v827_v26 = vmul.f32 %v3962_v41, %v823_v11  ;;  %v833_v6 = vmul.f32 %v3965_v31, %v823_v11  ;;  %v839_v42 = vmul.f32 %v4007_v29, %v823_v11 }
 0x171   :  { %v1698_v7 = vadd.f32 %v1696_v1, %v3982_v14  ;;  %v1704_v45 = vadd.f32 %v1702_v38, %v3985_v56  ;;  %v824_v36 = vsel %vm57_vm3, %v822_v33, 0.0  ;;  %v1709_v59 = vadd.f32 %v4011_v46, %v1691_v25  ;;  %v1724_v37 = vpop.permute.xlu0 %1723 }
 0x172   :  { %v829_v15 = vadd.f32 %v827_v26, %v4017_v53  ;;  %v835_v13 = vadd.f32 %v833_v6, %v4020_v43  ;;  %v841_v51 = vadd.f32 %v839_v42, %v4023_v35  ;;  %v828_v27 = vmul.f32 %v3962_v41, %v824_v36 }
 0x173   :  { %v834_v11 = vmul.f32 %v3965_v31, %v824_v36  ;;  %v840_v14 = vmul.f32 %v4007_v29, %v824_v36  ;;  %v1715_v56 = vadd.f32 %v4027_v57, %v1697_v28  ;;  %v1721_v10 = vadd.f32 %v4031_v40, %v1703_v17  ;;  %v1726_v57 = vpop.permute.xlu1 %1725 }
 0x174   :  { %v853_v21 = vadd.f32 %v3996_v3, %v829_v15  ;;  %v859_v46 = vadd.f32 %v4001_v49, %v835_v13  ;;  %v865_v53 = vadd.f32 %v4004_v8, %v841_v51  ;;  %v830_v43 = vadd.f32 %v828_v27, %v3977_v16  ;;  %v4648_v51 = vld [vmem:[#allocation28_spill] sm:$0xff] }
 0x175   :  { %v836_v35 = vadd.f32 %v834_v11, %v3988_v19  ;;  %v842_v25 = vadd.f32 %v840_v14, %v3991_v5  ;;  %v1727_v1 = vsel %vm57_vm3, %v1724_v37, 0.0  ;;  %v1710_v38 = vadd.f32 %v4035_v60, %v1692_v44  ;;  %v915_v33 = vpop.permute.xlu0 %914 }
 0x176   :  { %v854_v40 = vadd.f32 %v4055_v47, %v830_v43  ;;  %v1731_v3 = vmul.f32 %v1727_v1, %v3962_v41  ;;  %v1737_v49 = vmul.f32 %v1727_v1, %v3965_v31  ;;  %v1743_v8 = vmul.f32 %v1727_v1, %v4007_v29 }
 0x177   :  { %v860_v16 = vadd.f32 %v4058_v52, %v836_v35  ;;  %v866_v19 = vadd.f32 %v4069_v20, %v842_v25  ;;  %v1716_v5 = vadd.f32 %v4039_v54, %v1698_v7  ;;  %v1722_v17 = vadd.f32 %v4043_v63, %v1704_v45  ;;  %v4646_v52 = vld [vmem:[#allocation27_spill] sm:$0xff]  ;;  %v4647_v7 = vld [vmem:[#allocation29_spill] sm:$0xff]  ;;  %v917_v37 = vpop.permute.xlu1 %916 }
 0x178   :  { %v1733_v28 = vadd.f32 %v1731_v3, %v1709_v59  ;;  %v1739_v26 = vadd.f32 %v1737_v49, %v1715_v56  ;;  %v1745_v60 = vadd.f32 %v1743_v8, %v1721_v10  ;;  %v1728_v47 = vsel %vm57_vm3, %v1726_v57, 0.0  ;;  %v4653_v8 = vld [vmem:[#allocation30_spill] sm:$0xff] }
 0x179   :  { %v1732_v44 = vmul.f32 %v1728_v47, %v3962_v41  ;;  %v1738_v6 = vmul.f32 %v1728_v47, %v3965_v31  ;;  %v1744_v42 = vmul.f32 %v1728_v47, %v4007_v29  ;;  %v871_v36 = vadd.f32 %v4646_v52, %v853_v21  ;;  %v4650_v21 = vld [vmem:[#allocation34_spill] sm:$0xff]  ;;  %v4655_v52 = vld [vmem:[#allocation31_spill] sm:$0xff] }
 0x17a   :  { %v1757_v20 = vadd.f32 %v4169_v61, %v1733_v28  ;;  %v1763_v54 = vadd.f32 %v4172_v24, %v1739_v26  ;;  %v1769_v63 = vadd.f32 %v4175_v18, %v1745_v60  ;;  %v877_v45 = vadd.f32 %v4647_v7, %v859_v46  ;;  %v4649_v61 = vld [vmem:[#allocation35_spill] sm:$0xff]  ;;  %v4654_v60 = vld [vmem:[#allocation52_spill] sm:$0xff] }
 0x17b   :  { %v1734_v59 = vadd.f32 %v1732_v44, %v1710_v38  ;;  %v1740_v15 = vadd.f32 %v1738_v6, %v1716_v5  ;;  %v1746_v13 = vadd.f32 %v1744_v42, %v1722_v17  ;;  %v883_v41 = vadd.f32 %v4648_v51, %v865_v53  ;;  %v4651_v38 = vld [vmem:[#allocation49_spill] sm:$0xff] }
 0x17c   :  { %v895_v31 = vadd.f32 %v4187_v48, %v871_v36  ;;  %v901_v29 = vadd.f32 %v4193_v0, %v877_v45  ;;  %v918_v27 = vsel %vm58_vm6, %v915_v33, 0.0  ;;  %v872_v11 = vadd.f32 %v4649_v61, %v854_v40  ;;  %v4656_v36 = vld [vmem:[#allocation32_spill] sm:$0xff] }
 0x17d   :  { %v1758_v24 = vadd.f32 %v4157_v34, %v1734_v59  ;;  %v1764_v18 = vadd.f32 %v4160_v39, %v1740_v15  ;;  %v1770_v14 = vadd.f32 %v4163_v30, %v1746_v13  ;;  %v907_v56 = vadd.f32 %v4196_v32, %v883_v41  ;;  %v1819_v30 = vpop.permute.xlu0 %1818  ;;  %v1821_v5 = vpop.permute.xlu1 %1820  ;;  %v4658_v13 = vld [vmem:[#allocation38_spill] sm:$0xff] }
 0x17e   :  { %v922_v10 = vmul.f32 %v4046_v9, %v918_v27  ;;  %v928_v48 = vmul.f32 %v4049_v12, %v918_v27  ;;  %v934_v0 = vmul.f32 %v4052_v22, %v918_v27  ;;  %v878_v46 = vadd.f32 %v4650_v21, %v860_v16  ;;  %v4661_v27 = vld [vmem:[#allocation51_spill] sm:$0xff] }
 0x17f   :  { %v884_v53 = vadd.f32 %v3914_v55, %v866_v19  ;;  %v896_v43 = vadd.f32 %v4178_v58, %v872_v11  ;;  %v919_v34 = vsel %vm58_vm6, %v917_v37, 0.0  ;;  %v1775_v39 = vadd.f32 %v4062_v23, %v1757_v20  ;;  %v4652_v58 = vld [vmem:[#allocation36_spill] sm:$0xff] }
 0x180   :  { %v924_v35 = vadd.f32 %v922_v10, %v895_v31  ;;  %v930_v32 = vadd.f32 %v928_v48, %v901_v29  ;;  %v936_v25 = vadd.f32 %v934_v0, %v907_v56  ;;  %v902_v1 = vadd.f32 %v4181_v50, %v878_v46  ;;  %v4660_v31 = vld [vmem:[#allocation105_spill] sm:$0xff]  ;;  %v4663_v56 = vld [vmem:[#allocation40_spill] sm:$0xff] }
 0x181   :  { %v908_v57 = vadd.f32 %v4651_v38, %v884_v53  ;;  %v923_v40 = vmul.f32 %v4046_v9, %v919_v34  ;;  %v929_v3 = vmul.f32 %v4049_v12, %v919_v34  ;;  %v935_v55 = vmul.f32 %v4052_v22, %v919_v34  ;;  %v957_v15 = vpop.permute.xlu0 %956  ;;  %v959_v48 = vpop.permute.xlu1 %958  ;;  %v4664_v46 = vld [vmem:[#allocation44_spill] sm:$0xff] }
 0x182   :  { %v1781_v49 = vadd.f32 %v4652_v58, %v1763_v54  ;;  %v1787_v16 = vadd.f32 %v4653_v8, %v1769_v63  ;;  %v1799_v23 = vadd.f32 %v4213_v4, %v1775_v39  ;;  %v1822_v19 = vsel %vm58_vm6, %v1819_v30, 0.0  ;;  %v4657_v54 = vld [vmem:[#allocation37_spill] sm:$0xff] }
 0x183   :  { %v925_v17 = vadd.f32 %v923_v40, %v896_v43  ;;  %v931_v50 = vadd.f32 %v929_v3, %v902_v1  ;;  %v937_v28 = vadd.f32 %v935_v55, %v908_v57  ;;  %v1826_v26 = vmul.f32 %v1822_v19, %v4046_v9  ;;  %v4665_v43 = vld [vmem:[#allocation16_spill] sm:$0xff]  ;;  %v4670_v40 = vld [vmem:[#allocation18_spill] sm:$0xff] }
 0x184   :  { %v1805_v47 = vadd.f32 %v4654_v60, %v1781_v49  ;;  %v1811_v44 = vadd.f32 %v4221_v2, %v1787_v16  ;;  %v1832_v6 = vmul.f32 %v1822_v19, %v4049_v12  ;;  %v1838_v42 = vmul.f32 %v1822_v19, %v4052_v22  ;;  %v4659_v2 = vld [vmem:[#allocation50_spill] sm:$0xff] }
 0x185   :  { %v1828_v33 = vadd.f32 %v1826_v26, %v1799_v23  ;;  %v1776_v4 = vadd.f32 %v4655_v52, %v1758_v24  ;;  %v1782_v20 = vadd.f32 %v4656_v36, %v1764_v18  ;;  %v1788_v63 = vadd.f32 %v4657_v54, %v1770_v14  ;;  %v4662_v18 = vld [vmem:[#allocation39_spill] sm:$0xff]  ;;  %v1861_v16 = vpop.permute.xlu0 %1860 }
 0x186   :  { %v1834_v7 = vadd.f32 %v1832_v6, %v1805_v47  ;;  %v1840_v45 = vadd.f32 %v1838_v42, %v1811_v44  ;;  %v1823_v59 = vsel %vm58_vm6, %v1821_v5, 0.0  ;;  %v942_v51 = vadd.f32 %v4658_v13, %v924_v35  ;;  %v4671_v5 = vld [vmem:[#allocation45_spill] sm:$0xff]  ;;  %v2107_v47 = vld [vmem:[#allocation2 + $0x28] sm:$0xff] }
 0x187   :  { %v1800_v41 = vadd.f32 %v4659_v2, %v1776_v4  ;;  %v1806_v29 = vadd.f32 %v4660_v31, %v1782_v20  ;;  %v1812_v37 = vadd.f32 %v4661_v27, %v1788_v63  ;;  %v1827_v61 = vmul.f32 %v1823_v59, %v4046_v9  ;;  %v4666_v9 = vld [vmem:[#allocation41_spill] sm:$0xff]  ;;  %v4673_v20 = vld [vmem:[#allocation47_spill] sm:$0xff]  ;;  %v1863_v63 = vpop.permute.xlu1 %1862  ;;  %v2111_v2 = vld [vmem:[#allocation2 + $0x50] sm:$0xff] }
 0x188   :  { %v1833_v11 = vmul.f32 %v1823_v59, %v4049_v12  ;;  %v1839_v24 = vmul.f32 %v1823_v59, %v4052_v22  ;;  %v948_v14 = vadd.f32 %v4662_v18, %v930_v32  ;;  %v954_v10 = vadd.f32 %v4663_v56, %v936_v25  ;;  %v4667_v12 = vld [vmem:[#allocation42_spill] sm:$0xff]  ;;  %v4668_v22 = vld [vmem:[#allocation43_spill] sm:$0xff]  ;;  %v4669_v32 = vld [vmem:[#allocation17_spill] sm:$0xff] }
 0x189   :  { %v1829_v0 = vadd.f32 %v1827_v61, %v1800_v41  ;;  %v960_v21 = vsel %vm57_vm3, %v957_v15, 0.0  ;;  %v943_v53 = vadd.f32 %v4664_v46, %v925_v17  ;;  %v949_v34 = vadd.f32 %v4665_v43, %v931_v50  ;;  %v4672_v50 = vld [vmem:[#allocation46_spill] sm:$0xff]  ;;  %v2113_v46 = vld [vmem:[#allocation2 + $0x88] sm:$0xff] }
 0x18a   :  { %v1835_v39 = vadd.f32 %v1833_v11, %v1806_v29  ;;  %v1841_v30 = vadd.f32 %v1839_v24, %v1812_v37  ;;  %v964_v35 = vmul.f32 %v4666_v9, %v960_v21  ;;  %v970_v1 = vmul.f32 %v4667_v12, %v960_v21  ;;  %v4674_v29 = vld [vmem:[#allocation101_spill] sm:$0xff]  ;;  %v4675_v37 = vld [vmem:[#allocation48_spill] sm:$0xff]  ;;  %v2114_v43 = vld [vmem:[#allocation2 + $0xa8] sm:$0xff] }
 0x18b   :  { %v976_v38 = vmul.f32 %v4668_v22, %v960_v21  ;;  %v955_v57 = vadd.f32 %v4669_v32, %v937_v28  ;;  %v961_v25 = vsel %vm57_vm3, %v959_v48, 0.0  ;;  %v1846_v3 = vadd.f32 %v4670_v40, %v1828_v33  ;;  %v2106_v28 = vld [vmem:[#allocation2 + $0x8] sm:$0xff] }
 0x18c   :  { %v966_v55 = vadd.f32 %v964_v35, %v942_v51  ;;  %v972_v58 = vadd.f32 %v970_v1, %v948_v14  ;;  %v965_v49 = vmul.f32 %v4666_v9, %v961_v25  ;;  %v971_v8 = vmul.f32 %v4667_v12, %v961_v25  ;;  %v2108_v33 = vld [vmem:[#allocation2 + $0x48] sm:$0xff]  ;;  %v2115_v35 = vld [vmem:[#allocation2 + $0x70] sm:$0xff] }
 0x18d   :  { %v978_v23 = vadd.f32 %v976_v38, %v954_v10  ;;  %v977_v19 = vmul.f32 %v4668_v22, %v961_v25  ;;  %v1852_v17 = vadd.f32 %v4671_v5, %v1834_v7  ;;  %v1858_v26 = vadd.f32 %v4672_v50, %v1840_v45  ;;  %v2109_v7 = vld [vmem:[#allocation2 + $0x10] sm:$0xff] }
 0x18e   :  { %v980_v60 = vadd.f32 %v2106_v28, %v966_v55  ;;  %v982_v44 = vadd.f32 %v2107_v47, %v972_v58  ;;  %v967_v6 = vadd.f32 %v965_v49, %v943_v53  ;;  %v973_v42 = vadd.f32 %v971_v8, %v949_v34  ;;  %v2110_v45 = vld [vmem:[#allocation2 + $0x30] sm:$0xff] }
 0x18f   :  { %v984_v52 = vadd.f32 %v2108_v33, %v978_v23  ;;  %v979_v4 = vadd.f32 %v977_v19, %v955_v57  ;;  %v1864_v36 = vsel %vm57_vm3, %v1861_v16, 0.0  ;;  %v1847_v54 = vadd.f32 %v4673_v20, %v1829_v0  ;;  %v2112_v0 = vld [vmem:[#allocation2 + $0x68] sm:$0xff]  ;;  %v2116_v1 = vld [vmem:[#allocation2 + $0x90] sm:$0xff] }
 0x190   :  { %986 = vst [vmem:[#allocation9] sm:$0xff] %v980_v60  ;;  %988 = vst [vmem:[#allocation9 + $0x10] sm:$0xff] %v982_v44  ;;  %v981_v59 = vadd.f32 %v2109_v7, %v967_v6  ;;  %v983_v15 = vadd.f32 %v2110_v45, %v973_v42  ;;  %v1868_v13 = vmul.f32 %v1864_v36, %v4666_v9  ;;  %v1865_v18 = vsel %vm57_vm3, %v1863_v63, 0.0  ;;  %v2117_v38 = vld [vmem:[#allocation2 + $0xb0] sm:$0xff] }
 0x191   :  { %v1874_v51 = vmul.f32 %v1864_v36, %v4667_v12  ;;  %990 = vst [vmem:[#allocation9 + $0x20] sm:$0xff] %v984_v52  ;;  %v985_v41 = vadd.f32 %v2111_v2, %v979_v4  ;;  %v1880_v31 = vmul.f32 %v1864_v36, %v4668_v22  ;;  %v1853_v27 = vadd.f32 %v4674_v29, %v1835_v39 }
 0x192   :  { %v1859_v61 = vadd.f32 %v4675_v37, %v1841_v30  ;;  %987 = vst [vmem:[#allocation9 + $0x8] sm:$0xff] %v981_v59  ;;  %989 = vst [vmem:[#allocation9 + $0x18] sm:$0xff] %v983_v15  ;;  %v1870_v11 = vadd.f32 %v1868_v13, %v1846_v3  ;;  %v1869_v56 = vmul.f32 %v1865_v18, %v4666_v9 }
 0x193   :  { %v1876_v24 = vadd.f32 %v1874_v51, %v1852_v17  ;;  %991 = vst [vmem:[#allocation9 + $0x28] sm:$0xff] %v985_v41  ;;  %v1882_v14 = vadd.f32 %v1880_v31, %v1858_v26  ;;  %v1875_v10 = vmul.f32 %v1865_v18, %v4667_v12  ;;  %v1881_v48 = vmul.f32 %v1865_v18, %v4668_v22 }
 0x194   :  { %v1884_v21 = vadd.f32 %v2112_v0, %v1870_v11  ;;  %v1871_v39 = vadd.f32 %v1869_v56, %v1847_v54 }
 0x195   :  { %v1886_v53 = vadd.f32 %v2113_v46, %v1876_v24  ;;  %v1888_v34 = vadd.f32 %v2114_v43, %v1882_v14  ;;  %v1877_v30 = vadd.f32 %v1875_v10, %v1853_v27  ;;  %v1883_v62 = vadd.f32 %v1881_v48, %v1859_v61 }
 0x196   :  { %1891 = vst [vmem:[#allocation9 + $0x30] sm:$0xff] %v1884_v21  ;;  %v1885_v9 = vadd.f32 %v2115_v35, %v1871_v39 }
 0x197   :  { %1893 = vst [vmem:[#allocation9 + $0x40] sm:$0xff] %v1886_v53  ;;  %1895 = vst [vmem:[#allocation9 + $0x50] sm:$0xff] %v1888_v34  ;;  %v1887_v12 = vadd.f32 %v2116_v1, %v1877_v30  ;;  %v1889_v22 = vadd.f32 %v2117_v38, %v1883_v62 }
 0x198   :  { %1892 = vst [vmem:[#allocation9 + $0x38] sm:$0xff] %v1885_v9 }
 0x199   :  { %1894 = vst [vmem:[#allocation9 + $0x48] sm:$0xff] %v1887_v12  ;;  %1896 = vst [vmem:[#allocation9 + $0x58] sm:$0xff] %v1889_v22 }
 0x19a   :  { %2173 = shalt.err (!%p2170_p5)
}
 0x19b   :  { %1908 = dma.vmem_to_hbm [thread:$0]  %s1903_s4, 1536, %s4361_s3, [#allocation4], %s2191_s18, %s2191_s18, %s2192_s19  }
 0x19c   :  { %2188 = dma.done.wait [#allocation4], 1536  }
 0x19d   :  { %2189 = vsyncadd [#allocation4], 4294965760 }
 0x19e   :  { %1912 = vsyncpa [#allocation3], 1 }
 0x19f   :  { %1913 = vsyncpa [#allocation4], 1 }
 0x1a0   :  { %1914 = vsyncpa [#allocation5], 1 }
 0x1a1   :  { %1915 = vsyncpa [#allocation8], 1 }

</bundles_post_ra>
